<compile_context>
chip_gen: v5e
topology: v5e:2x2
jax: 0.10.0
libtpu: 0.0.40
codegen_flags: <defaults>
</compile_context>

<pallas_src>
import functools

import jax
import jax.numpy as jnp
from jax.experimental import pallas as pl
from jax.experimental.pallas import tpu as pltpu

EPS = 1e-5                       # nn.BatchNorm2d default eps
LANE = 128                       # channel padding granularity (TPU lanes)
SUBLANE = 8
TCO = 128                        # cout tile (lane-dense output)
VMEM_LIMIT = 32 * 1024 * 1024    # explicit scoped-VMEM budget (ok on v5e/v6e/v7x)


def _round_up(x, m):
    return ((x + m - 1) // m) * m


# ----------------------------- Pallas kernels ------------------------------

def _fused_conv_kernel(x_ref, w_ref, b_ref, o_ref, *, taps, m_rows):
    """Fused RepVGG block: 9-tap 3x3 conv + bias + ReLU for one image.

    x_ref: (s, L, Cin)   bf16  stride-phase planes of the padded image
    w_ref: (9, Cin, TCO) bf16  folded 3x3 weight, tap-major (kh, kw)
    b_ref: (1, TCO)      f32   folded bias
    o_ref: (m_rows, TCO) bf16  flattened output rows (row pitch = padded W)
    """
    tco = b_ref.shape[-1]
    # Bias is the accumulator init (hoisted out of the tap loop).
    acc = jnp.broadcast_to(b_ref[...], (m_rows, tco)).astype(jnp.float32)
    for k, (phase, start) in enumerate(taps):     # 9 static taps, unrolled
        xk = x_ref[phase, pl.ds(start, m_rows), :]            # (m_rows, Cin)
        acc = acc + jnp.dot(xk, w_ref[k],
                            preferred_element_type=jnp.float32)
    o_ref[...] = jnp.maximum(acc, 0.0).astype(o_ref.dtype)


def _gap_linear_kernel(x_ref, w_ref, b_ref, o_ref, *, inv_hw):
    """AdaptiveAvgPool2d(1) + flatten + Linear (sum * 1/HW, then matmul)."""
    x = x_ref[...].astype(jnp.float32)                        # (N, HW, C)
    pooled = jnp.sum(x, axis=1) * inv_hw                      # (N, C)
    out = jnp.dot(pooled, w_ref[...], preferred_element_type=jnp.float32)
    o_ref[...] = out + b_ref[...]


# ------------------------------ block wrapper -------------------------------

def fused_repvgg_block(x_nhwc, w_taps, bias, stride):
    """Apply one folded RepVGG block to a channel-padded NHWC bf16 tensor."""
    n, h, w_dim, cin_p = x_nhwc.shape
    cout_p = w_taps.shape[2]
    hp, wp = h + 2, w_dim + 2
    ho = (h - 1) // stride + 1
    wo = (w_dim - 1) // stride + 1

    # Output rows are indexed m = ho*wp + wo (row pitch = padded width wp);
    # columns wo..wp-1 of each row are junk and sliced off afterwards.
    m_rows = _round_up(ho * wp, SUBLANE)
    o_max = 2 * wp + 2
    plane_len = _round_up(m_rows + o_max // stride + 1, SUBLANE)

    # Glue (fuses under jit): spatial pad -> flatten H*W -> split the flat
    # axis into `stride` phase planes (total bytes ~1x the activation).
    xp = jnp.pad(x_nhwc, ((0, 0), (1, 1), (1, 1), (0, 0)))
    flat = xp.reshape(n, hp * wp, cin_p)
    phase_planes = []
    for p in range(stride):
        ph = flat[:, p::stride, :]
        assert plane_len >= ph.shape[1]
        ph = jnp.pad(ph, ((0, 0), (0, plane_len - ph.shape[1]), (0, 0)))
        phase_planes.append(ph)
    planes = jnp.stack(phase_planes, axis=1)                  # (n, s, L, cin_p)

    # Tap (kh, kw) reads flat index stride*m + o with o = kh*wp + kw, i.e.
    # phase plane (o % stride) at unit-stride offset (o // stride).
    taps = tuple(((kh * wp + kw) % stride, (kh * wp + kw) // stride)
                 for kh in range(3) for kw in range(3))

    n_co = cout_p // TCO
    kernel = functools.partial(_fused_conv_kernel, taps=taps, m_rows=m_rows)
    bytes_accessed = (planes.size * planes.dtype.itemsize
                      + w_taps.size * w_taps.dtype.itemsize
                      + bias.size * bias.dtype.itemsize
                      + n * m_rows * cout_p * 2)

    out_flat = pl.pallas_call(
        kernel,
        out_shape=jax.ShapeDtypeStruct((n, m_rows, cout_p), jnp.bfloat16),
        grid=(n, n_co),
        in_specs=[
            # whole padded image per batch element; constant across cout tiles
            pl.BlockSpec((None, stride, plane_len, cin_p),
                         lambda i, j: (i, 0, 0, 0)),
            # weight tile: constant across batch, resident when n_co == 1
            pl.BlockSpec((9, cin_p, TCO), lambda i, j: (0, 0, j)),
            pl.BlockSpec((1, TCO), lambda i, j: (0, j)),
        ],
        out_specs=pl.BlockSpec((None, m_rows, TCO), lambda i, j: (i, 0, j)),
        compiler_params=pltpu.CompilerParams(
            dimension_semantics=("parallel", "parallel"),
            vmem_limit_bytes=VMEM_LIMIT),
        cost_estimate=pl.CostEstimate(
            flops=2 * n * m_rows * 9 * cin_p * cout_p,
            transcendentals=0,
            bytes_accessed=int(bytes_accessed)),
    )(planes, w_taps, bias)

    # Drop the junk columns (row pitch wp -> valid wo); fuses with the next
    # block's pad/flatten under jit.
    out = out_flat[:, :ho * wp, :].reshape(n, ho, wp, cout_p)[:, :, :wo, :]
    return out


def gap_linear(x_nhwc, w, b):
    """AdaptiveAvgPool2d(1) + flatten + Linear, fused in one Pallas kernel."""
    # TODO(synk): tile the HW axis with an accumulator for large feature maps.
    n, h, w_dim, c = x_nhwc.shape
    hw = h * w_dim
    x = x_nhwc.reshape(n, hw, c)
    ncls_p = w.shape[1]
    kernel = functools.partial(_gap_linear_kernel, inv_hw=1.0 / hw)
    bytes_accessed = (x.size * x.dtype.itemsize + w.size * 4 + b.size * 4
                      + n * ncls_p * 4)
    return pl.pallas_call(
        kernel,
        out_shape=jax.ShapeDtypeStruct((n, ncls_p), jnp.float32),
        grid=(1,),
        in_specs=[
            pl.BlockSpec((n, hw, c), lambda i: (0, 0, 0)),
            pl.BlockSpec((c, ncls_p), lambda i: (0, 0)),
            pl.BlockSpec((1, ncls_p), lambda i: (0, 0)),
        ],
        out_specs=pl.BlockSpec((n, ncls_p), lambda i: (0, 0)),
        compiler_params=pltpu.CompilerParams(
            dimension_semantics=("arbitrary",),
            vmem_limit_bytes=VMEM_LIMIT),
        cost_estimate=pl.CostEstimate(
            flops=2 * n * c * ncls_p + n * hw * c,
            transcendentals=0,
            bytes_accessed=int(bytes_accessed)),
    )(x, w, b)


# --------------------------- parameter building ----------------------------

def _init_bn(key, c):
    k1, k2, k3, k4 = jax.random.split(key, 4)
    gamma = jax.random.uniform(k1, (c,), jnp.float32, 0.5, 1.5)
    beta = 0.1 * jax.random.normal(k2, (c,), jnp.float32)
    mean = 0.1 * jax.random.normal(k3, (c,), jnp.float32)
    var = jax.random.uniform(k4, (c,), jnp.float32, 0.5, 1.5)
    return gamma, beta, mean, var


def _fold_bn(w_oihw, gamma, beta, mean, var):
    t = gamma / jnp.sqrt(var + EPS)
    return w_oihw * t[:, None, None, None], beta - mean * t


def init_repvgg_block(key, cin, cout, stride):
    """Fold 3x3+BN, 1x1+BN and identity-BN into one 3x3 conv (+bias)."""
    keys = jax.random.split(key, 5)
    w3 = ((2.0 / (cin * 9)) ** 0.5) * jax.random.normal(
        keys[0], (cout, cin, 3, 3), jnp.float32)
    w1 = ((2.0 / cin) ** 0.5) * jax.random.normal(
        keys[1], (cout, cin, 1, 1), jnp.float32)

    w3f, b3 = _fold_bn(w3, *_init_bn(keys[2], cout))          # rbr_dense
    w1f, b1 = _fold_bn(w1, *_init_bn(keys[3], cout))          # rbr_1x1
    w1f_3x3 = jnp.zeros((cout, cin, 3, 3), jnp.float32)
    w1f_3x3 = w1f_3x3.at[:, :, 1, 1].set(w1f[:, :, 0, 0])

    w_fused = w3f + w1f_3x3
    b_fused = b3 + b1

    if cin == cout and stride == 1:                           # rbr_identity
        gamma, beta, mean, var = _init_bn(keys[4], cout)
        t = gamma / jnp.sqrt(var + EPS)
        wid = jnp.zeros((cout, cin, 3, 3), jnp.float32)
        wid = wid.at[jnp.arange(cout), jnp.arange(cin), 1, 1].set(t)
        w_fused = w_fused + wid
        b_fused = b_fused + (beta - mean * t)

    cin_p = _round_up(cin, LANE)
    cout_p = _round_up(cout, LANE)
    # OIHW -> (kh, kw, cin, cout), zero-pad channels to lane multiples,
    # reshape tap-major (9, cin_p, cout_p); cast weights to bf16, bias f32.
    w_t = jnp.transpose(w_fused, (2, 3, 1, 0))
    w_t = jnp.pad(w_t, ((0, 0), (0, 0), (0, cin_p - cin), (0, cout_p - cout)))
    w_taps = w_t.reshape(9, cin_p, cout_p).astype(jnp.bfloat16)
    b_pad = jnp.pad(b_fused, (0, cout_p - cout)).reshape(1, cout_p)
    return {"w": w_taps, "b": b_pad.astype(jnp.float32)}, stride


def build_repvgg(key, num_blocks, num_classes, width_multiplier):
    assert len(width_multiplier) == 4
    in_planes = min(64, int(64 * width_multiplier[0]))

    block_params, strides = [], []
    key, k0 = jax.random.split(key)
    p, s = init_repvgg_block(k0, 3, in_planes, 2)             # stage0
    block_params.append(p)
    strides.append(s)
    cur_in = in_planes

    stage_planes = [int(64 * width_multiplier[0]),
                    int(128 * width_multiplier[1]),
                    int(256 * width_multiplier[2]),
                    int(512 * width_multiplier[3])]
    for planes, nb in zip(stage_planes, num_blocks):
        for st in [2] + [1] * (nb - 1):
            key, kb = jax.random.split(key)
            p, s = init_repvgg_block(kb, cur_in, planes, st)
            block_params.append(p)
            strides.append(s)
            cur_in = planes

    cin_p = _round_up(cur_in, LANE)
    ncls_p = _round_up(num_classes, LANE)
    key, kw, kb = jax.random.split(key, 3)
    scale = (1.0 / cur_in) ** 0.5
    wl = scale * jax.random.normal(kw, (cur_in, num_classes), jnp.float32)
    bl = scale * jax.random.normal(kb, (1, num_classes), jnp.float32)
    wl = jnp.pad(wl, ((0, cin_p - cur_in), (0, ncls_p - num_classes)))
    bl = jnp.pad(bl, ((0, 0), (0, ncls_p - num_classes)))
    params = {"blocks": block_params, "head": (wl, bl)}
    return params, tuple(strides)


# --------------------------------- forward ----------------------------------

def repvgg_forward(x_nchw, params, *, strides, num_classes):
    assert x_nchw.shape[1] == 3, "first input channel equal 3"
    x = jnp.transpose(x_nchw, (0, 2, 3, 1))                   # NCHW -> NHWC
    cin_p = params["blocks"][0]["w"].shape[1]
    x = jnp.pad(x, ((0, 0), (0, 0), (0, 0), (0, cin_p - x.shape[-1])))
    x = x.astype(jnp.bfloat16)
    for blk, stride in zip(params["blocks"], strides):
        x = fused_repvgg_block(x, blk["w"], blk["b"], stride)
    wl, bl = params["head"]
    logits = gap_linear(x, wl, bl)                            # (N, ncls_pad)
    return logits[:, :num_classes]


# --------------------------------- main --------------------------------------

if __name__ == "__main__":
    key = jax.random.PRNGKey(0)
    kx, kp = jax.random.split(key)

    # small synthetic config: RepVGG(num_blocks=[2,2,1,1], num_classes=10,
    #                                width_multiplier=[0.25]*4), batch=2, 16x16
    x = jax.random.normal(kx, (2, 3, 16, 16), jnp.float32)    # NCHW like PyTorch
    params, strides = build_repvgg(
        kp, num_blocks=[2, 2, 1, 1], num_classes=10,
        width_multiplier=[0.25, 0.25, 0.25, 0.25],
    )

    fwd = jax.jit(functools.partial(repvgg_forward, strides=strides,
                                    num_classes=10))
    out = jax.block_until_ready(fwd(x, params))
    assert out.shape == (2, 10) and out.dtype == jnp.float32
    print("KERNEL_OK")
</pallas_src>

<mosaic_0001>
module attributes {stable_mosaic.version = 11 : i64} {
  func.func @_fused_conv_kernel(%arg0: i32, %arg1: i32, %arg2: memref<1x2x168x128xbf16, #tpu.memory_space<vmem>>, %arg3: memref<9x128x128xbf16, #tpu.memory_space<vmem>>, %arg4: memref<1x128xf32, #tpu.memory_space<vmem>>, %arg5: memref<1x144x128xbf16, #tpu.memory_space<vmem>>) attributes {dimension_semantics = [#tpu.dimension_semantics<parallel>, #tpu.dimension_semantics<parallel>], iteration_bounds = array<i64: 2, 1>, scalar_prefetch = 0 : i64, scratch_operands = 0 : i64, tpu.core_type = #tpu.core_type<tc>, window_params = [{transform_indices = @transform_0, window_bounds = array<i64: 1, 2, 168, 128>}, {transform_indices = @transform_1, window_bounds = array<i64: 9, 128, 128>}, {transform_indices = @transform_2, window_bounds = array<i64: 1, 128>}, {transform_indices = @transform_3, window_bounds = array<i64: 1, 144, 128>}]} {
    %c0 = arith.constant 0 : index
    %c0_0 = arith.constant 0 : index
    %0 = vector.load %arg4[%c0, %c0_0] : memref<1x128xf32, #tpu.memory_space<vmem>>, vector<1x128xf32>
    %1 = vector.shape_cast %0 : vector<1x128xf32> to vector<1x128xf32>
    %2 = vector.broadcast %1 : vector<1x128xf32> to vector<144x128xf32>
    %c0_1 = arith.constant 0 : index
    %c0_2 = arith.constant 0 : index
    %c0_3 = arith.constant 0 : index
    %c0_4 = arith.constant 0 : index
    %3 = vector.load %arg2[%c0_1, %c0_2, %c0_3, %c0_4] : memref<1x2x168x128xbf16, #tpu.memory_space<vmem>>, vector<1x1x144x128xbf16>
    %4 = vector.shape_cast %3 : vector<1x1x144x128xbf16> to vector<144x128xbf16>
    %c0_5 = arith.constant 0 : index
    %c0_6 = arith.constant 0 : index
    %c0_7 = arith.constant 0 : index
    %5 = vector.load %arg3[%c0_5, %c0_6, %c0_7] : memref<9x128x128xbf16, #tpu.memory_space<vmem>>, vector<1x128x128xbf16>
    %6 = vector.shape_cast %5 : vector<1x128x128xbf16> to vector<128x128xbf16>
    %cst = arith.constant dense<0.000000e+00> : vector<144x128xf32>
    %7 = tpu.matmul %4, %6, %cst {dimension_numbers = #tpu.dot_dimension_numbers<[1], [0], [0], [1], [0, 0, 1, 1], [], []>} : vector<144x128xbf16>, vector<128x128xbf16>, vector<144x128xf32> -> vector<144x128xf32>
    %8 = arith.addf %2, %7 : vector<144x128xf32>
    %c0_8 = arith.constant 0 : index
    %c1 = arith.constant 1 : index
    %c0_9 = arith.constant 0 : index
    %c0_10 = arith.constant 0 : index
    %9 = vector.load %arg2[%c0_8, %c1, %c0_9, %c0_10] : memref<1x2x168x128xbf16, #tpu.memory_space<vmem>>, vector<1x1x144x128xbf16>
    %10 = vector.shape_cast %9 : vector<1x1x144x128xbf16> to vector<144x128xbf16>
    %c1_11 = arith.constant 1 : index
    %c0_12 = arith.constant 0 : index
    %c0_13 = arith.constant 0 : index
    %11 = vector.load %arg3[%c1_11, %c0_12, %c0_13] : memref<9x128x128xbf16, #tpu.memory_space<vmem>>, vector<1x128x128xbf16>
    %12 = vector.shape_cast %11 : vector<1x128x128xbf16> to vector<128x128xbf16>
    %cst_14 = arith.constant dense<0.000000e+00> : vector<144x128xf32>
    %13 = tpu.matmul %10, %12, %cst_14 {dimension_numbers = #tpu.dot_dimension_numbers<[1], [0], [0], [1], [0, 0, 1, 1], [], []>} : vector<144x128xbf16>, vector<128x128xbf16>, vector<144x128xf32> -> vector<144x128xf32>
    %14 = arith.addf %8, %13 : vector<144x128xf32>
    %c0_15 = arith.constant 0 : index
    %c0_16 = arith.constant 0 : index
    %c1_17 = arith.constant 1 : index
    %c0_18 = arith.constant 0 : index
    %15 = vector.load %arg2[%c0_15, %c0_16, %c1_17, %c0_18] : memref<1x2x168x128xbf16, #tpu.memory_space<vmem>>, vector<1x1x144x128xbf16>
    %16 = vector.shape_cast %15 : vector<1x1x144x128xbf16> to vector<144x128xbf16>
    %c2 = arith.constant 2 : index
    %c0_19 = arith.constant 0 : index
    %c0_20 = arith.constant 0 : index
    %17 = vector.load %arg3[%c2, %c0_19, %c0_20] : memref<9x128x128xbf16, #tpu.memory_space<vmem>>, vector<1x128x128xbf16>
    %18 = vector.shape_cast %17 : vector<1x128x128xbf16> to vector<128x128xbf16>
    %cst_21 = arith.constant dense<0.000000e+00> : vector<144x128xf32>
    %19 = tpu.matmul %16, %18, %cst_21 {dimension_numbers = #tpu.dot_dimension_numbers<[1], [0], [0], [1], [0, 0, 1, 1], [], []>} : vector<144x128xbf16>, vector<128x128xbf16>, vector<144x128xf32> -> vector<144x128xf32>
    %20 = arith.addf %14, %19 : vector<144x128xf32>
    %c0_22 = arith.constant 0 : index
    %c0_23 = arith.constant 0 : index
    %c9 = arith.constant 9 : index
    %c0_24 = arith.constant 0 : index
    %21 = vector.load %arg2[%c0_22, %c0_23, %c9, %c0_24] : memref<1x2x168x128xbf16, #tpu.memory_space<vmem>>, vector<1x1x144x128xbf16>
    %22 = vector.shape_cast %21 : vector<1x1x144x128xbf16> to vector<144x128xbf16>
    %c3 = arith.constant 3 : index
    %c0_25 = arith.constant 0 : index
    %c0_26 = arith.constant 0 : index
    %23 = vector.load %arg3[%c3, %c0_25, %c0_26] : memref<9x128x128xbf16, #tpu.memory_space<vmem>>, vector<1x128x128xbf16>
    %24 = vector.shape_cast %23 : vector<1x128x128xbf16> to vector<128x128xbf16>
    %cst_27 = arith.constant dense<0.000000e+00> : vector<144x128xf32>
    %25 = tpu.matmul %22, %24, %cst_27 {dimension_numbers = #tpu.dot_dimension_numbers<[1], [0], [0], [1], [0, 0, 1, 1], [], []>} : vector<144x128xbf16>, vector<128x128xbf16>, vector<144x128xf32> -> vector<144x128xf32>
    %26 = arith.addf %20, %25 : vector<144x128xf32>
    %c0_28 = arith.constant 0 : index
    %c1_29 = arith.constant 1 : index
    %c9_30 = arith.constant 9 : index
    %c0_31 = arith.constant 0 : index
    %27 = vector.load %arg2[%c0_28, %c1_29, %c9_30, %c0_31] : memref<1x2x168x128xbf16, #tpu.memory_space<vmem>>, vector<1x1x144x128xbf16>
    %28 = vector.shape_cast %27 : vector<1x1x144x128xbf16> to vector<144x128xbf16>
    %c4 = arith.constant 4 : index
    %c0_32 = arith.constant 0 : index
    %c0_33 = arith.constant 0 : index
    %29 = vector.load %arg3[%c4, %c0_32, %c0_33] : memref<9x128x128xbf16, #tpu.memory_space<vmem>>, vector<1x128x128xbf16>
    %30 = vector.shape_cast %29 : vector<1x128x128xbf16> to vector<128x128xbf16>
    %cst_34 = arith.constant dense<0.000000e+00> : vector<144x128xf32>
    %31 = tpu.matmul %28, %30, %cst_34 {dimension_numbers = #tpu.dot_dimension_numbers<[1], [0], [0], [1], [0, 0, 1, 1], [], []>} : vector<144x128xbf16>, vector<128x128xbf16>, vector<144x128xf32> -> vector<144x128xf32>
    %32 = arith.addf %26, %31 : vector<144x128xf32>
    %c0_35 = arith.constant 0 : index
    %c0_36 = arith.constant 0 : index
    %c10 = arith.constant 10 : index
    %c0_37 = arith.constant 0 : index
    %33 = vector.load %arg2[%c0_35, %c0_36, %c10, %c0_37] : memref<1x2x168x128xbf16, #tpu.memory_space<vmem>>, vector<1x1x144x128xbf16>
    %34 = vector.shape_cast %33 : vector<1x1x144x128xbf16> to vector<144x128xbf16>
    %c5 = arith.constant 5 : index
    %c0_38 = arith.constant 0 : index
    %c0_39 = arith.constant 0 : index
    %35 = vector.load %arg3[%c5, %c0_38, %c0_39] : memref<9x128x128xbf16, #tpu.memory_space<vmem>>, vector<1x128x128xbf16>
    %36 = vector.shape_cast %35 : vector<1x128x128xbf16> to vector<128x128xbf16>
    %cst_40 = arith.constant dense<0.000000e+00> : vector<144x128xf32>
    %37 = tpu.matmul %34, %36, %cst_40 {dimension_numbers = #tpu.dot_dimension_numbers<[1], [0], [0], [1], [0, 0, 1, 1], [], []>} : vector<144x128xbf16>, vector<128x128xbf16>, vector<144x128xf32> -> vector<144x128xf32>
    %38 = arith.addf %32, %37 : vector<144x128xf32>
    %c0_41 = arith.constant 0 : index
    %c0_42 = arith.constant 0 : index
    %c18 = arith.constant 18 : index
    %c0_43 = arith.constant 0 : index
    %39 = vector.load %arg2[%c0_41, %c0_42, %c18, %c0_43] : memref<1x2x168x128xbf16, #tpu.memory_space<vmem>>, vector<1x1x144x128xbf16>
    %40 = vector.shape_cast %39 : vector<1x1x144x128xbf16> to vector<144x128xbf16>
    %c6 = arith.constant 6 : index
    %c0_44 = arith.constant 0 : index
    %c0_45 = arith.constant 0 : index
    %41 = vector.load %arg3[%c6, %c0_44, %c0_45] : memref<9x128x128xbf16, #tpu.memory_space<vmem>>, vector<1x128x128xbf16>
    %42 = vector.shape_cast %41 : vector<1x128x128xbf16> to vector<128x128xbf16>
    %cst_46 = arith.constant dense<0.000000e+00> : vector<144x128xf32>
    %43 = tpu.matmul %40, %42, %cst_46 {dimension_numbers = #tpu.dot_dimension_numbers<[1], [0], [0], [1], [0, 0, 1, 1], [], []>} : vector<144x128xbf16>, vector<128x128xbf16>, vector<144x128xf32> -> vector<144x128xf32>
    %44 = arith.addf %38, %43 : vector<144x128xf32>
    %c0_47 = arith.constant 0 : index
    %c1_48 = arith.constant 1 : index
    %c18_49 = arith.constant 18 : index
    %c0_50 = arith.constant 0 : index
    %45 = vector.load %arg2[%c0_47, %c1_48, %c18_49, %c0_50] : memref<1x2x168x128xbf16, #tpu.memory_space<vmem>>, vector<1x1x144x128xbf16>
    %46 = vector.shape_cast %45 : vector<1x1x144x128xbf16> to vector<144x128xbf16>
    %c7 = arith.constant 7 : index
    %c0_51 = arith.constant 0 : index
    %c0_52 = arith.constant 0 : index
    %47 = vector.load %arg3[%c7, %c0_51, %c0_52] : memref<9x128x128xbf16, #tpu.memory_space<vmem>>, vector<1x128x128xbf16>
    %48 = vector.shape_cast %47 : vector<1x128x128xbf16> to vector<128x128xbf16>
    %cst_53 = arith.constant dense<0.000000e+00> : vector<144x128xf32>
    %49 = tpu.matmul %46, %48, %cst_53 {dimension_numbers = #tpu.dot_dimension_numbers<[1], [0], [0], [1], [0, 0, 1, 1], [], []>} : vector<144x128xbf16>, vector<128x128xbf16>, vector<144x128xf32> -> vector<144x128xf32>
    %50 = arith.addf %44, %49 : vector<144x128xf32>
    %c0_54 = arith.constant 0 : index
    %c0_55 = arith.constant 0 : index
    %c19 = arith.constant 19 : index
    %c0_56 = arith.constant 0 : index
    %51 = vector.load %arg2[%c0_54, %c0_55, %c19, %c0_56] : memref<1x2x168x128xbf16, #tpu.memory_space<vmem>>, vector<1x1x144x128xbf16>
    %52 = vector.shape_cast %51 : vector<1x1x144x128xbf16> to vector<144x128xbf16>
    %c8 = arith.constant 8 : index
    %c0_57 = arith.constant 0 : index
    %c0_58 = arith.constant 0 : index
    %53 = vector.load %arg3[%c8, %c0_57, %c0_58] : memref<9x128x128xbf16, #tpu.memory_space<vmem>>, vector<1x128x128xbf16>
    %54 = vector.shape_cast %53 : vector<1x128x128xbf16> to vector<128x128xbf16>
    %cst_59 = arith.constant dense<0.000000e+00> : vector<144x128xf32>
    %55 = tpu.matmul %52, %54, %cst_59 {dimension_numbers = #tpu.dot_dimension_numbers<[1], [0], [0], [1], [0, 0, 1, 1], [], []>} : vector<144x128xbf16>, vector<128x128xbf16>, vector<144x128xf32> -> vector<144x128xf32>
    %56 = arith.addf %50, %55 : vector<144x128xf32>
    %cst_60 = arith.constant 0.000000e+00 : f32
    %57 = vector.broadcast %cst_60 : f32 to vector<144x128xf32>
    %58 = arith.maximumf %56, %57 : vector<144x128xf32>
    %59 = arith.truncf %58 : vector<144x128xf32> to vector<144x128xbf16>
    %c0_61 = arith.constant 0 : index
    %c0_62 = arith.constant 0 : index
    %c0_63 = arith.constant 0 : index
    %60 = vector.load %arg5[%c0_61, %c0_62, %c0_63] : memref<1x144x128xbf16, #tpu.memory_space<vmem>>, vector<1x144x128xbf16>
    %61 = vector.shape_cast %60 : vector<1x144x128xbf16> to vector<144x128xbf16>
    %62 = vector.shape_cast %59 : vector<144x128xbf16> to vector<1x144x128xbf16>
    tpu.vector_store %arg5[%c0_61, %c0_62, %c0_63], %62 {strides = array<i32>} : memref<1x144x128xbf16, #tpu.memory_space<vmem>>, vector<1x144x128xbf16>,
    return
  }
  func.func @transform_0(%arg0: i32, %arg1: i32) -> (i32, i32, i32, i32) {
    %c0_i32 = arith.constant 0 : i32
    %c0_i32_0 = arith.constant 0 : i32
    %c0_i32_1 = arith.constant 0 : i32
    %c0_i32_2 = arith.constant 0 : i32
    return %arg0, %c0_i32, %c0_i32_0, %c0_i32_1 : i32, i32, i32, i32
  }
  func.func @transform_1(%arg0: i32, %arg1: i32) -> (i32, i32, i32) {
    %c0_i32 = arith.constant 0 : i32
    %c0_i32_0 = arith.constant 0 : i32
    %c0_i32_1 = arith.constant 0 : i32
    return %c0_i32, %c0_i32_0, %arg1 : i32, i32, i32
  }
  func.func @transform_2(%arg0: i32, %arg1: i32) -> (i32, i32) {
    %c0_i32 = arith.constant 0 : i32
    %c0_i32_0 = arith.constant 0 : i32
    return %c0_i32, %arg1 : i32, i32
  }
  func.func @transform_3(%arg0: i32, %arg1: i32) -> (i32, i32, i32) {
    %c0_i32 = arith.constant 0 : i32
    %c0_i32_0 = arith.constant 0 : i32
    return %arg0, %c0_i32, %arg1 : i32, i32, i32
  }
}

module attributes {stable_mosaic.version = 11 : i64} {
  func.func @_fused_conv_kernel(%arg0: i32, %arg1: i32, %arg2: memref<1x2x56x128xbf16, #tpu.memory_space<vmem>>, %arg3: memref<9x128x128xbf16, #tpu.memory_space<vmem>>, %arg4: memref<1x128xf32, #tpu.memory_space<vmem>>, %arg5: memref<1x40x128xbf16, #tpu.memory_space<vmem>>) attributes {dimension_semantics = [#tpu.dimension_semantics<parallel>, #tpu.dimension_semantics<parallel>], iteration_bounds = array<i64: 2, 1>, scalar_prefetch = 0 : i64, scratch_operands = 0 : i64, tpu.core_type = #tpu.core_type<tc>, window_params = [{transform_indices = @transform_0, window_bounds = array<i64: 1, 2, 56, 128>}, {transform_indices = @transform_1, window_bounds = array<i64: 9, 128, 128>}, {transform_indices = @transform_2, window_bounds = array<i64: 1, 128>}, {transform_indices = @transform_3, window_bounds = array<i64: 1, 40, 128>}]} {
    %c0 = arith.constant 0 : index
    %c0_0 = arith.constant 0 : index
    %0 = vector.load %arg4[%c0, %c0_0] : memref<1x128xf32, #tpu.memory_space<vmem>>, vector<1x128xf32>
    %1 = vector.shape_cast %0 : vector<1x128xf32> to vector<1x128xf32>
    %2 = vector.broadcast %1 : vector<1x128xf32> to vector<40x128xf32>
    %c0_1 = arith.constant 0 : index
    %c0_2 = arith.constant 0 : index
    %c0_3 = arith.constant 0 : index
    %c0_4 = arith.constant 0 : index
    %3 = vector.load %arg2[%c0_1, %c0_2, %c0_3, %c0_4] : memref<1x2x56x128xbf16, #tpu.memory_space<vmem>>, vector<1x1x40x128xbf16>
    %4 = vector.shape_cast %3 : vector<1x1x40x128xbf16> to vector<40x128xbf16>
    %c0_5 = arith.constant 0 : index
    %c0_6 = arith.constant 0 : index
    %c0_7 = arith.constant 0 : index
    %5 = vector.load %arg3[%c0_5, %c0_6, %c0_7] : memref<9x128x128xbf16, #tpu.memory_space<vmem>>, vector<1x128x128xbf16>
    %6 = vector.shape_cast %5 : vector<1x128x128xbf16> to vector<128x128xbf16>
    %cst = arith.constant dense<0.000000e+00> : vector<40x128xf32>
    %7 = tpu.matmul %4, %6, %cst {dimension_numbers = #tpu.dot_dimension_numbers<[1], [0], [0], [1], [0, 0, 1, 1], [], []>} : vector<40x128xbf16>, vector<128x128xbf16>, vector<40x128xf32> -> vector<40x128xf32>
    %8 = arith.addf %2, %7 : vector<40x128xf32>
    %c0_8 = arith.constant 0 : index
    %c1 = arith.constant 1 : index
    %c0_9 = arith.constant 0 : index
    %c0_10 = arith.constant 0 : index
    %9 = vector.load %arg2[%c0_8, %c1, %c0_9, %c0_10] : memref<1x2x56x128xbf16, #tpu.memory_space<vmem>>, vector<1x1x40x128xbf16>
    %10 = vector.shape_cast %9 : vector<1x1x40x128xbf16> to vector<40x128xbf16>
    %c1_11 = arith.constant 1 : index
    %c0_12 = arith.constant 0 : index
    %c0_13 = arith.constant 0 : index
    %11 = vector.load %arg3[%c1_11, %c0_12, %c0_13] : memref<9x128x128xbf16, #tpu.memory_space<vmem>>, vector<1x128x128xbf16>
    %12 = vector.shape_cast %11 : vector<1x128x128xbf16> to vector<128x128xbf16>
    %cst_14 = arith.constant dense<0.000000e+00> : vector<40x128xf32>
    %13 = tpu.matmul %10, %12, %cst_14 {dimension_numbers = #tpu.dot_dimension_numbers<[1], [0], [0], [1], [0, 0, 1, 1], [], []>} : vector<40x128xbf16>, vector<128x128xbf16>, vector<40x128xf32> -> vector<40x128xf32>
    %14 = arith.addf %8, %13 : vector<40x128xf32>
    %c0_15 = arith.constant 0 : index
    %c0_16 = arith.constant 0 : index
    %c1_17 = arith.constant 1 : index
    %c0_18 = arith.constant 0 : index
    %15 = vector.load %arg2[%c0_15, %c0_16, %c1_17, %c0_18] : memref<1x2x56x128xbf16, #tpu.memory_space<vmem>>, vector<1x1x40x128xbf16>
    %16 = vector.shape_cast %15 : vector<1x1x40x128xbf16> to vector<40x128xbf16>
    %c2 = arith.constant 2 : index
    %c0_19 = arith.constant 0 : index
    %c0_20 = arith.constant 0 : index
    %17 = vector.load %arg3[%c2, %c0_19, %c0_20] : memref<9x128x128xbf16, #tpu.memory_space<vmem>>, vector<1x128x128xbf16>
    %18 = vector.shape_cast %17 : vector<1x128x128xbf16> to vector<128x128xbf16>
    %cst_21 = arith.constant dense<0.000000e+00> : vector<40x128xf32>
    %19 = tpu.matmul %16, %18, %cst_21 {dimension_numbers = #tpu.dot_dimension_numbers<[1], [0], [0], [1], [0, 0, 1, 1], [], []>} : vector<40x128xbf16>, vector<128x128xbf16>, vector<40x128xf32> -> vector<40x128xf32>
    %20 = arith.addf %14, %19 : vector<40x128xf32>
    %c0_22 = arith.constant 0 : index
    %c0_23 = arith.constant 0 : index
    %c5 = arith.constant 5 : index
    %c0_24 = arith.constant 0 : index
    %21 = vector.load %arg2[%c0_22, %c0_23, %c5, %c0_24] : memref<1x2x56x128xbf16, #tpu.memory_space<vmem>>, vector<1x1x40x128xbf16>
    %22 = vector.shape_cast %21 : vector<1x1x40x128xbf16> to vector<40x128xbf16>
    %c3 = arith.constant 3 : index
    %c0_25 = arith.constant 0 : index
    %c0_26 = arith.constant 0 : index
    %23 = vector.load %arg3[%c3, %c0_25, %c0_26] : memref<9x128x128xbf16, #tpu.memory_space<vmem>>, vector<1x128x128xbf16>
    %24 = vector.shape_cast %23 : vector<1x128x128xbf16> to vector<128x128xbf16>
    %cst_27 = arith.constant dense<0.000000e+00> : vector<40x128xf32>
    %25 = tpu.matmul %22, %24, %cst_27 {dimension_numbers = #tpu.dot_dimension_numbers<[1], [0], [0], [1], [0, 0, 1, 1], [], []>} : vector<40x128xbf16>, vector<128x128xbf16>, vector<40x128xf32> -> vector<40x128xf32>
    %26 = arith.addf %20, %25 : vector<40x128xf32>
    %c0_28 = arith.constant 0 : index
    %c1_29 = arith.constant 1 : index
    %c5_30 = arith.constant 5 : index
    %c0_31 = arith.constant 0 : index
    %27 = vector.load %arg2[%c0_28, %c1_29, %c5_30, %c0_31] : memref<1x2x56x128xbf16, #tpu.memory_space<vmem>>, vector<1x1x40x128xbf16>
    %28 = vector.shape_cast %27 : vector<1x1x40x128xbf16> to vector<40x128xbf16>
    %c4 = arith.constant 4 : index
    %c0_32 = arith.constant 0 : index
    %c0_33 = arith.constant 0 : index
    %29 = vector.load %arg3[%c4, %c0_32, %c0_33] : memref<9x128x128xbf16, #tpu.memory_space<vmem>>, vector<1x128x128xbf16>
    %30 = vector.shape_cast %29 : vector<1x128x128xbf16> to vector<128x128xbf16>
    %cst_34 = arith.constant dense<0.000000e+00> : vector<40x128xf32>
    %31 = tpu.matmul %28, %30, %cst_34 {dimension_numbers = #tpu.dot_dimension_numbers<[1], [0], [0], [1], [0, 0, 1, 1], [], []>} : vector<40x128xbf16>, vector<128x128xbf16>, vector<40x128xf32> -> vector<40x128xf32>
    %32 = arith.addf %26, %31 : vector<40x128xf32>
    %c0_35 = arith.constant 0 : index
    %c0_36 = arith.constant 0 : index
    %c6 = arith.constant 6 : index
    %c0_37 = arith.constant 0 : index
    %33 = vector.load %arg2[%c0_35, %c0_36, %c6, %c0_37] : memref<1x2x56x128xbf16, #tpu.memory_space<vmem>>, vector<1x1x40x128xbf16>
    %34 = vector.shape_cast %33 : vector<1x1x40x128xbf16> to vector<40x128xbf16>
    %c5_38 = arith.constant 5 : index
    %c0_39 = arith.constant 0 : index
    %c0_40 = arith.constant 0 : index
    %35 = vector.load %arg3[%c5_38, %c0_39, %c0_40] : memref<9x128x128xbf16, #tpu.memory_space<vmem>>, vector<1x128x128xbf16>
    %36 = vector.shape_cast %35 : vector<1x128x128xbf16> to vector<128x128xbf16>
    %cst_41 = arith.constant dense<0.000000e+00> : vector<40x128xf32>
    %37 = tpu.matmul %34, %36, %cst_41 {dimension_numbers = #tpu.dot_dimension_numbers<[1], [0], [0], [1], [0, 0, 1, 1], [], []>} : vector<40x128xbf16>, vector<128x128xbf16>, vector<40x128xf32> -> vector<40x128xf32>
    %38 = arith.addf %32, %37 : vector<40x128xf32>
    %c0_42 = arith.constant 0 : index
    %c0_43 = arith.constant 0 : index
    %c10 = arith.constant 10 : index
    %c0_44 = arith.constant 0 : index
    %39 = vector.load %arg2[%c0_42, %c0_43, %c10, %c0_44] : memref<1x2x56x128xbf16, #tpu.memory_space<vmem>>, vector<1x1x40x128xbf16>
    %40 = vector.shape_cast %39 : vector<1x1x40x128xbf16> to vector<40x128xbf16>
    %c6_45 = arith.constant 6 : index
    %c0_46 = arith.constant 0 : index
    %c0_47 = arith.constant 0 : index
    %41 = vector.load %arg3[%c6_45, %c0_46, %c0_47] : memref<9x128x128xbf16, #tpu.memory_space<vmem>>, vector<1x128x128xbf16>
    %42 = vector.shape_cast %41 : vector<1x128x128xbf16> to vector<128x128xbf16>
    %cst_48 = arith.constant dense<0.000000e+00> : vector<40x128xf32>
    %43 = tpu.matmul %40, %42, %cst_48 {dimension_numbers = #tpu.dot_dimension_numbers<[1], [0], [0], [1], [0, 0, 1, 1], [], []>} : vector<40x128xbf16>, vector<128x128xbf16>, vector<40x128xf32> -> vector<40x128xf32>
    %44 = arith.addf %38, %43 : vector<40x128xf32>
    %c0_49 = arith.constant 0 : index
    %c1_50 = arith.constant 1 : index
    %c10_51 = arith.constant 10 : index
    %c0_52 = arith.constant 0 : index
    %45 = vector.load %arg2[%c0_49, %c1_50, %c10_51, %c0_52] : memref<1x2x56x128xbf16, #tpu.memory_space<vmem>>, vector<1x1x40x128xbf16>
    %46 = vector.shape_cast %45 : vector<1x1x40x128xbf16> to vector<40x128xbf16>
    %c7 = arith.constant 7 : index
    %c0_53 = arith.constant 0 : index
    %c0_54 = arith.constant 0 : index
    %47 = vector.load %arg3[%c7, %c0_53, %c0_54] : memref<9x128x128xbf16, #tpu.memory_space<vmem>>, vector<1x128x128xbf16>
    %48 = vector.shape_cast %47 : vector<1x128x128xbf16> to vector<128x128xbf16>
    %cst_55 = arith.constant dense<0.000000e+00> : vector<40x128xf32>
    %49 = tpu.matmul %46, %48, %cst_55 {dimension_numbers = #tpu.dot_dimension_numbers<[1], [0], [0], [1], [0, 0, 1, 1], [], []>} : vector<40x128xbf16>, vector<128x128xbf16>, vector<40x128xf32> -> vector<40x128xf32>
    %50 = arith.addf %44, %49 : vector<40x128xf32>
    %c0_56 = arith.constant 0 : index
    %c0_57 = arith.constant 0 : index
    %c11 = arith.constant 11 : index
    %c0_58 = arith.constant 0 : index
    %51 = vector.load %arg2[%c0_56, %c0_57, %c11, %c0_58] : memref<1x2x56x128xbf16, #tpu.memory_space<vmem>>, vector<1x1x40x128xbf16>
    %52 = vector.shape_cast %51 : vector<1x1x40x128xbf16> to vector<40x128xbf16>
    %c8 = arith.constant 8 : index
    %c0_59 = arith.constant 0 : index
    %c0_60 = arith.constant 0 : index
    %53 = vector.load %arg3[%c8, %c0_59, %c0_60] : memref<9x128x128xbf16, #tpu.memory_space<vmem>>, vector<1x128x128xbf16>
    %54 = vector.shape_cast %53 : vector<1x128x128xbf16> to vector<128x128xbf16>
    %cst_61 = arith.constant dense<0.000000e+00> : vector<40x128xf32>
    %55 = tpu.matmul %52, %54, %cst_61 {dimension_numbers = #tpu.dot_dimension_numbers<[1], [0], [0], [1], [0, 0, 1, 1], [], []>} : vector<40x128xbf16>, vector<128x128xbf16>, vector<40x128xf32> -> vector<40x128xf32>
    %56 = arith.addf %50, %55 : vector<40x128xf32>
    %cst_62 = arith.constant 0.000000e+00 : f32
    %57 = vector.broadcast %cst_62 : f32 to vector<40x128xf32>
    %58 = arith.maximumf %56, %57 : vector<40x128xf32>
    %59 = arith.truncf %58 : vector<40x128xf32> to vector<40x128xbf16>
    %c0_63 = arith.constant 0 : index
    %c0_64 = arith.constant 0 : index
    %c0_65 = arith.constant 0 : index
    %60 = vector.load %arg5[%c0_63, %c0_64, %c0_65] : memref<1x40x128xbf16, #tpu.memory_space<vmem>>, vector<1x40x128xbf16>
    %61 = vector.shape_cast %60 : vector<1x40x128xbf16> to vector<40x128xbf16>
    %62 = vector.shape_cast %59 : vector<40x128xbf16> to vector<1x40x128xbf16>
    tpu.vector_store %arg5[%c0_63, %c0_64, %c0_65], %62 {strides = array<i32>} : memref<1x40x128xbf16, #tpu.memory_space<vmem>>, vector<1x40x128xbf16>,
    return
  }
  func.func @transform_0(%arg0: i32, %arg1: i32) -> (i32, i32, i32, i32) {
    %c0_i32 = arith.constant 0 : i32
    %c0_i32_0 = arith.constant 0 : i32
    %c0_i32_1 = arith.constant 0 : i32
    %c0_i32_2 = arith.constant 0 : i32
    return %arg0, %c0_i32, %c0_i32_0, %c0_i32_1 : i32, i32, i32, i32
  }
  func.func @transform_1(%arg0: i32, %arg1: i32) -> (i32, i32, i32) {
    %c0_i32 = arith.constant 0 : i32
    %c0_i32_0 = arith.constant 0 : i32
    %c0_i32_1 = arith.constant 0 : i32
    return %c0_i32, %c0_i32_0, %arg1 : i32, i32, i32
  }
  func.func @transform_2(%arg0: i32, %arg1: i32) -> (i32, i32) {
    %c0_i32 = arith.constant 0 : i32
    %c0_i32_0 = arith.constant 0 : i32
    return %c0_i32, %arg1 : i32, i32
  }
  func.func @transform_3(%arg0: i32, %arg1: i32) -> (i32, i32, i32) {
    %c0_i32 = arith.constant 0 : i32
    %c0_i32_0 = arith.constant 0 : i32
    return %arg0, %c0_i32, %arg1 : i32, i32, i32
  }
}

module attributes {stable_mosaic.version = 11 : i64} {
  func.func @_fused_conv_kernel(%arg0: i32, %arg1: i32, %arg2: memref<1x1x40x128xbf16, #tpu.memory_space<vmem>>, %arg3: memref<9x128x128xbf16, #tpu.memory_space<vmem>>, %arg4: memref<1x128xf32, #tpu.memory_space<vmem>>, %arg5: memref<1x24x128xbf16, #tpu.memory_space<vmem>>) attributes {dimension_semantics = [#tpu.dimension_semantics<parallel>, #tpu.dimension_semantics<parallel>], iteration_bounds = array<i64: 2, 1>, scalar_prefetch = 0 : i64, scratch_operands = 0 : i64, tpu.core_type = #tpu.core_type<tc>, window_params = [{transform_indices = @transform_0, window_bounds = array<i64: 1, 1, 40, 128>}, {transform_indices = @transform_1, window_bounds = array<i64: 9, 128, 128>}, {transform_indices = @transform_2, window_bounds = array<i64: 1, 128>}, {transform_indices = @transform_3, window_bounds = array<i64: 1, 24, 128>}]} {
    %c0 = arith.constant 0 : index
    %c0_0 = arith.constant 0 : index
    %0 = vector.load %arg4[%c0, %c0_0] : memref<1x128xf32, #tpu.memory_space<vmem>>, vector<1x128xf32>
    %1 = vector.shape_cast %0 : vector<1x128xf32> to vector<1x128xf32>
    %2 = vector.broadcast %1 : vector<1x128xf32> to vector<24x128xf32>
    %c0_1 = arith.constant 0 : index
    %c0_2 = arith.constant 0 : index
    %c0_3 = arith.constant 0 : index
    %c0_4 = arith.constant 0 : index
    %3 = vector.load %arg2[%c0_1, %c0_2, %c0_3, %c0_4] : memref<1x1x40x128xbf16, #tpu.memory_space<vmem>>, vector<1x1x24x128xbf16>
    %4 = vector.shape_cast %3 : vector<1x1x24x128xbf16> to vector<24x128xbf16>
    %c0_5 = arith.constant 0 : index
    %c0_6 = arith.constant 0 : index
    %c0_7 = arith.constant 0 : index
    %5 = vector.load %arg3[%c0_5, %c0_6, %c0_7] : memref<9x128x128xbf16, #tpu.memory_space<vmem>>, vector<1x128x128xbf16>
    %6 = vector.shape_cast %5 : vector<1x128x128xbf16> to vector<128x128xbf16>
    %cst = arith.constant dense<0.000000e+00> : vector<24x128xf32>
    %7 = tpu.matmul %4, %6, %cst {dimension_numbers = #tpu.dot_dimension_numbers<[1], [0], [0], [1], [0, 0, 1, 1], [], []>} : vector<24x128xbf16>, vector<128x128xbf16>, vector<24x128xf32> -> vector<24x128xf32>
    %8 = arith.addf %2, %7 : vector<24x128xf32>
    %c0_8 = arith.constant 0 : index
    %c0_9 = arith.constant 0 : index
    %c1 = arith.constant 1 : index
    %c0_10 = arith.constant 0 : index
    %9 = vector.load %arg2[%c0_8, %c0_9, %c1, %c0_10] : memref<1x1x40x128xbf16, #tpu.memory_space<vmem>>, vector<1x1x24x128xbf16>
    %10 = vector.shape_cast %9 : vector<1x1x24x128xbf16> to vector<24x128xbf16>
    %c1_11 = arith.constant 1 : index
    %c0_12 = arith.constant 0 : index
    %c0_13 = arith.constant 0 : index
    %11 = vector.load %arg3[%c1_11, %c0_12, %c0_13] : memref<9x128x128xbf16, #tpu.memory_space<vmem>>, vector<1x128x128xbf16>
    %12 = vector.shape_cast %11 : vector<1x128x128xbf16> to vector<128x128xbf16>
    %cst_14 = arith.constant dense<0.000000e+00> : vector<24x128xf32>
    %13 = tpu.matmul %10, %12, %cst_14 {dimension_numbers = #tpu.dot_dimension_numbers<[1], [0], [0], [1], [0, 0, 1, 1], [], []>} : vector<24x128xbf16>, vector<128x128xbf16>, vector<24x128xf32> -> vector<24x128xf32>
    %14 = arith.addf %8, %13 : vector<24x128xf32>
    %c0_15 = arith.constant 0 : index
    %c0_16 = arith.constant 0 : index
    %c2 = arith.constant 2 : index
    %c0_17 = arith.constant 0 : index
    %15 = vector.load %arg2[%c0_15, %c0_16, %c2, %c0_17] : memref<1x1x40x128xbf16, #tpu.memory_space<vmem>>, vector<1x1x24x128xbf16>
    %16 = vector.shape_cast %15 : vector<1x1x24x128xbf16> to vector<24x128xbf16>
    %c2_18 = arith.constant 2 : index
    %c0_19 = arith.constant 0 : index
    %c0_20 = arith.constant 0 : index
    %17 = vector.load %arg3[%c2_18, %c0_19, %c0_20] : memref<9x128x128xbf16, #tpu.memory_space<vmem>>, vector<1x128x128xbf16>
    %18 = vector.shape_cast %17 : vector<1x128x128xbf16> to vector<128x128xbf16>
    %cst_21 = arith.constant dense<0.000000e+00> : vector<24x128xf32>
    %19 = tpu.matmul %16, %18, %cst_21 {dimension_numbers = #tpu.dot_dimension_numbers<[1], [0], [0], [1], [0, 0, 1, 1], [], []>} : vector<24x128xbf16>, vector<128x128xbf16>, vector<24x128xf32> -> vector<24x128xf32>
    %20 = arith.addf %14, %19 : vector<24x128xf32>
    %c0_22 = arith.constant 0 : index
    %c0_23 = arith.constant 0 : index
    %c6 = arith.constant 6 : index
    %c0_24 = arith.constant 0 : index
    %21 = vector.load %arg2[%c0_22, %c0_23, %c6, %c0_24] : memref<1x1x40x128xbf16, #tpu.memory_space<vmem>>, vector<1x1x24x128xbf16>
    %22 = vector.shape_cast %21 : vector<1x1x24x128xbf16> to vector<24x128xbf16>
    %c3 = arith.constant 3 : index
    %c0_25 = arith.constant 0 : index
    %c0_26 = arith.constant 0 : index
    %23 = vector.load %arg3[%c3, %c0_25, %c0_26] : memref<9x128x128xbf16, #tpu.memory_space<vmem>>, vector<1x128x128xbf16>
    %24 = vector.shape_cast %23 : vector<1x128x128xbf16> to vector<128x128xbf16>
    %cst_27 = arith.constant dense<0.000000e+00> : vector<24x128xf32>
    %25 = tpu.matmul %22, %24, %cst_27 {dimension_numbers = #tpu.dot_dimension_numbers<[1], [0], [0], [1], [0, 0, 1, 1], [], []>} : vector<24x128xbf16>, vector<128x128xbf16>, vector<24x128xf32> -> vector<24x128xf32>
    %26 = arith.addf %20, %25 : vector<24x128xf32>
    %c0_28 = arith.constant 0 : index
    %c0_29 = arith.constant 0 : index
    %c7 = arith.constant 7 : index
    %c0_30 = arith.constant 0 : index
    %27 = vector.load %arg2[%c0_28, %c0_29, %c7, %c0_30] : memref<1x1x40x128xbf16, #tpu.memory_space<vmem>>, vector<1x1x24x128xbf16>
    %28 = vector.shape_cast %27 : vector<1x1x24x128xbf16> to vector<24x128xbf16>
    %c4 = arith.constant 4 : index
    %c0_31 = arith.constant 0 : index
    %c0_32 = arith.constant 0 : index
    %29 = vector.load %arg3[%c4, %c0_31, %c0_32] : memref<9x128x128xbf16, #tpu.memory_space<vmem>>, vector<1x128x128xbf16>
    %30 = vector.shape_cast %29 : vector<1x128x128xbf16> to vector<128x128xbf16>
    %cst_33 = arith.constant dense<0.000000e+00> : vector<24x128xf32>
    %31 = tpu.matmul %28, %30, %cst_33 {dimension_numbers = #tpu.dot_dimension_numbers<[1], [0], [0], [1], [0, 0, 1, 1], [], []>} : vector<24x128xbf16>, vector<128x128xbf16>, vector<24x128xf32> -> vector<24x128xf32>
    %32 = arith.addf %26, %31 : vector<24x128xf32>
    %c0_34 = arith.constant 0 : index
    %c0_35 = arith.constant 0 : index
    %c8 = arith.constant 8 : index
    %c0_36 = arith.constant 0 : index
    %33 = vector.load %arg2[%c0_34, %c0_35, %c8, %c0_36] : memref<1x1x40x128xbf16, #tpu.memory_space<vmem>>, vector<1x1x24x128xbf16>
    %34 = vector.shape_cast %33 : vector<1x1x24x128xbf16> to vector<24x128xbf16>
    %c5 = arith.constant 5 : index
    %c0_37 = arith.constant 0 : index
    %c0_38 = arith.constant 0 : index
    %35 = vector.load %arg3[%c5, %c0_37, %c0_38] : memref<9x128x128xbf16, #tpu.memory_space<vmem>>, vector<1x128x128xbf16>
    %36 = vector.shape_cast %35 : vector<1x128x128xbf16> to vector<128x128xbf16>
    %cst_39 = arith.constant dense<0.000000e+00> : vector<24x128xf32>
    %37 = tpu.matmul %34, %36, %cst_39 {dimension_numbers = #tpu.dot_dimension_numbers<[1], [0], [0], [1], [0, 0, 1, 1], [], []>} : vector<24x128xbf16>, vector<128x128xbf16>, vector<24x128xf32> -> vector<24x128xf32>
    %38 = arith.addf %32, %37 : vector<24x128xf32>
    %c0_40 = arith.constant 0 : index
    %c0_41 = arith.constant 0 : index
    %c12 = arith.constant 12 : index
    %c0_42 = arith.constant 0 : index
    %39 = vector.load %arg2[%c0_40, %c0_41, %c12, %c0_42] : memref<1x1x40x128xbf16, #tpu.memory_space<vmem>>, vector<1x1x24x128xbf16>
    %40 = vector.shape_cast %39 : vector<1x1x24x128xbf16> to vector<24x128xbf16>
    %c6_43 = arith.constant 6 : index
    %c0_44 = arith.constant 0 : index
    %c0_45 = arith.constant 0 : index
    %41 = vector.load %arg3[%c6_43, %c0_44, %c0_45] : memref<9x128x128xbf16, #tpu.memory_space<vmem>>, vector<1x128x128xbf16>
    %42 = vector.shape_cast %41 : vector<1x128x128xbf16> to vector<128x128xbf16>
    %cst_46 = arith.constant dense<0.000000e+00> : vector<24x128xf32>
    %43 = tpu.matmul %40, %42, %cst_46 {dimension_numbers = #tpu.dot_dimension_numbers<[1], [0], [0], [1], [0, 0, 1, 1], [], []>} : vector<24x128xbf16>, vector<128x128xbf16>, vector<24x128xf32> -> vector<24x128xf32>
    %44 = arith.addf %38, %43 : vector<24x128xf32>
    %c0_47 = arith.constant 0 : index
    %c0_48 = arith.constant 0 : index
    %c13 = arith.constant 13 : index
    %c0_49 = arith.constant 0 : index
    %45 = vector.load %arg2[%c0_47, %c0_48, %c13, %c0_49] : memref<1x1x40x128xbf16, #tpu.memory_space<vmem>>, vector<1x1x24x128xbf16>
    %46 = vector.shape_cast %45 : vector<1x1x24x128xbf16> to vector<24x128xbf16>
    %c7_50 = arith.constant 7 : index
    %c0_51 = arith.constant 0 : index
    %c0_52 = arith.constant 0 : index
    %47 = vector.load %arg3[%c7_50, %c0_51, %c0_52] : memref<9x128x128xbf16, #tpu.memory_space<vmem>>, vector<1x128x128xbf16>
    %48 = vector.shape_cast %47 : vector<1x128x128xbf16> to vector<128x128xbf16>
    %cst_53 = arith.constant dense<0.000000e+00> : vector<24x128xf32>
    %49 = tpu.matmul %46, %48, %cst_53 {dimension_numbers = #tpu.dot_dimension_numbers<[1], [0], [0], [1], [0, 0, 1, 1], [], []>} : vector<24x128xbf16>, vector<128x128xbf16>, vector<24x128xf32> -> vector<24x128xf32>
    %50 = arith.addf %44, %49 : vector<24x128xf32>
    %c0_54 = arith.constant 0 : index
    %c0_55 = arith.constant 0 : index
    %c14 = arith.constant 14 : index
    %c0_56 = arith.constant 0 : index
    %51 = vector.load %arg2[%c0_54, %c0_55, %c14, %c0_56] : memref<1x1x40x128xbf16, #tpu.memory_space<vmem>>, vector<1x1x24x128xbf16>
    %52 = vector.shape_cast %51 : vector<1x1x24x128xbf16> to vector<24x128xbf16>
    %c8_57 = arith.constant 8 : index
    %c0_58 = arith.constant 0 : index
    %c0_59 = arith.constant 0 : index
    %53 = vector.load %arg3[%c8_57, %c0_58, %c0_59] : memref<9x128x128xbf16, #tpu.memory_space<vmem>>, vector<1x128x128xbf16>
    %54 = vector.shape_cast %53 : vector<1x128x128xbf16> to vector<128x128xbf16>
    %cst_60 = arith.constant dense<0.000000e+00> : vector<24x128xf32>
    %55 = tpu.matmul %52, %54, %cst_60 {dimension_numbers = #tpu.dot_dimension_numbers<[1], [0], [0], [1], [0, 0, 1, 1], [], []>} : vector<24x128xbf16>, vector<128x128xbf16>, vector<24x128xf32> -> vector<24x128xf32>
    %56 = arith.addf %50, %55 : vector<24x128xf32>
    %cst_61 = arith.constant 0.000000e+00 : f32
    %57 = vector.broadcast %cst_61 : f32 to vector<24x128xf32>
    %58 = arith.maximumf %56, %57 : vector<24x128xf32>
    %59 = arith.truncf %58 : vector<24x128xf32> to vector<24x128xbf16>
    %c0_62 = arith.constant 0 : index
    %c0_63 = arith.constant 0 : index
    %c0_64 = arith.constant 0 : index
    %60 = vector.load %arg5[%c0_62, %c0_63, %c0_64] : memref<1x24x128xbf16, #tpu.memory_space<vmem>>, vector<1x24x128xbf16>
    %61 = vector.shape_cast %60 : vector<1x24x128xbf16> to vector<24x128xbf16>
    %62 = vector.shape_cast %59 : vector<24x128xbf16> to vector<1x24x128xbf16>
    tpu.vector_store %arg5[%c0_62, %c0_63, %c0_64], %62 {strides = array<i32>} : memref<1x24x128xbf16, #tpu.memory_space<vmem>>, vector<1x24x128xbf16>,
    return
  }
  func.func @transform_0(%arg0: i32, %arg1: i32) -> (i32, i32, i32, i32) {
    %c0_i32 = arith.constant 0 : i32
    %c0_i32_0 = arith.constant 0 : i32
    %c0_i32_1 = arith.constant 0 : i32
    %c0_i32_2 = arith.constant 0 : i32
    return %arg0, %c0_i32, %c0_i32_0, %c0_i32_1 : i32, i32, i32, i32
  }
  func.func @transform_1(%arg0: i32, %arg1: i32) -> (i32, i32, i32) {
    %c0_i32 = arith.constant 0 : i32
    %c0_i32_0 = arith.constant 0 : i32
    %c0_i32_1 = arith.constant 0 : i32
    return %c0_i32, %c0_i32_0, %arg1 : i32, i32, i32
  }
  func.func @transform_2(%arg0: i32, %arg1: i32) -> (i32, i32) {
    %c0_i32 = arith.constant 0 : i32
    %c0_i32_0 = arith.constant 0 : i32
    return %c0_i32, %arg1 : i32, i32
  }
  func.func @transform_3(%arg0: i32, %arg1: i32) -> (i32, i32, i32) {
    %c0_i32 = arith.constant 0 : i32
    %c0_i32_0 = arith.constant 0 : i32
    return %arg0, %c0_i32, %arg1 : i32, i32, i32
  }
}

module attributes {stable_mosaic.version = 11 : i64} {
  func.func @_fused_conv_kernel(%arg0: i32, %arg1: i32, %arg2: memref<1x2x24x128xbf16, #tpu.memory_space<vmem>>, %arg3: memref<9x128x128xbf16, #tpu.memory_space<vmem>>, %arg4: memref<1x128xf32, #tpu.memory_space<vmem>>, %arg5: memref<1x16x128xbf16, #tpu.memory_space<vmem>>) attributes {dimension_semantics = [#tpu.dimension_semantics<parallel>, #tpu.dimension_semantics<parallel>], iteration_bounds = array<i64: 2, 1>, scalar_prefetch = 0 : i64, scratch_operands = 0 : i64, tpu.core_type = #tpu.core_type<tc>, window_params = [{transform_indices = @transform_0, window_bounds = array<i64: 1, 2, 24, 128>}, {transform_indices = @transform_1, window_bounds = array<i64: 9, 128, 128>}, {transform_indices = @transform_2, window_bounds = array<i64: 1, 128>}, {transform_indices = @transform_3, window_bounds = array<i64: 1, 16, 128>}]} {
    %c0 = arith.constant 0 : index
    %c0_0 = arith.constant 0 : index
    %0 = vector.load %arg4[%c0, %c0_0] : memref<1x128xf32, #tpu.memory_space<vmem>>, vector<1x128xf32>
    %1 = vector.shape_cast %0 : vector<1x128xf32> to vector<1x128xf32>
    %2 = vector.broadcast %1 : vector<1x128xf32> to vector<16x128xf32>
    %c0_1 = arith.constant 0 : index
    %c0_2 = arith.constant 0 : index
    %c0_3 = arith.constant 0 : index
    %c0_4 = arith.constant 0 : index
    %3 = vector.load %arg2[%c0_1, %c0_2, %c0_3, %c0_4] : memref<1x2x24x128xbf16, #tpu.memory_space<vmem>>, vector<1x1x16x128xbf16>
    %4 = vector.shape_cast %3 : vector<1x1x16x128xbf16> to vector<16x128xbf16>
    %c0_5 = arith.constant 0 : index
    %c0_6 = arith.constant 0 : index
    %c0_7 = arith.constant 0 : index
    %5 = vector.load %arg3[%c0_5, %c0_6, %c0_7] : memref<9x128x128xbf16, #tpu.memory_space<vmem>>, vector<1x128x128xbf16>
    %6 = vector.shape_cast %5 : vector<1x128x128xbf16> to vector<128x128xbf16>
    %cst = arith.constant dense<0.000000e+00> : vector<16x128xf32>
    %7 = tpu.matmul %4, %6, %cst {dimension_numbers = #tpu.dot_dimension_numbers<[1], [0], [0], [1], [0, 0, 1, 1], [], []>} : vector<16x128xbf16>, vector<128x128xbf16>, vector<16x128xf32> -> vector<16x128xf32>
    %8 = arith.addf %2, %7 : vector<16x128xf32>
    %c0_8 = arith.constant 0 : index
    %c1 = arith.constant 1 : index
    %c0_9 = arith.constant 0 : index
    %c0_10 = arith.constant 0 : index
    %9 = vector.load %arg2[%c0_8, %c1, %c0_9, %c0_10] : memref<1x2x24x128xbf16, #tpu.memory_space<vmem>>, vector<1x1x16x128xbf16>
    %10 = vector.shape_cast %9 : vector<1x1x16x128xbf16> to vector<16x128xbf16>
    %c1_11 = arith.constant 1 : index
    %c0_12 = arith.constant 0 : index
    %c0_13 = arith.constant 0 : index
    %11 = vector.load %arg3[%c1_11, %c0_12, %c0_13] : memref<9x128x128xbf16, #tpu.memory_space<vmem>>, vector<1x128x128xbf16>
    %12 = vector.shape_cast %11 : vector<1x128x128xbf16> to vector<128x128xbf16>
    %cst_14 = arith.constant dense<0.000000e+00> : vector<16x128xf32>
    %13 = tpu.matmul %10, %12, %cst_14 {dimension_numbers = #tpu.dot_dimension_numbers<[1], [0], [0], [1], [0, 0, 1, 1], [], []>} : vector<16x128xbf16>, vector<128x128xbf16>, vector<16x128xf32> -> vector<16x128xf32>
    %14 = arith.addf %8, %13 : vector<16x128xf32>
    %c0_15 = arith.constant 0 : index
    %c0_16 = arith.constant 0 : index
    %c1_17 = arith.constant 1 : index
    %c0_18 = arith.constant 0 : index
    %15 = vector.load %arg2[%c0_15, %c0_16, %c1_17, %c0_18] : memref<1x2x24x128xbf16, #tpu.memory_space<vmem>>, vector<1x1x16x128xbf16>
    %16 = vector.shape_cast %15 : vector<1x1x16x128xbf16> to vector<16x128xbf16>
    %c2 = arith.constant 2 : index
    %c0_19 = arith.constant 0 : index
    %c0_20 = arith.constant 0 : index
    %17 = vector.load %arg3[%c2, %c0_19, %c0_20] : memref<9x128x128xbf16, #tpu.memory_space<vmem>>, vector<1x128x128xbf16>
    %18 = vector.shape_cast %17 : vector<1x128x128xbf16> to vector<128x128xbf16>
    %cst_21 = arith.constant dense<0.000000e+00> : vector<16x128xf32>
    %19 = tpu.matmul %16, %18, %cst_21 {dimension_numbers = #tpu.dot_dimension_numbers<[1], [0], [0], [1], [0, 0, 1, 1], [], []>} : vector<16x128xbf16>, vector<128x128xbf16>, vector<16x128xf32> -> vector<16x128xf32>
    %20 = arith.addf %14, %19 : vector<16x128xf32>
    %c0_22 = arith.constant 0 : index
    %c0_23 = arith.constant 0 : index
    %c3 = arith.constant 3 : index
    %c0_24 = arith.constant 0 : index
    %21 = vector.load %arg2[%c0_22, %c0_23, %c3, %c0_24] : memref<1x2x24x128xbf16, #tpu.memory_space<vmem>>, vector<1x1x16x128xbf16>
    %22 = vector.shape_cast %21 : vector<1x1x16x128xbf16> to vector<16x128xbf16>
    %c3_25 = arith.constant 3 : index
    %c0_26 = arith.constant 0 : index
    %c0_27 = arith.constant 0 : index
    %23 = vector.load %arg3[%c3_25, %c0_26, %c0_27] : memref<9x128x128xbf16, #tpu.memory_space<vmem>>, vector<1x128x128xbf16>
    %24 = vector.shape_cast %23 : vector<1x128x128xbf16> to vector<128x128xbf16>
    %cst_28 = arith.constant dense<0.000000e+00> : vector<16x128xf32>
    %25 = tpu.matmul %22, %24, %cst_28 {dimension_numbers = #tpu.dot_dimension_numbers<[1], [0], [0], [1], [0, 0, 1, 1], [], []>} : vector<16x128xbf16>, vector<128x128xbf16>, vector<16x128xf32> -> vector<16x128xf32>
    %26 = arith.addf %20, %25 : vector<16x128xf32>
    %c0_29 = arith.constant 0 : index
    %c1_30 = arith.constant 1 : index
    %c3_31 = arith.constant 3 : index
    %c0_32 = arith.constant 0 : index
    %27 = vector.load %arg2[%c0_29, %c1_30, %c3_31, %c0_32] : memref<1x2x24x128xbf16, #tpu.memory_space<vmem>>, vector<1x1x16x128xbf16>
    %28 = vector.shape_cast %27 : vector<1x1x16x128xbf16> to vector<16x128xbf16>
    %c4 = arith.constant 4 : index
    %c0_33 = arith.constant 0 : index
    %c0_34 = arith.constant 0 : index
    %29 = vector.load %arg3[%c4, %c0_33, %c0_34] : memref<9x128x128xbf16, #tpu.memory_space<vmem>>, vector<1x128x128xbf16>
    %30 = vector.shape_cast %29 : vector<1x128x128xbf16> to vector<128x128xbf16>
    %cst_35 = arith.constant dense<0.000000e+00> : vector<16x128xf32>
    %31 = tpu.matmul %28, %30, %cst_35 {dimension_numbers = #tpu.dot_dimension_numbers<[1], [0], [0], [1], [0, 0, 1, 1], [], []>} : vector<16x128xbf16>, vector<128x128xbf16>, vector<16x128xf32> -> vector<16x128xf32>
    %32 = arith.addf %26, %31 : vector<16x128xf32>
    %c0_36 = arith.constant 0 : index
    %c0_37 = arith.constant 0 : index
    %c4_38 = arith.constant 4 : index
    %c0_39 = arith.constant 0 : index
    %33 = vector.load %arg2[%c0_36, %c0_37, %c4_38, %c0_39] : memref<1x2x24x128xbf16, #tpu.memory_space<vmem>>, vector<1x1x16x128xbf16>
    %34 = vector.shape_cast %33 : vector<1x1x16x128xbf16> to vector<16x128xbf16>
    %c5 = arith.constant 5 : index
    %c0_40 = arith.constant 0 : index
    %c0_41 = arith.constant 0 : index
    %35 = vector.load %arg3[%c5, %c0_40, %c0_41] : memref<9x128x128xbf16, #tpu.memory_space<vmem>>, vector<1x128x128xbf16>
    %36 = vector.shape_cast %35 : vector<1x128x128xbf16> to vector<128x128xbf16>
    %cst_42 = arith.constant dense<0.000000e+00> : vector<16x128xf32>
    %37 = tpu.matmul %34, %36, %cst_42 {dimension_numbers = #tpu.dot_dimension_numbers<[1], [0], [0], [1], [0, 0, 1, 1], [], []>} : vector<16x128xbf16>, vector<128x128xbf16>, vector<16x128xf32> -> vector<16x128xf32>
    %38 = arith.addf %32, %37 : vector<16x128xf32>
    %c0_43 = arith.constant 0 : index
    %c0_44 = arith.constant 0 : index
    %c6 = arith.constant 6 : index
    %c0_45 = arith.constant 0 : index
    %39 = vector.load %arg2[%c0_43, %c0_44, %c6, %c0_45] : memref<1x2x24x128xbf16, #tpu.memory_space<vmem>>, vector<1x1x16x128xbf16>
    %40 = vector.shape_cast %39 : vector<1x1x16x128xbf16> to vector<16x128xbf16>
    %c6_46 = arith.constant 6 : index
    %c0_47 = arith.constant 0 : index
    %c0_48 = arith.constant 0 : index
    %41 = vector.load %arg3[%c6_46, %c0_47, %c0_48] : memref<9x128x128xbf16, #tpu.memory_space<vmem>>, vector<1x128x128xbf16>
    %42 = vector.shape_cast %41 : vector<1x128x128xbf16> to vector<128x128xbf16>
    %cst_49 = arith.constant dense<0.000000e+00> : vector<16x128xf32>
    %43 = tpu.matmul %40, %42, %cst_49 {dimension_numbers = #tpu.dot_dimension_numbers<[1], [0], [0], [1], [0, 0, 1, 1], [], []>} : vector<16x128xbf16>, vector<128x128xbf16>, vector<16x128xf32> -> vector<16x128xf32>
    %44 = arith.addf %38, %43 : vector<16x128xf32>
    %c0_50 = arith.constant 0 : index
    %c1_51 = arith.constant 1 : index
    %c6_52 = arith.constant 6 : index
    %c0_53 = arith.constant 0 : index
    %45 = vector.load %arg2[%c0_50, %c1_51, %c6_52, %c0_53] : memref<1x2x24x128xbf16, #tpu.memory_space<vmem>>, vector<1x1x16x128xbf16>
    %46 = vector.shape_cast %45 : vector<1x1x16x128xbf16> to vector<16x128xbf16>
    %c7 = arith.constant 7 : index
    %c0_54 = arith.constant 0 : index
    %c0_55 = arith.constant 0 : index
    %47 = vector.load %arg3[%c7, %c0_54, %c0_55] : memref<9x128x128xbf16, #tpu.memory_space<vmem>>, vector<1x128x128xbf16>
    %48 = vector.shape_cast %47 : vector<1x128x128xbf16> to vector<128x128xbf16>
    %cst_56 = arith.constant dense<0.000000e+00> : vector<16x128xf32>
    %49 = tpu.matmul %46, %48, %cst_56 {dimension_numbers = #tpu.dot_dimension_numbers<[1], [0], [0], [1], [0, 0, 1, 1], [], []>} : vector<16x128xbf16>, vector<128x128xbf16>, vector<16x128xf32> -> vector<16x128xf32>
    %50 = arith.addf %44, %49 : vector<16x128xf32>
    %c0_57 = arith.constant 0 : index
    %c0_58 = arith.constant 0 : index
    %c7_59 = arith.constant 7 : index
    %c0_60 = arith.constant 0 : index
    %51 = vector.load %arg2[%c0_57, %c0_58, %c7_59, %c0_60] : memref<1x2x24x128xbf16, #tpu.memory_space<vmem>>, vector<1x1x16x128xbf16>
    %52 = vector.shape_cast %51 : vector<1x1x16x128xbf16> to vector<16x128xbf16>
    %c8 = arith.constant 8 : index
    %c0_61 = arith.constant 0 : index
    %c0_62 = arith.constant 0 : index
    %53 = vector.load %arg3[%c8, %c0_61, %c0_62] : memref<9x128x128xbf16, #tpu.memory_space<vmem>>, vector<1x128x128xbf16>
    %54 = vector.shape_cast %53 : vector<1x128x128xbf16> to vector<128x128xbf16>
    %cst_63 = arith.constant dense<0.000000e+00> : vector<16x128xf32>
    %55 = tpu.matmul %52, %54, %cst_63 {dimension_numbers = #tpu.dot_dimension_numbers<[1], [0], [0], [1], [0, 0, 1, 1], [], []>} : vector<16x128xbf16>, vector<128x128xbf16>, vector<16x128xf32> -> vector<16x128xf32>
    %56 = arith.addf %50, %55 : vector<16x128xf32>
    %cst_64 = arith.constant 0.000000e+00 : f32
    %57 = vector.broadcast %cst_64 : f32 to vector<16x128xf32>
    %58 = arith.maximumf %56, %57 : vector<16x128xf32>
    %59 = arith.truncf %58 : vector<16x128xf32> to vector<16x128xbf16>
    %c0_65 = arith.constant 0 : index
    %c0_66 = arith.constant 0 : index
    %c0_67 = arith.constant 0 : index
    %60 = vector.load %arg5[%c0_65, %c0_66, %c0_67] : memref<1x16x128xbf16, #tpu.memory_space<vmem>>, vector<1x16x128xbf16>
    %61 = vector.shape_cast %60 : vector<1x16x128xbf16> to vector<16x128xbf16>
    %62 = vector.shape_cast %59 : vector<16x128xbf16> to vector<1x16x128xbf16>
    tpu.vector_store %arg5[%c0_65, %c0_66, %c0_67], %62 {strides = array<i32>} : memref<1x16x128xbf16, #tpu.memory_space<vmem>>, vector<1x16x128xbf16>,
    return
  }
  func.func @transform_0(%arg0: i32, %arg1: i32) -> (i32, i32, i32, i32) {
    %c0_i32 = arith.constant 0 : i32
    %c0_i32_0 = arith.constant 0 : i32
    %c0_i32_1 = arith.constant 0 : i32
    %c0_i32_2 = arith.constant 0 : i32
    return %arg0, %c0_i32, %c0_i32_0, %c0_i32_1 : i32, i32, i32, i32
  }
  func.func @transform_1(%arg0: i32, %arg1: i32) -> (i32, i32, i32) {
    %c0_i32 = arith.constant 0 : i32
    %c0_i32_0 = arith.constant 0 : i32
    %c0_i32_1 = arith.constant 0 : i32
    return %c0_i32, %c0_i32_0, %arg1 : i32, i32, i32
  }
  func.func @transform_2(%arg0: i32, %arg1: i32) -> (i32, i32) {
    %c0_i32 = arith.constant 0 : i32
    %c0_i32_0 = arith.constant 0 : i32
    return %c0_i32, %arg1 : i32, i32
  }
  func.func @transform_3(%arg0: i32, %arg1: i32) -> (i32, i32, i32) {
    %c0_i32 = arith.constant 0 : i32
    %c0_i32_0 = arith.constant 0 : i32
    return %arg0, %c0_i32, %arg1 : i32, i32, i32
  }
}

module attributes {stable_mosaic.version = 11 : i64} {
  func.func @_fused_conv_kernel(%arg0: i32, %arg1: i32, %arg2: memref<1x1x24x128xbf16, #tpu.memory_space<vmem>>, %arg3: memref<9x128x128xbf16, #tpu.memory_space<vmem>>, %arg4: memref<1x128xf32, #tpu.memory_space<vmem>>, %arg5: memref<1x8x128xbf16, #tpu.memory_space<vmem>>) attributes {dimension_semantics = [#tpu.dimension_semantics<parallel>, #tpu.dimension_semantics<parallel>], iteration_bounds = array<i64: 2, 1>, scalar_prefetch = 0 : i64, scratch_operands = 0 : i64, tpu.core_type = #tpu.core_type<tc>, window_params = [{transform_indices = @transform_0, window_bounds = array<i64: 1, 1, 24, 128>}, {transform_indices = @transform_1, window_bounds = array<i64: 9, 128, 128>}, {transform_indices = @transform_2, window_bounds = array<i64: 1, 128>}, {transform_indices = @transform_3, window_bounds = array<i64: 1, 8, 128>}]} {
    %c0 = arith.constant 0 : index
    %c0_0 = arith.constant 0 : index
    %0 = vector.load %arg4[%c0, %c0_0] : memref<1x128xf32, #tpu.memory_space<vmem>>, vector<1x128xf32>
    %1 = vector.shape_cast %0 : vector<1x128xf32> to vector<1x128xf32>
    %2 = vector.broadcast %1 : vector<1x128xf32> to vector<8x128xf32>
    %c0_1 = arith.constant 0 : index
    %c0_2 = arith.constant 0 : index
    %c0_3 = arith.constant 0 : index
    %c0_4 = arith.constant 0 : index
    %3 = vector.load %arg2[%c0_1, %c0_2, %c0_3, %c0_4] : memref<1x1x24x128xbf16, #tpu.memory_space<vmem>>, vector<1x1x8x128xbf16>
    %4 = vector.shape_cast %3 : vector<1x1x8x128xbf16> to vector<8x128xbf16>
    %c0_5 = arith.constant 0 : index
    %c0_6 = arith.constant 0 : index
    %c0_7 = arith.constant 0 : index
    %5 = vector.load %arg3[%c0_5, %c0_6, %c0_7] : memref<9x128x128xbf16, #tpu.memory_space<vmem>>, vector<1x128x128xbf16>
    %6 = vector.shape_cast %5 : vector<1x128x128xbf16> to vector<128x128xbf16>
    %cst = arith.constant dense<0.000000e+00> : vector<8x128xf32>
    %7 = tpu.matmul %4, %6, %cst {dimension_numbers = #tpu.dot_dimension_numbers<[1], [0], [0], [1], [0, 0, 1, 1], [], []>} : vector<8x128xbf16>, vector<128x128xbf16>, vector<8x128xf32> -> vector<8x128xf32>
    %8 = arith.addf %2, %7 : vector<8x128xf32>
    %c0_8 = arith.constant 0 : index
    %c0_9 = arith.constant 0 : index
    %c1 = arith.constant 1 : index
    %c0_10 = arith.constant 0 : index
    %9 = vector.load %arg2[%c0_8, %c0_9, %c1, %c0_10] : memref<1x1x24x128xbf16, #tpu.memory_space<vmem>>, vector<1x1x8x128xbf16>
    %10 = vector.shape_cast %9 : vector<1x1x8x128xbf16> to vector<8x128xbf16>
    %c1_11 = arith.constant 1 : index
    %c0_12 = arith.constant 0 : index
    %c0_13 = arith.constant 0 : index
    %11 = vector.load %arg3[%c1_11, %c0_12, %c0_13] : memref<9x128x128xbf16, #tpu.memory_space<vmem>>, vector<1x128x128xbf16>
    %12 = vector.shape_cast %11 : vector<1x128x128xbf16> to vector<128x128xbf16>
    %cst_14 = arith.constant dense<0.000000e+00> : vector<8x128xf32>
    %13 = tpu.matmul %10, %12, %cst_14 {dimension_numbers = #tpu.dot_dimension_numbers<[1], [0], [0], [1], [0, 0, 1, 1], [], []>} : vector<8x128xbf16>, vector<128x128xbf16>, vector<8x128xf32> -> vector<8x128xf32>
    %14 = arith.addf %8, %13 : vector<8x128xf32>
    %c0_15 = arith.constant 0 : index
    %c0_16 = arith.constant 0 : index
    %c2 = arith.constant 2 : index
    %c0_17 = arith.constant 0 : index
    %15 = vector.load %arg2[%c0_15, %c0_16, %c2, %c0_17] : memref<1x1x24x128xbf16, #tpu.memory_space<vmem>>, vector<1x1x8x128xbf16>
    %16 = vector.shape_cast %15 : vector<1x1x8x128xbf16> to vector<8x128xbf16>
    %c2_18 = arith.constant 2 : index
    %c0_19 = arith.constant 0 : index
    %c0_20 = arith.constant 0 : index
    %17 = vector.load %arg3[%c2_18, %c0_19, %c0_20] : memref<9x128x128xbf16, #tpu.memory_space<vmem>>, vector<1x128x128xbf16>
    %18 = vector.shape_cast %17 : vector<1x128x128xbf16> to vector<128x128xbf16>
    %cst_21 = arith.constant dense<0.000000e+00> : vector<8x128xf32>
    %19 = tpu.matmul %16, %18, %cst_21 {dimension_numbers = #tpu.dot_dimension_numbers<[1], [0], [0], [1], [0, 0, 1, 1], [], []>} : vector<8x128xbf16>, vector<128x128xbf16>, vector<8x128xf32> -> vector<8x128xf32>
    %20 = arith.addf %14, %19 : vector<8x128xf32>
    %c0_22 = arith.constant 0 : index
    %c0_23 = arith.constant 0 : index
    %c4 = arith.constant 4 : index
    %c0_24 = arith.constant 0 : index
    %21 = vector.load %arg2[%c0_22, %c0_23, %c4, %c0_24] : memref<1x1x24x128xbf16, #tpu.memory_space<vmem>>, vector<1x1x8x128xbf16>
    %22 = vector.shape_cast %21 : vector<1x1x8x128xbf16> to vector<8x128xbf16>
    %c3 = arith.constant 3 : index
    %c0_25 = arith.constant 0 : index
    %c0_26 = arith.constant 0 : index
    %23 = vector.load %arg3[%c3, %c0_25, %c0_26] : memref<9x128x128xbf16, #tpu.memory_space<vmem>>, vector<1x128x128xbf16>
    %24 = vector.shape_cast %23 : vector<1x128x128xbf16> to vector<128x128xbf16>
    %cst_27 = arith.constant dense<0.000000e+00> : vector<8x128xf32>
    %25 = tpu.matmul %22, %24, %cst_27 {dimension_numbers = #tpu.dot_dimension_numbers<[1], [0], [0], [1], [0, 0, 1, 1], [], []>} : vector<8x128xbf16>, vector<128x128xbf16>, vector<8x128xf32> -> vector<8x128xf32>
    %26 = arith.addf %20, %25 : vector<8x128xf32>
    %c0_28 = arith.constant 0 : index
    %c0_29 = arith.constant 0 : index
    %c5 = arith.constant 5 : index
    %c0_30 = arith.constant 0 : index
    %27 = vector.load %arg2[%c0_28, %c0_29, %c5, %c0_30] : memref<1x1x24x128xbf16, #tpu.memory_space<vmem>>, vector<1x1x8x128xbf16>
    %28 = vector.shape_cast %27 : vector<1x1x8x128xbf16> to vector<8x128xbf16>
    %c4_31 = arith.constant 4 : index
    %c0_32 = arith.constant 0 : index
    %c0_33 = arith.constant 0 : index
    %29 = vector.load %arg3[%c4_31, %c0_32, %c0_33] : memref<9x128x128xbf16, #tpu.memory_space<vmem>>, vector<1x128x128xbf16>
    %30 = vector.shape_cast %29 : vector<1x128x128xbf16> to vector<128x128xbf16>
    %cst_34 = arith.constant dense<0.000000e+00> : vector<8x128xf32>
    %31 = tpu.matmul %28, %30, %cst_34 {dimension_numbers = #tpu.dot_dimension_numbers<[1], [0], [0], [1], [0, 0, 1, 1], [], []>} : vector<8x128xbf16>, vector<128x128xbf16>, vector<8x128xf32> -> vector<8x128xf32>
    %32 = arith.addf %26, %31 : vector<8x128xf32>
    %c0_35 = arith.constant 0 : index
    %c0_36 = arith.constant 0 : index
    %c6 = arith.constant 6 : index
    %c0_37 = arith.constant 0 : index
    %33 = vector.load %arg2[%c0_35, %c0_36, %c6, %c0_37] : memref<1x1x24x128xbf16, #tpu.memory_space<vmem>>, vector<1x1x8x128xbf16>
    %34 = vector.shape_cast %33 : vector<1x1x8x128xbf16> to vector<8x128xbf16>
    %c5_38 = arith.constant 5 : index
    %c0_39 = arith.constant 0 : index
    %c0_40 = arith.constant 0 : index
    %35 = vector.load %arg3[%c5_38, %c0_39, %c0_40] : memref<9x128x128xbf16, #tpu.memory_space<vmem>>, vector<1x128x128xbf16>
    %36 = vector.shape_cast %35 : vector<1x128x128xbf16> to vector<128x128xbf16>
    %cst_41 = arith.constant dense<0.000000e+00> : vector<8x128xf32>
    %37 = tpu.matmul %34, %36, %cst_41 {dimension_numbers = #tpu.dot_dimension_numbers<[1], [0], [0], [1], [0, 0, 1, 1], [], []>} : vector<8x128xbf16>, vector<128x128xbf16>, vector<8x128xf32> -> vector<8x128xf32>
    %38 = arith.addf %32, %37 : vector<8x128xf32>
    %c0_42 = arith.constant 0 : index
    %c0_43 = arith.constant 0 : index
    %c8 = arith.constant 8 : index
    %c0_44 = arith.constant 0 : index
    %39 = vector.load %arg2[%c0_42, %c0_43, %c8, %c0_44] : memref<1x1x24x128xbf16, #tpu.memory_space<vmem>>, vector<1x1x8x128xbf16>
    %40 = vector.shape_cast %39 : vector<1x1x8x128xbf16> to vector<8x128xbf16>
    %c6_45 = arith.constant 6 : index
    %c0_46 = arith.constant 0 : index
    %c0_47 = arith.constant 0 : index
    %41 = vector.load %arg3[%c6_45, %c0_46, %c0_47] : memref<9x128x128xbf16, #tpu.memory_space<vmem>>, vector<1x128x128xbf16>
    %42 = vector.shape_cast %41 : vector<1x128x128xbf16> to vector<128x128xbf16>
    %cst_48 = arith.constant dense<0.000000e+00> : vector<8x128xf32>
    %43 = tpu.matmul %40, %42, %cst_48 {dimension_numbers = #tpu.dot_dimension_numbers<[1], [0], [0], [1], [0, 0, 1, 1], [], []>} : vector<8x128xbf16>, vector<128x128xbf16>, vector<8x128xf32> -> vector<8x128xf32>
    %44 = arith.addf %38, %43 : vector<8x128xf32>
    %c0_49 = arith.constant 0 : index
    %c0_50 = arith.constant 0 : index
    %c9 = arith.constant 9 : index
    %c0_51 = arith.constant 0 : index
    %45 = vector.load %arg2[%c0_49, %c0_50, %c9, %c0_51] : memref<1x1x24x128xbf16, #tpu.memory_space<vmem>>, vector<1x1x8x128xbf16>
    %46 = vector.shape_cast %45 : vector<1x1x8x128xbf16> to vector<8x128xbf16>
    %c7 = arith.constant 7 : index
    %c0_52 = arith.constant 0 : index
    %c0_53 = arith.constant 0 : index
    %47 = vector.load %arg3[%c7, %c0_52, %c0_53] : memref<9x128x128xbf16, #tpu.memory_space<vmem>>, vector<1x128x128xbf16>
    %48 = vector.shape_cast %47 : vector<1x128x128xbf16> to vector<128x128xbf16>
    %cst_54 = arith.constant dense<0.000000e+00> : vector<8x128xf32>
    %49 = tpu.matmul %46, %48, %cst_54 {dimension_numbers = #tpu.dot_dimension_numbers<[1], [0], [0], [1], [0, 0, 1, 1], [], []>} : vector<8x128xbf16>, vector<128x128xbf16>, vector<8x128xf32> -> vector<8x128xf32>
    %50 = arith.addf %44, %49 : vector<8x128xf32>
    %c0_55 = arith.constant 0 : index
    %c0_56 = arith.constant 0 : index
    %c10 = arith.constant 10 : index
    %c0_57 = arith.constant 0 : index
    %51 = vector.load %arg2[%c0_55, %c0_56, %c10, %c0_57] : memref<1x1x24x128xbf16, #tpu.memory_space<vmem>>, vector<1x1x8x128xbf16>
    %52 = vector.shape_cast %51 : vector<1x1x8x128xbf16> to vector<8x128xbf16>
    %c8_58 = arith.constant 8 : index
    %c0_59 = arith.constant 0 : index
    %c0_60 = arith.constant 0 : index
    %53 = vector.load %arg3[%c8_58, %c0_59, %c0_60] : memref<9x128x128xbf16, #tpu.memory_space<vmem>>, vector<1x128x128xbf16>
    %54 = vector.shape_cast %53 : vector<1x128x128xbf16> to vector<128x128xbf16>
    %cst_61 = arith.constant dense<0.000000e+00> : vector<8x128xf32>
    %55 = tpu.matmul %52, %54, %cst_61 {dimension_numbers = #tpu.dot_dimension_numbers<[1], [0], [0], [1], [0, 0, 1, 1], [], []>} : vector<8x128xbf16>, vector<128x128xbf16>, vector<8x128xf32> -> vector<8x128xf32>
    %56 = arith.addf %50, %55 : vector<8x128xf32>
    %cst_62 = arith.constant 0.000000e+00 : f32
    %57 = vector.broadcast %cst_62 : f32 to vector<8x128xf32>
    %58 = arith.maximumf %56, %57 : vector<8x128xf32>
    %59 = arith.truncf %58 : vector<8x128xf32> to vector<8x128xbf16>
    %c0_63 = arith.constant 0 : index
    %c0_64 = arith.constant 0 : index
    %c0_65 = arith.constant 0 : index
    %60 = vector.load %arg5[%c0_63, %c0_64, %c0_65] : memref<1x8x128xbf16, #tpu.memory_space<vmem>>, vector<1x8x128xbf16>
    %61 = vector.shape_cast %60 : vector<1x8x128xbf16> to vector<8x128xbf16>
    %62 = vector.shape_cast %59 : vector<8x128xbf16> to vector<1x8x128xbf16>
    tpu.vector_store %arg5[%c0_63, %c0_64, %c0_65], %62 {strides = array<i32>} : memref<1x8x128xbf16, #tpu.memory_space<vmem>>, vector<1x8x128xbf16>,
    return
  }
  func.func @transform_0(%arg0: i32, %arg1: i32) -> (i32, i32, i32, i32) {
    %c0_i32 = arith.constant 0 : i32
    %c0_i32_0 = arith.constant 0 : i32
    %c0_i32_1 = arith.constant 0 : i32
    %c0_i32_2 = arith.constant 0 : i32
    return %arg0, %c0_i32, %c0_i32_0, %c0_i32_1 : i32, i32, i32, i32
  }
  func.func @transform_1(%arg0: i32, %arg1: i32) -> (i32, i32, i32) {
    %c0_i32 = arith.constant 0 : i32
    %c0_i32_0 = arith.constant 0 : i32
    %c0_i32_1 = arith.constant 0 : i32
    return %c0_i32, %c0_i32_0, %arg1 : i32, i32, i32
  }
  func.func @transform_2(%arg0: i32, %arg1: i32) -> (i32, i32) {
    %c0_i32 = arith.constant 0 : i32
    %c0_i32_0 = arith.constant 0 : i32
    return %c0_i32, %arg1 : i32, i32
  }
  func.func @transform_3(%arg0: i32, %arg1: i32) -> (i32, i32, i32) {
    %c0_i32 = arith.constant 0 : i32
    %c0_i32_0 = arith.constant 0 : i32
    return %arg0, %c0_i32, %arg1 : i32, i32, i32
  }
}

module attributes {stable_mosaic.version = 11 : i64} {
  func.func @_fused_conv_kernel(%arg0: i32, %arg1: i32, %arg2: memref<1x2x16x128xbf16, #tpu.memory_space<vmem>>, %arg3: memref<9x128x128xbf16, #tpu.memory_space<vmem>>, %arg4: memref<1x128xf32, #tpu.memory_space<vmem>>, %arg5: memref<1x8x128xbf16, #tpu.memory_space<vmem>>) attributes {dimension_semantics = [#tpu.dimension_semantics<parallel>, #tpu.dimension_semantics<parallel>], iteration_bounds = array<i64: 2, 1>, scalar_prefetch = 0 : i64, scratch_operands = 0 : i64, tpu.core_type = #tpu.core_type<tc>, window_params = [{transform_indices = @transform_0, window_bounds = array<i64: 1, 2, 16, 128>}, {transform_indices = @transform_1, window_bounds = array<i64: 9, 128, 128>}, {transform_indices = @transform_2, window_bounds = array<i64: 1, 128>}, {transform_indices = @transform_3, window_bounds = array<i64: 1, 8, 128>}]} {
    %c0 = arith.constant 0 : index
    %c0_0 = arith.constant 0 : index
    %0 = vector.load %arg4[%c0, %c0_0] : memref<1x128xf32, #tpu.memory_space<vmem>>, vector<1x128xf32>
    %1 = vector.shape_cast %0 : vector<1x128xf32> to vector<1x128xf32>
    %2 = vector.broadcast %1 : vector<1x128xf32> to vector<8x128xf32>
    %c0_1 = arith.constant 0 : index
    %c0_2 = arith.constant 0 : index
    %c0_3 = arith.constant 0 : index
    %c0_4 = arith.constant 0 : index
    %3 = vector.load %arg2[%c0_1, %c0_2, %c0_3, %c0_4] : memref<1x2x16x128xbf16, #tpu.memory_space<vmem>>, vector<1x1x8x128xbf16>
    %4 = vector.shape_cast %3 : vector<1x1x8x128xbf16> to vector<8x128xbf16>
    %c0_5 = arith.constant 0 : index
    %c0_6 = arith.constant 0 : index
    %c0_7 = arith.constant 0 : index
    %5 = vector.load %arg3[%c0_5, %c0_6, %c0_7] : memref<9x128x128xbf16, #tpu.memory_space<vmem>>, vector<1x128x128xbf16>
    %6 = vector.shape_cast %5 : vector<1x128x128xbf16> to vector<128x128xbf16>
    %cst = arith.constant dense<0.000000e+00> : vector<8x128xf32>
    %7 = tpu.matmul %4, %6, %cst {dimension_numbers = #tpu.dot_dimension_numbers<[1], [0], [0], [1], [0, 0, 1, 1], [], []>} : vector<8x128xbf16>, vector<128x128xbf16>, vector<8x128xf32> -> vector<8x128xf32>
    %8 = arith.addf %2, %7 : vector<8x128xf32>
    %c0_8 = arith.constant 0 : index
    %c1 = arith.constant 1 : index
    %c0_9 = arith.constant 0 : index
    %c0_10 = arith.constant 0 : index
    %9 = vector.load %arg2[%c0_8, %c1, %c0_9, %c0_10] : memref<1x2x16x128xbf16, #tpu.memory_space<vmem>>, vector<1x1x8x128xbf16>
    %10 = vector.shape_cast %9 : vector<1x1x8x128xbf16> to vector<8x128xbf16>
    %c1_11 = arith.constant 1 : index
    %c0_12 = arith.constant 0 : index
    %c0_13 = arith.constant 0 : index
    %11 = vector.load %arg3[%c1_11, %c0_12, %c0_13] : memref<9x128x128xbf16, #tpu.memory_space<vmem>>, vector<1x128x128xbf16>
    %12 = vector.shape_cast %11 : vector<1x128x128xbf16> to vector<128x128xbf16>
    %cst_14 = arith.constant dense<0.000000e+00> : vector<8x128xf32>
    %13 = tpu.matmul %10, %12, %cst_14 {dimension_numbers = #tpu.dot_dimension_numbers<[1], [0], [0], [1], [0, 0, 1, 1], [], []>} : vector<8x128xbf16>, vector<128x128xbf16>, vector<8x128xf32> -> vector<8x128xf32>
    %14 = arith.addf %8, %13 : vector<8x128xf32>
    %c0_15 = arith.constant 0 : index
    %c0_16 = arith.constant 0 : index
    %c1_17 = arith.constant 1 : index
    %c0_18 = arith.constant 0 : index
    %15 = vector.load %arg2[%c0_15, %c0_16, %c1_17, %c0_18] : memref<1x2x16x128xbf16, #tpu.memory_space<vmem>>, vector<1x1x8x128xbf16>
    %16 = vector.shape_cast %15 : vector<1x1x8x128xbf16> to vector<8x128xbf16>
    %c2 = arith.constant 2 : index
    %c0_19 = arith.constant 0 : index
    %c0_20 = arith.constant 0 : index
    %17 = vector.load %arg3[%c2, %c0_19, %c0_20] : memref<9x128x128xbf16, #tpu.memory_space<vmem>>, vector<1x128x128xbf16>
    %18 = vector.shape_cast %17 : vector<1x128x128xbf16> to vector<128x128xbf16>
    %cst_21 = arith.constant dense<0.000000e+00> : vector<8x128xf32>
    %19 = tpu.matmul %16, %18, %cst_21 {dimension_numbers = #tpu.dot_dimension_numbers<[1], [0], [0], [1], [0, 0, 1, 1], [], []>} : vector<8x128xbf16>, vector<128x128xbf16>, vector<8x128xf32> -> vector<8x128xf32>
    %20 = arith.addf %14, %19 : vector<8x128xf32>
    %c0_22 = arith.constant 0 : index
    %c0_23 = arith.constant 0 : index
    %c2_24 = arith.constant 2 : index
    %c0_25 = arith.constant 0 : index
    %21 = vector.load %arg2[%c0_22, %c0_23, %c2_24, %c0_25] : memref<1x2x16x128xbf16, #tpu.memory_space<vmem>>, vector<1x1x8x128xbf16>
    %22 = vector.shape_cast %21 : vector<1x1x8x128xbf16> to vector<8x128xbf16>
    %c3 = arith.constant 3 : index
    %c0_26 = arith.constant 0 : index
    %c0_27 = arith.constant 0 : index
    %23 = vector.load %arg3[%c3, %c0_26, %c0_27] : memref<9x128x128xbf16, #tpu.memory_space<vmem>>, vector<1x128x128xbf16>
    %24 = vector.shape_cast %23 : vector<1x128x128xbf16> to vector<128x128xbf16>
    %cst_28 = arith.constant dense<0.000000e+00> : vector<8x128xf32>
    %25 = tpu.matmul %22, %24, %cst_28 {dimension_numbers = #tpu.dot_dimension_numbers<[1], [0], [0], [1], [0, 0, 1, 1], [], []>} : vector<8x128xbf16>, vector<128x128xbf16>, vector<8x128xf32> -> vector<8x128xf32>
    %26 = arith.addf %20, %25 : vector<8x128xf32>
    %c0_29 = arith.constant 0 : index
    %c1_30 = arith.constant 1 : index
    %c2_31 = arith.constant 2 : index
    %c0_32 = arith.constant 0 : index
    %27 = vector.load %arg2[%c0_29, %c1_30, %c2_31, %c0_32] : memref<1x2x16x128xbf16, #tpu.memory_space<vmem>>, vector<1x1x8x128xbf16>
    %28 = vector.shape_cast %27 : vector<1x1x8x128xbf16> to vector<8x128xbf16>
    %c4 = arith.constant 4 : index
    %c0_33 = arith.constant 0 : index
    %c0_34 = arith.constant 0 : index
    %29 = vector.load %arg3[%c4, %c0_33, %c0_34] : memref<9x128x128xbf16, #tpu.memory_space<vmem>>, vector<1x128x128xbf16>
    %30 = vector.shape_cast %29 : vector<1x128x128xbf16> to vector<128x128xbf16>
    %cst_35 = arith.constant dense<0.000000e+00> : vector<8x128xf32>
    %31 = tpu.matmul %28, %30, %cst_35 {dimension_numbers = #tpu.dot_dimension_numbers<[1], [0], [0], [1], [0, 0, 1, 1], [], []>} : vector<8x128xbf16>, vector<128x128xbf16>, vector<8x128xf32> -> vector<8x128xf32>
    %32 = arith.addf %26, %31 : vector<8x128xf32>
    %c0_36 = arith.constant 0 : index
    %c0_37 = arith.constant 0 : index
    %c3_38 = arith.constant 3 : index
    %c0_39 = arith.constant 0 : index
    %33 = vector.load %arg2[%c0_36, %c0_37, %c3_38, %c0_39] : memref<1x2x16x128xbf16, #tpu.memory_space<vmem>>, vector<1x1x8x128xbf16>
    %34 = vector.shape_cast %33 : vector<1x1x8x128xbf16> to vector<8x128xbf16>
    %c5 = arith.constant 5 : index
    %c0_40 = arith.constant 0 : index
    %c0_41 = arith.constant 0 : index
    %35 = vector.load %arg3[%c5, %c0_40, %c0_41] : memref<9x128x128xbf16, #tpu.memory_space<vmem>>, vector<1x128x128xbf16>
    %36 = vector.shape_cast %35 : vector<1x128x128xbf16> to vector<128x128xbf16>
    %cst_42 = arith.constant dense<0.000000e+00> : vector<8x128xf32>
    %37 = tpu.matmul %34, %36, %cst_42 {dimension_numbers = #tpu.dot_dimension_numbers<[1], [0], [0], [1], [0, 0, 1, 1], [], []>} : vector<8x128xbf16>, vector<128x128xbf16>, vector<8x128xf32> -> vector<8x128xf32>
    %38 = arith.addf %32, %37 : vector<8x128xf32>
    %c0_43 = arith.constant 0 : index
    %c0_44 = arith.constant 0 : index
    %c4_45 = arith.constant 4 : index
    %c0_46 = arith.constant 0 : index
    %39 = vector.load %arg2[%c0_43, %c0_44, %c4_45, %c0_46] : memref<1x2x16x128xbf16, #tpu.memory_space<vmem>>, vector<1x1x8x128xbf16>
    %40 = vector.shape_cast %39 : vector<1x1x8x128xbf16> to vector<8x128xbf16>
    %c6 = arith.constant 6 : index
    %c0_47 = arith.constant 0 : index
    %c0_48 = arith.constant 0 : index
    %41 = vector.load %arg3[%c6, %c0_47, %c0_48] : memref<9x128x128xbf16, #tpu.memory_space<vmem>>, vector<1x128x128xbf16>
    %42 = vector.shape_cast %41 : vector<1x128x128xbf16> to vector<128x128xbf16>
    %cst_49 = arith.constant dense<0.000000e+00> : vector<8x128xf32>
    %43 = tpu.matmul %40, %42, %cst_49 {dimension_numbers = #tpu.dot_dimension_numbers<[1], [0], [0], [1], [0, 0, 1, 1], [], []>} : vector<8x128xbf16>, vector<128x128xbf16>, vector<8x128xf32> -> vector<8x128xf32>
    %44 = arith.addf %38, %43 : vector<8x128xf32>
    %c0_50 = arith.constant 0 : index
    %c1_51 = arith.constant 1 : index
    %c4_52 = arith.constant 4 : index
    %c0_53 = arith.constant 0 : index
    %45 = vector.load %arg2[%c0_50, %c1_51, %c4_52, %c0_53] : memref<1x2x16x128xbf16, #tpu.memory_space<vmem>>, vector<1x1x8x128xbf16>
    %46 = vector.shape_cast %45 : vector<1x1x8x128xbf16> to vector<8x128xbf16>
    %c7 = arith.constant 7 : index
    %c0_54 = arith.constant 0 : index
    %c0_55 = arith.constant 0 : index
    %47 = vector.load %arg3[%c7, %c0_54, %c0_55] : memref<9x128x128xbf16, #tpu.memory_space<vmem>>, vector<1x128x128xbf16>
    %48 = vector.shape_cast %47 : vector<1x128x128xbf16> to vector<128x128xbf16>
    %cst_56 = arith.constant dense<0.000000e+00> : vector<8x128xf32>
    %49 = tpu.matmul %46, %48, %cst_56 {dimension_numbers = #tpu.dot_dimension_numbers<[1], [0], [0], [1], [0, 0, 1, 1], [], []>} : vector<8x128xbf16>, vector<128x128xbf16>, vector<8x128xf32> -> vector<8x128xf32>
    %50 = arith.addf %44, %49 : vector<8x128xf32>
    %c0_57 = arith.constant 0 : index
    %c0_58 = arith.constant 0 : index
    %c5_59 = arith.constant 5 : index
    %c0_60 = arith.constant 0 : index
    %51 = vector.load %arg2[%c0_57, %c0_58, %c5_59, %c0_60] : memref<1x2x16x128xbf16, #tpu.memory_space<vmem>>, vector<1x1x8x128xbf16>
    %52 = vector.shape_cast %51 : vector<1x1x8x128xbf16> to vector<8x128xbf16>
    %c8 = arith.constant 8 : index
    %c0_61 = arith.constant 0 : index
    %c0_62 = arith.constant 0 : index
    %53 = vector.load %arg3[%c8, %c0_61, %c0_62] : memref<9x128x128xbf16, #tpu.memory_space<vmem>>, vector<1x128x128xbf16>
    %54 = vector.shape_cast %53 : vector<1x128x128xbf16> to vector<128x128xbf16>
    %cst_63 = arith.constant dense<0.000000e+00> : vector<8x128xf32>
    %55 = tpu.matmul %52, %54, %cst_63 {dimension_numbers = #tpu.dot_dimension_numbers<[1], [0], [0], [1], [0, 0, 1, 1], [], []>} : vector<8x128xbf16>, vector<128x128xbf16>, vector<8x128xf32> -> vector<8x128xf32>
    %56 = arith.addf %50, %55 : vector<8x128xf32>
    %cst_64 = arith.constant 0.000000e+00 : f32
    %57 = vector.broadcast %cst_64 : f32 to vector<8x128xf32>
    %58 = arith.maximumf %56, %57 : vector<8x128xf32>
    %59 = arith.truncf %58 : vector<8x128xf32> to vector<8x128xbf16>
    %c0_65 = arith.constant 0 : index
    %c0_66 = arith.constant 0 : index
    %c0_67 = arith.constant 0 : index
    %60 = vector.load %arg5[%c0_65, %c0_66, %c0_67] : memref<1x8x128xbf16, #tpu.memory_space<vmem>>, vector<1x8x128xbf16>
    %61 = vector.shape_cast %60 : vector<1x8x128xbf16> to vector<8x128xbf16>
    %62 = vector.shape_cast %59 : vector<8x128xbf16> to vector<1x8x128xbf16>
    tpu.vector_store %arg5[%c0_65, %c0_66, %c0_67], %62 {strides = array<i32>} : memref<1x8x128xbf16, #tpu.memory_space<vmem>>, vector<1x8x128xbf16>,
    return
  }
  func.func @transform_0(%arg0: i32, %arg1: i32) -> (i32, i32, i32, i32) {
    %c0_i32 = arith.constant 0 : i32
    %c0_i32_0 = arith.constant 0 : i32
    %c0_i32_1 = arith.constant 0 : i32
    %c0_i32_2 = arith.constant 0 : i32
    return %arg0, %c0_i32, %c0_i32_0, %c0_i32_1 : i32, i32, i32, i32
  }
  func.func @transform_1(%arg0: i32, %arg1: i32) -> (i32, i32, i32) {
    %c0_i32 = arith.constant 0 : i32
    %c0_i32_0 = arith.constant 0 : i32
    %c0_i32_1 = arith.constant 0 : i32
    return %c0_i32, %c0_i32_0, %arg1 : i32, i32, i32
  }
  func.func @transform_2(%arg0: i32, %arg1: i32) -> (i32, i32) {
    %c0_i32 = arith.constant 0 : i32
    %c0_i32_0 = arith.constant 0 : i32
    return %c0_i32, %arg1 : i32, i32
  }
  func.func @transform_3(%arg0: i32, %arg1: i32) -> (i32, i32, i32) {
    %c0_i32 = arith.constant 0 : i32
    %c0_i32_0 = arith.constant 0 : i32
    return %arg0, %c0_i32, %arg1 : i32, i32, i32
  }
}

module attributes {stable_mosaic.version = 11 : i64} {
  func.func @_gap_linear_kernel(%arg0: i32, %arg1: memref<2x1x128xbf16, #tpu.memory_space<vmem>>, %arg2: memref<128x128xf32, #tpu.memory_space<vmem>>, %arg3: memref<1x128xf32, #tpu.memory_space<vmem>>, %arg4: memref<2x128xf32, #tpu.memory_space<vmem>>) attributes {dimension_semantics = [#tpu.dimension_semantics<arbitrary>], iteration_bounds = array<i64: 1>, scalar_prefetch = 0 : i64, scratch_operands = 0 : i64, tpu.core_type = #tpu.core_type<tc>, window_params = [{pipeline_mode = #tpu.pipeline_mode<synchronous>, transform_indices = @transform_0, window_bounds = array<i64: 2, 1, 128>}, {pipeline_mode = #tpu.pipeline_mode<synchronous>, transform_indices = @transform_1, window_bounds = array<i64: 128, 128>}, {pipeline_mode = #tpu.pipeline_mode<synchronous>, transform_indices = @transform_2, window_bounds = array<i64: 1, 128>}, {pipeline_mode = #tpu.pipeline_mode<synchronous>, transform_indices = @transform_3, window_bounds = array<i64: 2, 128>}]} {
    %c0 = arith.constant 0 : index
    %c0_0 = arith.constant 0 : index
    %c0_1 = arith.constant 0 : index
    %0 = vector.load %arg1[%c0, %c0_0, %c0_1] : memref<2x1x128xbf16, #tpu.memory_space<vmem>>, vector<2x1x128xbf16>
    %1 = arith.extf %0 : vector<2x1x128xbf16> to vector<2x1x128xf32>
    %cst = arith.constant dense<0.000000e+00> : vector<2x128xf32>
    %2 = vector.multi_reduction <add>, %1, %cst [1] : vector<2x1x128xf32> to vector<2x128xf32>
    %cst_2 = arith.constant 1.000000e+00 : f32
    %3 = vector.broadcast %cst_2 : f32 to vector<2x128xf32>
    %4 = arith.mulf %2, %3 : vector<2x128xf32>
    %c0_3 = arith.constant 0 : index
    %c0_4 = arith.constant 0 : index
    %5 = vector.load %arg2[%c0_3, %c0_4] : memref<128x128xf32, #tpu.memory_space<vmem>>, vector<128x128xf32>
    %cst_5 = arith.constant dense<0.000000e+00> : vector<2x128xf32>
    %6 = tpu.matmul %4, %5, %cst_5 {dimension_numbers = #tpu.dot_dimension_numbers<[1], [0], [0], [1], [0, 0, 1, 1], [], []>} : vector<2x128xf32>, vector<128x128xf32>, vector<2x128xf32> -> vector<2x128xf32>
    %c0_6 = arith.constant 0 : index
    %c0_7 = arith.constant 0 : index
    %7 = vector.load %arg3[%c0_6, %c0_7] : memref<1x128xf32, #tpu.memory_space<vmem>>, vector<1x128xf32>
    %8 = vector.broadcast %7 : vector<1x128xf32> to vector<2x128xf32>
    %9 = arith.addf %6, %8 : vector<2x128xf32>
    %c0_8 = arith.constant 0 : index
    %c0_9 = arith.constant 0 : index
    %10 = vector.load %arg4[%c0_8, %c0_9] : memref<2x128xf32, #tpu.memory_space<vmem>>, vector<2x128xf32>
    tpu.vector_store %arg4[%c0_8, %c0_9], %9 {strides = array<i32>} : memref<2x128xf32, #tpu.memory_space<vmem>>, vector<2x128xf32>,
    return
  }
  func.func @transform_0(%arg0: i32) -> (i32, i32, i32) {
    %c0_i32 = arith.constant 0 : i32
    %c0_i32_0 = arith.constant 0 : i32
    %c0_i32_1 = arith.constant 0 : i32
    %c0_i32_2 = arith.constant 0 : i32
    return %c0_i32, %c0_i32_0, %c0_i32_1 : i32, i32, i32
  }
  func.func @transform_1(%arg0: i32) -> (i32, i32) {
    %c0_i32 = arith.constant 0 : i32
    %c0_i32_0 = arith.constant 0 : i32
    %c0_i32_1 = arith.constant 0 : i32
    return %c0_i32, %c0_i32_0 : i32, i32
  }
  func.func @transform_2(%arg0: i32) -> (i32, i32) {
    %c0_i32 = arith.constant 0 : i32
    %c0_i32_0 = arith.constant 0 : i32
    %c0_i32_1 = arith.constant 0 : i32
    return %c0_i32, %c0_i32_0 : i32, i32
  }
  func.func @transform_3(%arg0: i32) -> (i32, i32) {
    %c0_i32 = arith.constant 0 : i32
    %c0_i32_0 = arith.constant 0 : i32
    %c0_i32_1 = arith.constant 0 : i32
    return %c0_i32, %c0_i32_0 : i32, i32
  }
}

module attributes {stable_mosaic.version = 11 : i64} {
  func.func @_fused_conv_kernel(%arg0: i32, %arg1: i32, %arg2: memref<1x2x16x128xbf16, #tpu.memory_space<vmem>>, %arg3: memref<9x128x128xbf16, #tpu.memory_space<vmem>>, %arg4: memref<1x128xf32, #tpu.memory_space<vmem>>, %arg5: memref<1x8x128xbf16, #tpu.memory_space<vmem>>) attributes {dimension_semantics = [#tpu.dimension_semantics<parallel>, #tpu.dimension_semantics<parallel>], iteration_bounds = array<i64: 2, 1>, scalar_prefetch = 0 : i64, scratch_operands = 0 : i64, tpu.core_type = #tpu.core_type<tc>, window_params = [{transform_indices = @transform_0, window_bounds = array<i64: 1, 2, 16, 128>}, {transform_indices = @transform_1, window_bounds = array<i64: 9, 128, 128>}, {transform_indices = @transform_2, window_bounds = array<i64: 1, 128>}, {transform_indices = @transform_3, window_bounds = array<i64: 1, 8, 128>}]} {
    %c0 = arith.constant 0 : index
    %c0_0 = arith.constant 0 : index
    %0 = vector.load %arg4[%c0, %c0_0] : memref<1x128xf32, #tpu.memory_space<vmem>>, vector<1x128xf32>
    %1 = vector.shape_cast %0 : vector<1x128xf32> to vector<1x128xf32>
    %2 = vector.broadcast %1 : vector<1x128xf32> to vector<8x128xf32>
    %c0_1 = arith.constant 0 : index
    %c0_2 = arith.constant 0 : index
    %c0_3 = arith.constant 0 : index
    %c0_4 = arith.constant 0 : index
    %3 = vector.load %arg2[%c0_1, %c0_2, %c0_3, %c0_4] : memref<1x2x16x128xbf16, #tpu.memory_space<vmem>>, vector<1x1x8x128xbf16>
    %4 = vector.shape_cast %3 : vector<1x1x8x128xbf16> to vector<8x128xbf16>
    %c0_5 = arith.constant 0 : index
    %c0_6 = arith.constant 0 : index
    %c0_7 = arith.constant 0 : index
    %5 = vector.load %arg3[%c0_5, %c0_6, %c0_7] : memref<9x128x128xbf16, #tpu.memory_space<vmem>>, vector<1x128x128xbf16>
    %6 = vector.shape_cast %5 : vector<1x128x128xbf16> to vector<128x128xbf16>
    %cst = arith.constant dense<0.000000e+00> : vector<8x128xf32>
    %7 = tpu.matmul %4, %6, %cst {dimension_numbers = #tpu.dot_dimension_numbers<[1], [0], [0], [1], [0, 0, 1, 1], [], []>} : vector<8x128xbf16>, vector<128x128xbf16>, vector<8x128xf32> -> vector<8x128xf32>
    %8 = arith.addf %2, %7 : vector<8x128xf32>
    %c0_8 = arith.constant 0 : index
    %c1 = arith.constant 1 : index
    %c0_9 = arith.constant 0 : index
    %c0_10 = arith.constant 0 : index
    %9 = vector.load %arg2[%c0_8, %c1, %c0_9, %c0_10] : memref<1x2x16x128xbf16, #tpu.memory_space<vmem>>, vector<1x1x8x128xbf16>
    %10 = vector.shape_cast %9 : vector<1x1x8x128xbf16> to vector<8x128xbf16>
    %c1_11 = arith.constant 1 : index
    %c0_12 = arith.constant 0 : index
    %c0_13 = arith.constant 0 : index
    %11 = vector.load %arg3[%c1_11, %c0_12, %c0_13] : memref<9x128x128xbf16, #tpu.memory_space<vmem>>, vector<1x128x128xbf16>
    %12 = vector.shape_cast %11 : vector<1x128x128xbf16> to vector<128x128xbf16>
    %cst_14 = arith.constant dense<0.000000e+00> : vector<8x128xf32>
    %13 = tpu.matmul %10, %12, %cst_14 {dimension_numbers = #tpu.dot_dimension_numbers<[1], [0], [0], [1], [0, 0, 1, 1], [], []>} : vector<8x128xbf16>, vector<128x128xbf16>, vector<8x128xf32> -> vector<8x128xf32>
    %14 = arith.addf %8, %13 : vector<8x128xf32>
    %c0_15 = arith.constant 0 : index
    %c0_16 = arith.constant 0 : index
    %c1_17 = arith.constant 1 : index
    %c0_18 = arith.constant 0 : index
    %15 = vector.load %arg2[%c0_15, %c0_16, %c1_17, %c0_18] : memref<1x2x16x128xbf16, #tpu.memory_space<vmem>>, vector<1x1x8x128xbf16>
    %16 = vector.shape_cast %15 : vector<1x1x8x128xbf16> to vector<8x128xbf16>
    %c2 = arith.constant 2 : index
    %c0_19 = arith.constant 0 : index
    %c0_20 = arith.constant 0 : index
    %17 = vector.load %arg3[%c2, %c0_19, %c0_20] : memref<9x128x128xbf16, #tpu.memory_space<vmem>>, vector<1x128x128xbf16>
    %18 = vector.shape_cast %17 : vector<1x128x128xbf16> to vector<128x128xbf16>
    %cst_21 = arith.constant dense<0.000000e+00> : vector<8x128xf32>
    %19 = tpu.matmul %16, %18, %cst_21 {dimension_numbers = #tpu.dot_dimension_numbers<[1], [0], [0], [1], [0, 0, 1, 1], [], []>} : vector<8x128xbf16>, vector<128x128xbf16>, vector<8x128xf32> -> vector<8x128xf32>
    %20 = arith.addf %14, %19 : vector<8x128xf32>
    %c0_22 = arith.constant 0 : index
    %c1_23 = arith.constant 1 : index
    %c1_24 = arith.constant 1 : index
    %c0_25 = arith.constant 0 : index
    %21 = vector.load %arg2[%c0_22, %c1_23, %c1_24, %c0_25] : memref<1x2x16x128xbf16, #tpu.memory_space<vmem>>, vector<1x1x8x128xbf16>
    %22 = vector.shape_cast %21 : vector<1x1x8x128xbf16> to vector<8x128xbf16>
    %c3 = arith.constant 3 : index
    %c0_26 = arith.constant 0 : index
    %c0_27 = arith.constant 0 : index
    %23 = vector.load %arg3[%c3, %c0_26, %c0_27] : memref<9x128x128xbf16, #tpu.memory_space<vmem>>, vector<1x128x128xbf16>
    %24 = vector.shape_cast %23 : vector<1x128x128xbf16> to vector<128x128xbf16>
    %cst_28 = arith.constant dense<0.000000e+00> : vector<8x128xf32>
    %25 = tpu.matmul %22, %24, %cst_28 {dimension_numbers = #tpu.dot_dimension_numbers<[1], [0], [0], [1], [0, 0, 1, 1], [], []>} : vector<8x128xbf16>, vector<128x128xbf16>, vector<8x128xf32> -> vector<8x128xf32>
    %26 = arith.addf %20, %25 : vector<8x128xf32>
    %c0_29 = arith.constant 0 : index
    %c0_30 = arith.constant 0 : index
    %c2_31 = arith.constant 2 : index
    %c0_32 = arith.constant 0 : index
    %27 = vector.load %arg2[%c0_29, %c0_30, %c2_31, %c0_32] : memref<1x2x16x128xbf16, #tpu.memory_space<vmem>>, vector<1x1x8x128xbf16>
    %28 = vector.shape_cast %27 : vector<1x1x8x128xbf16> to vector<8x128xbf16>
    %c4 = arith.constant 4 : index
    %c0_33 = arith.constant 0 : index
    %c0_34 = arith.constant 0 : index
    %29 = vector.load %arg3[%c4, %c0_33, %c0_34] : memref<9x128x128xbf16, #tpu.memory_space<vmem>>, vector<1x128x128xbf16>
    %30 = vector.shape_cast %29 : vector<1x128x128xbf16> to vector<128x128xbf16>
    %cst_35 = arith.constant dense<0.000000e+00> : vector<8x128xf32>
    %31 = tpu.matmul %28, %30, %cst_35 {dimension_numbers = #tpu.dot_dimension_numbers<[1], [0], [0], [1], [0, 0, 1, 1], [], []>} : vector<8x128xbf16>, vector<128x128xbf16>, vector<8x128xf32> -> vector<8x128xf32>
    %32 = arith.addf %26, %31 : vector<8x128xf32>
    %c0_36 = arith.constant 0 : index
    %c1_37 = arith.constant 1 : index
    %c2_38 = arith.constant 2 : index
    %c0_39 = arith.constant 0 : index
    %33 = vector.load %arg2[%c0_36, %c1_37, %c2_38, %c0_39] : memref<1x2x16x128xbf16, #tpu.memory_space<vmem>>, vector<1x1x8x128xbf16>
    %34 = vector.shape_cast %33 : vector<1x1x8x128xbf16> to vector<8x128xbf16>
    %c5 = arith.constant 5 : index
    %c0_40 = arith.constant 0 : index
    %c0_41 = arith.constant 0 : index
    %35 = vector.load %arg3[%c5, %c0_40, %c0_41] : memref<9x128x128xbf16, #tpu.memory_space<vmem>>, vector<1x128x128xbf16>
    %36 = vector.shape_cast %35 : vector<1x128x128xbf16> to vector<128x128xbf16>
    %cst_42 = arith.constant dense<0.000000e+00> : vector<8x128xf32>
    %37 = tpu.matmul %34, %36, %cst_42 {dimension_numbers = #tpu.dot_dimension_numbers<[1], [0], [0], [1], [0, 0, 1, 1], [], []>} : vector<8x128xbf16>, vector<128x128xbf16>, vector<8x128xf32> -> vector<8x128xf32>
    %38 = arith.addf %32, %37 : vector<8x128xf32>
    %c0_43 = arith.constant 0 : index
    %c0_44 = arith.constant 0 : index
    %c3_45 = arith.constant 3 : index
    %c0_46 = arith.constant 0 : index
    %39 = vector.load %arg2[%c0_43, %c0_44, %c3_45, %c0_46] : memref<1x2x16x128xbf16, #tpu.memory_space<vmem>>, vector<1x1x8x128xbf16>
    %40 = vector.shape_cast %39 : vector<1x1x8x128xbf16> to vector<8x128xbf16>
    %c6 = arith.constant 6 : index
    %c0_47 = arith.constant 0 : index
    %c0_48 = arith.constant 0 : index
    %41 = vector.load %arg3[%c6, %c0_47, %c0_48] : memref<9x128x128xbf16, #tpu.memory_space<vmem>>, vector<1x128x128xbf16>
    %42 = vector.shape_cast %41 : vector<1x128x128xbf16> to vector<128x128xbf16>
    %cst_49 = arith.constant dense<0.000000e+00> : vector<8x128xf32>
    %43 = tpu.matmul %40, %42, %cst_49 {dimension_numbers = #tpu.dot_dimension_numbers<[1], [0], [0], [1], [0, 0, 1, 1], [], []>} : vector<8x128xbf16>, vector<128x128xbf16>, vector<8x128xf32> -> vector<8x128xf32>
    %44 = arith.addf %38, %43 : vector<8x128xf32>
    %c0_50 = arith.constant 0 : index
    %c1_51 = arith.constant 1 : index
    %c3_52 = arith.constant 3 : index
    %c0_53 = arith.constant 0 : index
    %45 = vector.load %arg2[%c0_50, %c1_51, %c3_52, %c0_53] : memref<1x2x16x128xbf16, #tpu.memory_space<vmem>>, vector<1x1x8x128xbf16>
    %46 = vector.shape_cast %45 : vector<1x1x8x128xbf16> to vector<8x128xbf16>
    %c7 = arith.constant 7 : index
    %c0_54 = arith.constant 0 : index
    %c0_55 = arith.constant 0 : index
    %47 = vector.load %arg3[%c7, %c0_54, %c0_55] : memref<9x128x128xbf16, #tpu.memory_space<vmem>>, vector<1x128x128xbf16>
    %48 = vector.shape_cast %47 : vector<1x128x128xbf16> to vector<128x128xbf16>
    %cst_56 = arith.constant dense<0.000000e+00> : vector<8x128xf32>
    %49 = tpu.matmul %46, %48, %cst_56 {dimension_numbers = #tpu.dot_dimension_numbers<[1], [0], [0], [1], [0, 0, 1, 1], [], []>} : vector<8x128xbf16>, vector<128x128xbf16>, vector<8x128xf32> -> vector<8x128xf32>
    %50 = arith.addf %44, %49 : vector<8x128xf32>
    %c0_57 = arith.constant 0 : index
    %c0_58 = arith.constant 0 : index
    %c4_59 = arith.constant 4 : index
    %c0_60 = arith.constant 0 : index
    %51 = vector.load %arg2[%c0_57, %c0_58, %c4_59, %c0_60] : memref<1x2x16x128xbf16, #tpu.memory_space<vmem>>, vector<1x1x8x128xbf16>
    %52 = vector.shape_cast %51 : vector<1x1x8x128xbf16> to vector<8x128xbf16>
    %c8 = arith.constant 8 : index
    %c0_61 = arith.constant 0 : index
    %c0_62 = arith.constant 0 : index
    %53 = vector.load %arg3[%c8, %c0_61, %c0_62] : memref<9x128x128xbf16, #tpu.memory_space<vmem>>, vector<1x128x128xbf16>
    %54 = vector.shape_cast %53 : vector<1x128x128xbf16> to vector<128x128xbf16>
    %cst_63 = arith.constant dense<0.000000e+00> : vector<8x128xf32>
    %55 = tpu.matmul %52, %54, %cst_63 {dimension_numbers = #tpu.dot_dimension_numbers<[1], [0], [0], [1], [0, 0, 1, 1], [], []>} : vector<8x128xbf16>, vector<128x128xbf16>, vector<8x128xf32> -> vector<8x128xf32>
    %56 = arith.addf %50, %55 : vector<8x128xf32>
    %cst_64 = arith.constant 0.000000e+00 : f32
    %57 = vector.broadcast %cst_64 : f32 to vector<8x128xf32>
    %58 = arith.maximumf %56, %57 : vector<8x128xf32>
    %59 = arith.truncf %58 : vector<8x128xf32> to vector<8x128xbf16>
    %c0_65 = arith.constant 0 : index
    %c0_66 = arith.constant 0 : index
    %c0_67 = arith.constant 0 : index
    %60 = vector.load %arg5[%c0_65, %c0_66, %c0_67] : memref<1x8x128xbf16, #tpu.memory_space<vmem>>, vector<1x8x128xbf16>
    %61 = vector.shape_cast %60 : vector<1x8x128xbf16> to vector<8x128xbf16>
    %62 = vector.shape_cast %59 : vector<8x128xbf16> to vector<1x8x128xbf16>
    tpu.vector_store %arg5[%c0_65, %c0_66, %c0_67], %62 {strides = array<i32>} : memref<1x8x128xbf16, #tpu.memory_space<vmem>>, vector<1x8x128xbf16>,
    return
  }
  func.func @transform_0(%arg0: i32, %arg1: i32) -> (i32, i32, i32, i32) {
    %c0_i32 = arith.constant 0 : i32
    %c0_i32_0 = arith.constant 0 : i32
    %c0_i32_1 = arith.constant 0 : i32
    %c0_i32_2 = arith.constant 0 : i32
    return %arg0, %c0_i32, %c0_i32_0, %c0_i32_1 : i32, i32, i32, i32
  }
  func.func @transform_1(%arg0: i32, %arg1: i32) -> (i32, i32, i32) {
    %c0_i32 = arith.constant 0 : i32
    %c0_i32_0 = arith.constant 0 : i32
    %c0_i32_1 = arith.constant 0 : i32
    return %c0_i32, %c0_i32_0, %arg1 : i32, i32, i32
  }
  func.func @transform_2(%arg0: i32, %arg1: i32) -> (i32, i32) {
    %c0_i32 = arith.constant 0 : i32
    %c0_i32_0 = arith.constant 0 : i32
    return %c0_i32, %arg1 : i32, i32
  }
  func.func @transform_3(%arg0: i32, %arg1: i32) -> (i32, i32, i32) {
    %c0_i32 = arith.constant 0 : i32
    %c0_i32_0 = arith.constant 0 : i32
    return %arg0, %c0_i32, %arg1 : i32, i32, i32
  }
}

</mosaic_0001>

<bundles_post_ra>
// kernel: repvgg_forward.9
= control target key start
LH: loop header
LB: loop body
LE: loop exit
PB: predicated region body
PF: predicated region fallthrough
CT: control target
= control target key end

     0   :  { %s2145_s12 = smov 0   ;;  %s2147_s13 = smov 0   ;;  %s2511_s0 = inlined_call_operand.vmem [shape: bf16[2,2,56,128], index: 0, kind: input, shape index: {}]   ;;  %s2512_s1 = inlined_call_operand.vmem [shape: bf16[9,128,128], index: 1, kind: input, shape index: {}]   ;;  %s2513_s2 = inlined_call_operand.vmem [shape: f32[1,128], index: 2, kind: input, shape index: {}]   ;;  %s2514_s3 = inlined_call_operand.vmem [shape: bf16[2,40,128], index: 3, kind: output, shape index: {}]  }
   0x1   :  { %s2149_s14 = smov 0  }
   0x2 LB: > { %s25_s15 = sadd.s32 1, %s2119_s13  ;;  %p1468_p0 = scmp.ge.s32.totalorder %s2123_s14, 1  ;;  %s2123_s14 = sphi %s2149_s14, %s13_s14   ;;  %s2119_s13 = sphi %s2147_s13, %s2516_s13   ;;  %s2115_s12 = sphi %s2145_s12, %s2515_s12  }
   0x3   : > { %p27_p1 = scmp.ge.s32.totalorder %s25_s15, 2  ;;  %p168_p2 = scmp.lt.s32.totalorder %s2123_s14, 3 }
   0x5   : > { %s2518_s15 = smov (%p27_p1, %s25_s15), 0  ;;  %p169_p3 = pnand %p1468_p0, %p168_p2 }
   0x6   : > { %p202_p4 = scmp.lt.s32.totalorder (!%p169_p3), %s2115_s12, 1 }
   0x7   : > { %172 = sbr.rel (%p169_p3) target bundleno = 295 (0x127), region = 32 }
   0xc   : > { %v1967_v0 = vld [vmem:[%s2512_s1 + $0x38] sm:$0xff]  ;;  %v1966_v2 = vld [vmem:[%s2512_s1 + $0x30] sm:$0xff]  ;;  %s2520_s12 = smov (!%p202_p4, %s2115_s12), 1  ;;  %v1965_v6 = vld [vmem:[%s2512_s1 + $0x28] sm:$0xff]  ;;  %vm492_vm0 = vsmask.f32 7424 }
   0xd   : > { %v1986_v1 = vld [vmem:[%s2512_s1 + $0xb8] sm:$0xff]  ;;  %2058 = vmatpush.bf16.msra.mxu1 %v1967_v0  ;;  %311 = vmatpush.bf16.msra.mxu0 %v1967_v0  ;;  %v1985_v3 = vld [vmem:[%s2512_s1 + $0xb0] sm:$0xff]  ;;  %s2074_s30 = smul.u32 56, %s2520_s12  ;;  %v1984_v7 = vld [vmem:[%s2512_s1 + $0xa8] sm:$0xff]  ;;  %vm620_vm1 = vsmask.f32 5376 }
   0xe   : > { %567 = vmatpush.bf16.msra.mxu2 %v1986_v1  ;;  %v1994_v4 = vld [vmem:[%s2512_s1 + $0xf8] sm:$0xff]  ;;  %v1993_v5 = vld [vmem:[%s2512_s1 + $0xf0] sm:$0xff]  ;;  %v1992_v8 = vld [vmem:[%s2512_s1 + $0xe8] sm:$0xff]  ;;  %vm885_vm2 = vcmask 1044480   ;;  %vm1008_vm3 = vcmask 1046528   ;;  %s2075_s5 = smul.u32 20, %s2520_s12 }
   0xf   : > { %693 = vmatpush.bf16.msra.mxu3 %v1994_v4  ;;  %v1964_v9 = vld [vmem:[%s2512_s1 + $0x20] sm:$0xff]  ;;  %s2199_s16 = scalar_lea.vmem %s2511_s0, %s2074_s30  ;;  %v1963_v14 = vld [vmem:[%s2512_s1 + $0x18] sm:$0xff]  ;;  %v1962_v19 = vld [vmem:[%s2512_s1 + $0x10] sm:$0xff]  ;;  %vm1236_vm4 = vsmask.f32 6400 }
  0x10   : > { %v1983_v10 = vld [vmem:[%s2512_s1 + $0xa0] sm:$0xff]  ;;  %v1982_v17 = vld [vmem:[%s2512_s1 + $0x98] sm:$0xff]  ;;  %v1981_v21 = vld [vmem:[%s2512_s1 + $0x90] sm:$0xff]  ;;  %s2496_s8 = scalar_lea.vmem %s2514_s3, %s2075_s5 }
  0x11   : > { %2059 = vmatpush.bf16.msra.mxu1 %v1966_v2  ;;  %312 = vmatpush.bf16.msra.mxu0 %v1966_v2  ;;  %v595_v11 = vld [vmem:[%s2199_s16] sm:$0xc]  ;;  %v1990_v18 = vld [vmem:[%s2512_s1 + $0xd8] sm:$0xff]  ;;  %v2230_v22 = vld [vmem:[%s2199_s16 + $0x8] sm:$0xff] }
  0x12   : > { %568 = vmatpush.bf16.msra.mxu2 %v1985_v3  ;;  %v1991_v12 = vld [vmem:[%s2512_s1 + $0xe0] sm:$0xff]  ;;  %v616_v16 = vunpack.c.l.b16 %v595_v11  ;;  %v1989_v24 = vld [vmem:[%s2512_s1 + $0xd0] sm:$0xff]  ;;  %v1961_v25 = vld [vmem:[%s2512_s1 + $0x8] sm:$0xff]  ;;  %v505_v27 = vshrl.u32 %v2230_v22, 16  ;;  %v501_v33 = vshll.u32 %v2230_v22, 16 }
  0x13   : > { %694 = vmatpush.bf16.msra.mxu3 %v1993_v5  ;;  %v2209_v13 = vld [vmem:[%s2199_s16] sm:$0xff]   ;;  %v2240_v26 = vld [vmem:[%s2199_s16 + $0x10] sm:$0xff]   ;;  %v1980_v30 = vld [vmem:[%s2512_s1 + $0x88] sm:$0xff] }
  0x14   : > { %v2046_v15 = vunpack.c.h.b16 %v2209_v13  ;;  %v496_v23 = vshll.u32 %v2209_v13, 16  ;;  %v494_v31 = vshrl.u32 %v2209_v13, 16  ;;  %v256_v34 = vunpack.c.l.b16 %v2240_v26  ;;  %v1988_v35 = vld [vmem:[%s2512_s1 + $0xc8] sm:$0xff]  ;;  %v1960_v36 = vld [vmem:[%s2512_s1] sm:$0xff]  ;;  %v1977_v37 = vld [vmem:[%s2512_s1 + $0x78] sm:$0xff] }
  0x15   : > { %2060 = vmatpush.bf16.msra.mxu1 %v1965_v6  ;;  %313 = vmatpush.bf16.msra.mxu0 %v1965_v6  ;;  %v629_v40 = vrot.slane %v505_v27, 2  ;;  %v630_v41 = vrot.slane %v501_v33, 3  ;;  %v1979_v42 = vld [vmem:[%s2512_s1 + $0x80] sm:$0xff]  ;;  %v503_v44 = vrot.slane %v501_v33, 1  ;;  %v2005_v45 = vld [vmem:[%s2512_s1 + $0x138] sm:$0xff]  ;;  %v1976_v56 = vld [vmem:[%s2512_s1 + $0x70] sm:$0xff] }
  0x16   : > { %569 = vmatpush.bf16.msra.mxu2 %v1984_v7  ;;  %v618_v20 = vpack.c.b16 %v2046_v15, %v616_v16  ;;  %v498_v32 = vrot.slane %v496_v23, 1  ;;  %v596_v46 = vld [vmem:[%s2199_s16 + $0x14] sm:$0x7]  ;;  %v2023_v47 = vld [vmem:[%s2512_s1 + $0x1b8] sm:$0xff]  ;;  %v458_v48 = vld [vmem:[%s2199_s16 + $0x10] sm:$0xf]  ;;  %v259_v51 = vpack.c.b16 %v256_v34, %v256_v34 }
  0x17   : > { %695 = vmatpush.bf16.msra.mxu3 %v1992_v8  ;;  %v459_v49 = vld [vmem:[%s2199_s16 + $0x14] sm:$0x1]  ;;  %v1958_v50 = vld [vmem:[%s2199_s16] sm:$0xff]  ;;  %v2276_v54 = vor.u32 %v630_v41, %v629_v40  ;;  %v617_v55 = vunpack.c.l.b16 %v596_v46  ;;  %v487_v58 = vunpack.c.l.b16 %v458_v48  ;;  %v2034_v60 = vld [vmem:[%s2512_s1 + $0x1f8] sm:$0xff] }
  0x18   : > { %v622_v28 = vshrl.u32 %v618_v20, 16  ;;  %v625_v29 = vshll.u32 %v618_v20, 16  ;;  %v499_v43 = vor.u32 %v498_v32, %v494_v31  ;;  %v1987_v52 = vld [vmem:[%s2512_s1 + $0xc0] sm:$0xff]  ;;  %v488_v59 = vunpack.c.l.b16 %v459_v49  ;;  %v2004_v61 = vld [vmem:[%s2512_s1 + $0x130] sm:$0xff]  ;;  %v1975_v1 = vld [vmem:[%s2512_s1 + $0x68] sm:$0xff] }
  0x19   : > { %2061 = vmatpush.bf16.msra.mxu1 %v1964_v9  ;;  %314 = vmatpush.bf16.msra.mxu0 %v1964_v9  ;;  %v2022_v62 = vld [vmem:[%s2512_s1 + $0x1b0] sm:$0xff]  ;;  %v2293_v0 = vpack.c.b16 %v617_v55, %v487_v58  ;;  %v2003_v4 = vld [vmem:[%s2512_s1 + $0x128] sm:$0xff]  ;;  %v1974_v8 = vld [vmem:[%s2512_s1 + $0x60] sm:$0xff]  ;;  %v507_v20 = vor.u32 %v505_v27, %v503_v44 }
  0x1a   : > { %570 = vmatpush.bf16.msra.mxu2 %v1983_v10  ;;  %v624_v38 = vrot.slane %v622_v28, 2  ;;  %v627_v39 = vrot.slane %v625_v29, 3  ;;  %v504_v57 = vsel %vm492_vm0, %v499_v43, %v503_v44  ;;  %v2298_v2 = vpack.c.b16 %v488_v59, %v487_v58  ;;  %v2033_v3 = vld [vmem:[%s2512_s1 + $0x1f0] sm:$0xff]  ;;  %v2021_v5 = vld [vmem:[%s2512_s1 + $0x1a8] sm:$0xff]  ;;  %v2002_v11 = vld [vmem:[%s2512_s1 + $0x120] sm:$0xff] }
  0x1b   : > { %696 = vmatpush.bf16.msra.mxu3 %v1991_v12  ;;  %v634_v6 = vshrl.u32 %v2293_v0, 16  ;;  %v637_v7 = vshll.u32 %v2293_v0, 16  ;;  %v2032_v10 = vld [vmem:[%s2512_s1 + $0x1e8] sm:$0xff]  ;;  %v2020_v12 = vld [vmem:[%s2512_s1 + $0x1a0] sm:$0xff]  ;;  %v2001_v23 = vld [vmem:[%s2512_s1 + $0x118] sm:$0xff] }
  0x1c   : > { %v628_v53 = vor.u32 %v627_v39, %v624_v38  ;;  %v509_v9 = vshll.u32 %v2298_v2, 16  ;;  %v2031_v27 = vld [vmem:[%s2512_s1 + $0x1e0] sm:$0xff]  ;;  %v1972_v31 = vld [vmem:[%s2512_s1 + $0x50] sm:$0xff]  ;;  %v2030_v40 = vld [vmem:[%s2512_s1 + $0x1d8] sm:$0xff] }
  0x1d   : > { %2062 = vmatpush.bf16.msra.mxu1 %v1963_v14  ;;  %315 = vmatpush.bf16.msra.mxu0 %v1963_v14  ;;  %v636_v14 = vrot.slane %v634_v6, 2  ;;  %v639_v16 = vrot.slane %v637_v7, 3  ;;  %v2000_v33 = vld [vmem:[%s2512_s1 + $0x110] sm:$0xff]  ;;  %v1971_v41 = vld [vmem:[%s2512_s1 + $0x48] sm:$0xff]  ;;  %v1970_v49 = vld [vmem:[%s2512_s1 + $0x40] sm:$0xff] }
  0x1e   : > { %571 = vmatpush.bf16.msra.mxu2 %v1982_v17  ;;  %v632_v63 = vsel %vm620_vm1, %v628_v53, %v2276_v54  ;;  %v1696_v17 = vld [vmem:[%s2199_s16 + $0x1c] sm:$0xc]  ;;  %v2018_v34 = vld [vmem:[%s2512_s1 + $0x190] sm:$0xff]  ;;  %v2017_v43 = vld [vmem:[%s2512_s1 + $0x188] sm:$0xff] }
  0x1f   : > { %697 = vmatpush.bf16.msra.mxu3 %v1990_v18  ;;  %v1995_v18 = vld [vmem:[%s2199_s16 + $0x1c] sm:$0xf0]  ;;  %v2340_v29 = vor.u32 %v639_v16, %v636_v14  ;;  %v2029_v48 = vld [vmem:[%s2512_s1 + $0x1d0] sm:$0xff]  ;;  %v2028_v58 = vld [vmem:[%s2512_s1 + $0x1c8] sm:$0xff] }
  0x20   : > { %v1697_v28 = vor.u32 %v1995_v18, %v1696_v17  ;;  %v2016_v53 = vld [vmem:[%s2512_s1 + $0x180] sm:$0xff]  ;;  %v1704_v59 = vld [vmem:[%s2199_s16 + $0x2c] sm:$0xf] }
  0x21   : > { %2063 = vmatpush.bf16.msra.mxu1 %v1962_v19  ;;  %316 = vmatpush.bf16.msra.mxu0 %v1962_v19  ;;  %v1973_v19 = vld [vmem:[%s2512_s1 + $0x58] sm:$0xff]  ;;  %v2040_v7 = vld [vmem:[%s2512_s1 + $0x228] sm:$0xff]  ;;  %v2039_v17 = vld [vmem:[%s2512_s1 + $0x220] sm:$0xff] }
  0x22   : > { %572 = vmatpush.bf16.msra.mxu2 %v1981_v21  ;;  %v2331_v21 = vrot.slane %v509_v9, 1  ;;  %v2010_v9 = vld [vmem:[%s2512_s1 + $0x160] sm:$0xff]  ;;  %v2025_v13 = vld [vmem:[%s2199_s16 + $0x28] sm:$0xff] }
  0x23   : > { %698 = vmatpush.bf16.msra.mxu3 %v1989_v24  ;;  %v2019_v24 = vld [vmem:[%s2512_s1 + $0x198] sm:$0xff] }
  0x24   : > { %v512_v32 = vsel %vm492_vm0, %v507_v20, %v2331_v21  ;;  %v2431_v20 = vld [vmem:[%s2199_s16 + $0xc] sm:$0xff] }
  0x25   : > { %2064 = vmatpush.bf16.msra.mxu1 %v1961_v25  ;;  %317 = vmatpush.bf16.msra.mxu0 %v1961_v25  ;;  %v1959_v25 = vld [vmem:[%s2199_s16 + $0x8] sm:$0xff] }
  0x26   : > { %573 = vmatpush.bf16.msra.mxu2 %v1980_v30  ;;  %v1996_v30 = vld [vmem:[%s2199_s16 + $0x24] sm:$0xff] }
  0x27   : > { %699 = vmatpush.bf16.msra.mxu3 %v1988_v35  ;;  %v760_v35 = vshrl.u32 %v1697_v28, 16  ;;  %v768_v38 = vshrl.u32 %v1996_v30, 16  ;;  %v771_v39 = vshll.u32 %v1996_v30, 16 }
  0x29   : > { %2065 = vmatpush.bf16.msra.mxu1 %v1960_v36  ;;  %318 = vmatpush.bf16.msra.mxu0 %v1960_v36  ;;  %v641_v36 = vsel %vm620_vm1, %v2276_v54, %v2340_v29  ;;  %v762_v44 = vrot.slane %v760_v35, 2  ;;  %v770_v46 = vrot.slane %v768_v38, 2  ;;  %v1968_v54 = vld [vmem:[%s2199_s16 + $0x1c] sm:$0xff] }
  0x2a   : > { %574 = vmatpush.bf16.msra.mxu2 %v1979_v42  ;;  %v1999_v42 = vld [vmem:[%s2512_s1 + $0x108] sm:$0xff] }
  0x2b   : > { %700 = vmatpush.bf16.msra.mxu3 %v1987_v52  ;;  %v2042_v52 = vld [vmem:[%s2512_s1 + $0x238] sm:$0xff] }
  0x2c   : > { %319 = vmatmul.bf16.vlgmr.msra.gmra.mxu0 %v1958_v50  ;;  %329 = vmatmul.bf16.vlgmr.msra.gmra.mxu1 %v259_v51  ;;  %v2013_v50 = vld [vmem:[%s2512_s1 + $0x178] sm:$0xff]  ;;  %v1998_v51 = vld [vmem:[%s2512_s1 + $0x100] sm:$0xff] }
  0x2d   : > { %426 = vmatpush.bf16.msrb.mxu1 %v1977_v37  ;;  %836 = vmatpush.bf16.msrb.mxu0 %v2005_v45  ;;  %v763_v37 = vshll.u32 %v1697_v28, 16 }
  0x2e   : > { %1065 = vmatpush.bf16.msrb.mxu2 %v2023_v47  ;;  %701 = vmatmul.bf16.vlgmr.msra.gmra.mxu3 %v632_v63  ;;  %v773_v47 = vrot.slane %v771_v39, 3  ;;  %v2007_v39 = vld [vmem:[%s2512_s1 + $0x148] sm:$0xff] }
  0x2f   : > { %575 = vmatmul.bf16.vlgmr.msra.gmra.mxu2 %v504_v57  ;;  %1187 = vmatpush.bf16.msrb.mxu3 %v2034_v60  ;;  %v765_v45 = vrot.slane %v763_v37, 3  ;;  %v513_v57 = vshrl.u32 %v2298_v2, 16  ;;  %v1997_v60 = vld [vmem:[%s2199_s16 + $0x2c] sm:$0x70] }
  0x30   : > { %v1705_v2 = vor.u32 %v1997_v60, %v1704_v59  ;;  %v2037_v37 = vld [vmem:[%s2512_s1 + $0x210] sm:$0xff]  ;;  %v1246_v60 = vshrl.u32 %v2431_v20, 16 }
  0x31   : > { %427 = vmatpush.bf16.msrb.mxu1 %v1976_v56  ;;  %837 = vmatpush.bf16.msrb.mxu0 %v2004_v61  ;;  %v766_v55 = vor.u32 %v765_v45, %v762_v44  ;;  %v2391_v56 = vor.u32 %v773_v47, %v770_v46  ;;  %v2012_v61 = vld [vmem:[%s2512_s1 + $0x170] sm:$0xff]  ;;  %v515_v63 = vor.u32 %v513_v57, %v2331_v21  ;;  %v1515_v44 = vld [vmem:[%s2199_s16 + $0x2c] sm:$0xf]  ;;  %v1003_v45 = vunpack.c.h.b16 %v2240_v26  ;;  %v2006_v47 = vld [vmem:[%s2512_s1 + $0x140] sm:$0xff] }
  0x32   : > { %1066 = vmatpush.bf16.msrb.mxu2 %v2022_v62  ;;  %v780_v6 = vshll.u32 %v1705_v2, 16 }
  0x33   : > { %1188 = vmatpush.bf16.msrb.mxu3 %v2033_v3  ;;  %v775_v62 = vsel %vm620_vm1, %v766_v55, %v2391_v56  ;;  %v2027_v3 = vld [vmem:[%s2512_s1 + $0x1c0] sm:$0xff] }
  0x34   : > { %v782_v16 = vrot.slane %v780_v6, 3 }
  0x35   : > { %428 = vmatpush.bf16.msrb.mxu1 %v1975_v1  ;;  %838 = vmatpush.bf16.msrb.mxu0 %v2003_v4  ;;  %v2041_v1 = vld [vmem:[%s2512_s1 + $0x230] sm:$0xff]  ;;  %v2011_v4 = vld [vmem:[%s2512_s1 + $0x168] sm:$0xff] }
  0x36   : > { %1067 = vmatpush.bf16.msrb.mxu2 %v2021_v5  ;;  %v777_v5 = vshrl.u32 %v1705_v2, 16 }
  0x37   : > { %1189 = vmatpush.bf16.msrb.mxu3 %v2032_v10  ;;  %v1804_v10 = vld [vmem:[%s2199_s16 + $0x4] sm:$0xe] }
  0x38   : > { %v779_v14 = vrot.slane %v777_v5, 2 }
  0x39   : > { %429 = vmatpush.bf16.msrb.mxu1 %v1974_v8  ;;  %839 = vmatpush.bf16.msrb.mxu0 %v2002_v11  ;;  %v864_v8 = vld [vmem:[%s2199_s16] sm:$0x8]  ;;  %v2014_v11 = vld [vmem:[%s2199_s16 + $0x4] sm:$0xf0] }
  0x3a   : > { %1068 = vmatpush.bf16.msrb.mxu2 %v2020_v12  ;;  %v883_v12 = vunpack.c.l.b16 %v864_v8  ;;  %v2433_v21 = vor.u32 %v2014_v11, %v1804_v10  ;;  %v783_v30 = vor.u32 %v782_v16, %v779_v14 }
  0x3b   : > { %1190 = vmatpush.bf16.msrb.mxu3 %v2031_v27 }
  0x3c   : > { %324 = vmatmul.bf16.gmra.mxu0 %v1959_v25  ;;  %v884_v18 = vpack.c.b16 %v2046_v15, %v883_v12  ;;  %v2009_v25 = vld [vmem:[%s2512_s1 + $0x158] sm:$0xff]  ;;  %v1238_v57 = vshrl.u32 %v2433_v21, 16  ;;  %v1241_v59 = vshll.u32 %v2433_v21, 16 }
  0x3d   : > { %430 = vmatpush.bf16.msrb.mxu1 %v1973_v19  ;;  %840 = vmatpush.bf16.msrb.mxu0 %v2001_v23  ;;  %v887_v19 = vrot.slane %v2230_v22, 3  ;;  %v1866_v23 = vld [vmem:[%s2199_s16 + $0x20] sm:$0xe]  ;;  %v2038_v22 = vld [vmem:[%s2512_s1 + $0x218] sm:$0xff] }
  0x3e   : > { %1069 = vmatpush.bf16.msrb.mxu2 %v2019_v24  ;;  %706 = vmatmul.bf16.gmra.mxu3 %v641_v36  ;;  %v2024_v24 = vld [vmem:[%s2199_s16 + $0x20] sm:$0xf0]  ;;  %v886_v28 = vrot.slane %v884_v18, 3  ;;  %v1132_v36 = vrot.slane %v2025_v13, 1 }
  0x3f   : > { %580 = vmatmul.bf16.gmra.mxu2 %v512_v32  ;;  %1191 = vmatpush.bf16.msrb.mxu3 %v2030_v40  ;;  %v1867_v15 = vor.u32 %v2024_v24, %v1866_v23  ;;  %v1010_v32 = vrot.slane %v2431_v20, 1  ;;  %v975_v40 = vld [vmem:[%s2199_s16 + $0x18] sm:$0x1] }
  0x40   : > { %v2446_v27 = vsel %vm885_vm2, %v886_v28, %v887_v19  ;;  %v1004_v46 = vunpack.c.l.b16 %v975_v40 }
  0x41   : > { %431 = vmatpush.bf16.msrb.mxu1 %v1972_v31  ;;  %841 = vmatpush.bf16.msrb.mxu0 %v2000_v33  ;;  %v1009_v31 = vrot.slane %v2433_v21, 1  ;;  %v2008_v33 = vld [vmem:[%s2512_s1 + $0x150] sm:$0xff]  ;;  %v1131_v35 = vrot.slane %v1867_v15, 1 }
  0x42   : > { %1070 = vmatpush.bf16.msrb.mxu2 %v2018_v34  ;;  %v784_v34 = vsel %vm620_vm1, %v2391_v56, %v783_v30 }
  0x43   : > { %1192 = vmatpush.bf16.msrb.mxu3 %v2029_v48  ;;  %v1011_v38 = vsel %vm1008_vm3, %v1009_v31, %v1010_v32 }
  0x45   : > { %432 = vmatpush.bf16.msrb.mxu1 %v1971_v41  ;;  %842 = vmatpush.bf16.msrb.mxu0 %v1999_v42  ;;  %v1133_v41 = vsel %vm1008_vm3, %v1131_v35, %v1132_v36  ;;  %v2036_v42 = vld [vmem:[%s2512_s1 + $0x208] sm:$0xff] }
  0x46   : > { %1071 = vmatpush.bf16.msrb.mxu2 %v2017_v43  ;;  %v889_v43 = vrot.slane %v2293_v0, 3  ;;  %v1007_v0 = vpack.c.b16 %v1004_v46, %v1003_v45 }
  0x47   : > { %1193 = vmatpush.bf16.msrb.mxu3 %v2028_v58 }
  0x48   : > { %v890_v48 = vsel %vm885_vm2, %v887_v19, %v889_v43 }
  0x49   : > { %433 = vmatpush.bf16.msrb.mxu1 %v1970_v49  ;;  %843 = vmatpush.bf16.msrb.mxu0 %v1998_v51  ;;  %v371_v49 = vunpack.c.l.b16 %v1515_v44  ;;  %v1874_v51 = vld [vmem:[%s2199_s16 + $0x30] sm:$0xf] }
  0x4a   : > { %1072 = vmatpush.bf16.msrb.mxu2 %v2016_v53 }
  0x4b   : > { %1194 = vmatpush.bf16.msrb.mxu3 %v2027_v3  ;;  %v374_v26 = vpack.c.b16 %v371_v49, %v371_v49  ;;  %v1215_v3 = vld [vmem:[%s2199_s16 + $0x18] sm:$0x3] }
  0x4c   : > { %434 = vmatmul.bf16.vlgmr.msrb.gmra.mxu1 %v1968_v54  ;;  %844 = vmatmul.bf16.vlgmr.msrb.gmra.mxu0 %v775_v62  ;;  %v1012_v54 = vrot.slane %v1007_v0, 1  ;;  %v1240_v62 = vrot.slane %v1238_v57, 1  ;;  %v1234_v6 = vunpack.c.l.b16 %v1215_v3 }
  0x4d   : > { %942 = vmatpush.bf16.msra.mxu1 %v2013_v50  ;;  %1314 = vmatpush.bf16.msra.mxu0 %v2042_v52  ;;  %v2035_v50 = vld [vmem:[%s2512_s1 + $0x200] sm:$0xff] }
  0x4e   : > { %2066 = vmatpush.bf16.msra.mxu2 %v2042_v52  ;;  %711 = vmatmul.bf16.gmra.mxu3 %v2340_v29  ;;  %v1969_v29 = vld [vmem:[%s2199_s16 + $0x24] sm:$0xff]  ;;  %v2026_v52 = vld [vmem:[%s2199_s16 + $0x30] sm:$0x10]  ;;  %v1013_v56 = vsel %vm1008_vm3, %v1010_v32, %v1012_v54  ;;  %v1235_v8 = vpack.c.b16 %v1234_v6, %v1003_v45 }
  0x4f   : > { %585 = vmatmul.bf16.gmra.mxu2 %v515_v63  ;;  %v1875_v53 = vor.u32 %v2026_v52, %v1874_v51  ;;  %v1243_v63 = vrot.slane %v1241_v59, 2 }
  0x50   : > { %v1258_v10 = vshll.u32 %v1235_v8, 16 }
  0x51   : > { %943 = vmatpush.bf16.msra.mxu1 %v2012_v61  ;;  %1315 = vmatpush.bf16.msra.mxu0 %v2041_v1  ;;  %v1134_v55 = vrot.slane %v1875_v53, 1  ;;  %v1249_v61 = vshll.u32 %v2431_v20, 16 }
  0x52   : > { %2067 = vmatpush.bf16.msra.mxu2 %v2041_v1  ;;  %v1248_v1 = vrot.slane %v1246_v60, 1  ;;  %v1260_v12 = vrot.slane %v1258_v10, 2 }
  0x53   : > { %v1135_v58 = vsel %vm1008_vm3, %v1132_v36, %v1134_v55  ;;  %v1251_v2 = vrot.slane %v1249_v61, 2 }
  0x55   : > { %944 = vmatpush.bf16.msra.mxu1 %v2011_v4  ;;  %1316 = vmatpush.bf16.msra.mxu0 %v2040_v7  ;;  %v1244_v4 = vor.u32 %v1243_v63, %v1240_v62  ;;  %v1252_v5 = vor.u32 %v1251_v2, %v1248_v1 }
  0x56   : > { %2068 = vmatpush.bf16.msra.mxu2 %v2040_v7 }
  0x57   : > { %v1253_v7 = vsel %vm1236_vm4, %v1244_v4, %v1252_v5 }
  0x59   : > { %945 = vmatpush.bf16.msra.mxu1 %v2010_v9  ;;  %1317 = vmatpush.bf16.msra.mxu0 %v2039_v17  ;;  %v1255_v9 = vshrl.u32 %v1235_v8, 16 }
  0x5a   : > { %2069 = vmatpush.bf16.msra.mxu2 %v2039_v17 }
  0x5b   : > { %v1257_v11 = vrot.slane %v1255_v9, 1 }
  0x5c   : > { %439 = vmatmul.bf16.gmra.mxu1 %v1969_v29  ;;  %849 = vmatmul.bf16.gmra.mxu0 %v784_v34 }
  0x5d   : > { %946 = vmatpush.bf16.msra.mxu1 %v2009_v25  ;;  %1318 = vmatpush.bf16.msra.mxu0 %v2038_v22  ;;  %v1261_v14 = vor.u32 %v1260_v12, %v1257_v11 }
  0x5e   : > { %2070 = vmatpush.bf16.msra.mxu2 %v2038_v22  ;;  %1195 = vmatmul.bf16.vlgmr.msrb.gmra.mxu3 %v1133_v41 }
  0x5f   : > { %1073 = vmatmul.bf16.vlgmr.msrb.gmra.mxu2 %v1011_v38  ;;  %v1262_v16 = vsel %vm1236_vm4, %v1252_v5, %v1261_v14 }
  0x61   : > { %947 = vmatpush.bf16.msra.mxu1 %v2008_v33  ;;  %1319 = vmatpush.bf16.msra.mxu0 %v2037_v37 }
  0x62   : > { %2071 = vmatpush.bf16.msra.mxu2 %v2037_v37 }
  0x65   : > { %948 = vmatpush.bf16.msra.mxu1 %v2007_v39  ;;  %1320 = vmatpush.bf16.msra.mxu0 %v2036_v42 }
  0x66   : > { %2072 = vmatpush.bf16.msra.mxu2 %v2036_v42 }
  0x69   : > { %949 = vmatpush.bf16.msra.mxu1 %v2006_v47  ;;  %1321 = vmatpush.bf16.msra.mxu0 %v2035_v50 }
  0x6a   : > { %2073 = vmatpush.bf16.msra.mxu2 %v2035_v50 }
  0x6c   : > { %444 = vmatmul.bf16.gmra.mxu1 %v374_v26  ;;  %854 = vmatmul.bf16.gmra.mxu0 %v783_v30  ;;  %v2100_v30 = vld [vmem:[%s2513_s2] ss:$0 sm:$0xff] }
  0x6e   : > { %1200 = vmatmul.bf16.gmra.mxu3 %v1135_v58 }
  0x6f   : > { %1078 = vmatmul.bf16.gmra.mxu2 %v1013_v56 }
  0x7c   : > { %950 = vmatmul.bf16.vlgmr.msra.gmra.mxu1 %v2446_v27  ;;  %1322 = vmatmul.bf16.vlgmr.msra.gmra.mxu0 %v1253_v7 }
  0x7e   : > { %1205 = vmatmul.bf16.gmra.mxu3 %v1134_v55 }
  0x7f   : > { %1083 = vmatmul.bf16.gmra.mxu2 %v1012_v54 }
  0x8c   : > { %955 = vmatmul.bf16.gmra.mxu1 %v890_v48  ;;  %1327 = vmatmul.bf16.gmra.mxu0 %v1262_v16 }
  0x8f   : > { %1332 = vmatmul.bf16.vlgmr.msra.gmra.mxu2 %v1261_v14 }
  0x9c   : > { %960 = vmatmul.bf16.gmra.mxu1 %v889_v43 }
  0xa9   : > { %v320_v17 = vpop.f32.mrf.mxu0  ;;  %v330_v18 = vpop.f32.mrf.mxu1 }
  0xaa   : > { %v334_v22 = vadd.f32 %v2100_v30, %v320_v17  ;;  %v338_v57 = vadd.f32 %v2100_v30, %v330_v18 }
  0xb1   : > { %v322_v20 = vpop.f32.mrf.mxu0  ;;  %v332_v21 = vpop.f32.mrf.mxu1 }
  0xb2   : > { %v576_v19 = vpop.f32.mrf.mxu2  ;;  %v702_v23 = vpop.f32.mrf.mxu3  ;;  %v335_v37 = vadd.f32 %v2100_v30, %v322_v20 }
  0xb9   : > { %v325_v25 = vpop.f32.mrf.mxu0 }
  0xba   : > { %v578_v24 = vpop.f32.mrf.mxu2  ;;  %v704_v28 = vpop.f32.mrf.mxu3  ;;  %v336_v44 = vadd.f32 %v2100_v30, %v325_v25 }
  0xc1   : > { %v327_v13 = vpop.f32.mrf.mxu0 }
  0xc2   : > { %v581_v29 = vpop.f32.mrf.mxu2  ;;  %v707_v15 = vpop.f32.mrf.mxu3  ;;  %v337_v51 = vadd.f32 %v2100_v30, %v327_v13 }
  0xc9   : > { %v435_v27 = vpop.f32.mrf.mxu1  ;;  %v845_v34 = vpop.f32.mrf.mxu0 }
  0xca   : > { %v449_v31 = vadd.f32 %v435_v27, %v334_v22  ;;  %v583_v32 = vpop.f32.mrf.mxu2  ;;  %v709_v36 = vpop.f32.mrf.mxu3 }
  0xcc   : > { %v590_v33 = vadd.f32 %v576_v19, %v449_v31 }
  0xce   : > { %v716_v35 = vadd.f32 %v702_v23, %v590_v33 }
  0xd0   : > { %v859_v5 = vadd.f32 %v845_v34, %v716_v35 }
  0xd1   : > { %v437_v38 = vpop.f32.mrf.mxu1  ;;  %v847_v42 = vpop.f32.mrf.mxu0 }
  0xd2   : > { %v450_v39 = vadd.f32 %v437_v38, %v335_v37  ;;  %v586_v40 = vpop.f32.mrf.mxu2  ;;  %v2490_v43 = vpop.f32.mrf.mxu3 }
  0xd4   : > { %v591_v41 = vadd.f32 %v578_v24, %v450_v39 }
  0xd6   : > { %v717_v9 = vadd.f32 %v704_v28, %v591_v41 }
  0xd8   : > { %v860_v14 = vadd.f32 %v847_v42, %v717_v9 }
  0xd9   : > { %v440_v45 = vpop.f32.mrf.mxu1  ;;  %v850_v49 = vpop.f32.mrf.mxu0 }
  0xda   : > { %v451_v46 = vadd.f32 %v440_v45, %v336_v44  ;;  %v588_v47 = vpop.f32.mrf.mxu2  ;;  %v714_v0 = vpop.f32.mrf.mxu3 }
  0xdc   : > { %v592_v48 = vadd.f32 %v581_v29, %v451_v46 }
  0xde   : > { %v718_v50 = vadd.f32 %v707_v15, %v592_v48 }
  0xe0   : > { %v861_v29 = vadd.f32 %v850_v49, %v718_v50 }
  0xe1   : > { %v442_v52 = vpop.f32.mrf.mxu1  ;;  %v852_v55 = vpop.f32.mrf.mxu0 }
  0xe2   : > { %v452_v26 = vadd.f32 %v442_v52, %v337_v51  ;;  %v1074_v53 = vpop.f32.mrf.mxu2  ;;  %v1196_v56 = vpop.f32.mrf.mxu3 }
  0xe4   : > { %v593_v54 = vadd.f32 %v583_v32, %v452_v26 }
  0xe6   : > { %v719_v31 = vadd.f32 %v709_v36, %v593_v54 }
  0xe8   : > { %v862_v37 = vadd.f32 %v852_v55, %v719_v31 }
  0xe9   : > { %v445_v58 = vpop.f32.mrf.mxu1  ;;  %v855_v62 = vpop.f32.mrf.mxu0 }
  0xea   : > { %v453_v59 = vadd.f32 %v445_v58, %v338_v57  ;;  %v1076_v60 = vpop.f32.mrf.mxu2  ;;  %v1198_v63 = vpop.f32.mrf.mxu3 }
  0xec   : > { %v594_v61 = vadd.f32 %v586_v40, %v453_v59 }
  0xee   : > { %v720_v42 = vadd.f32 %v2490_v43, %v594_v61 }
  0xf0   : > { %v863_v48 = vadd.f32 %v855_v62, %v720_v42 }
  0xf1   : > { %v447_v1 = vpop.f32.mrf.mxu1  ;;  %v857_v3 = vpop.f32.mrf.mxu0 }
  0xf2   : > { %v1079_v2 = vpop.f32.mrf.mxu2  ;;  %v1201_v4 = vpop.f32.mrf.mxu3 }
  0xf9   : > { %v951_v6 = vpop.f32.mrf.mxu1  ;;  %v1323_v10 = vpop.f32.mrf.mxu0 }
  0xfa   : > { %v965_v7 = vadd.f32 %v951_v6, %v859_v5  ;;  %v1081_v8 = vpop.f32.mrf.mxu2  ;;  %v1203_v12 = vpop.f32.mrf.mxu3 }
  0xfc   : > { %v1088_v11 = vadd.f32 %v1074_v53, %v965_v7 }
  0xfe   : > { %v1210_v17 = vadd.f32 %v1196_v56, %v1088_v11 }
 0x100   : > { %v1337_v23 = vadd.f32 %v1323_v10, %v1210_v17 }
 0x101   : > { %v953_v16 = vpop.f32.mrf.mxu1  ;;  %v1325_v21 = vpop.f32.mrf.mxu0 }
 0x102   : > { %v966_v18 = vadd.f32 %v953_v16, %v860_v14  ;;  %v1084_v19 = vpop.f32.mrf.mxu2  ;;  %v1206_v25 = vpop.f32.mrf.mxu3  ;;  %v1342_v15 = vmax.f32 %v1337_v23, 0.0 }
 0x104   : > { %v1089_v20 = vadd.f32 %v1076_v60, %v966_v18 }
 0x106   : > { %v1211_v24 = vadd.f32 %v1198_v63, %v1089_v20 }
 0x108   : > { %v1338_v30 = vadd.f32 %v1325_v21, %v1211_v24 }
 0x109   : > { %v956_v13 = vpop.f32.mrf.mxu1  ;;  %v1328_v33 = vpop.f32.mrf.mxu0 }
 0x10a   : > { %v1343_v22 = vmax.f32 %v1338_v30, 0.0  ;;  %v967_v28 = vadd.f32 %v956_v13, %v861_v29  ;;  %v1086_v27 = vpop.f32.mrf.mxu2  ;;  %v1208_v35 = vpop.f32.mrf.mxu3 }
 0x10c   : > { %v2050_v32 = vpack.c.bf16 %v1343_v22, %v1342_v15  ;;  %v1090_v34 = vadd.f32 %v1079_v2, %v967_v28 }
 0x10e   : > { %2051 = vst [vmem:[%s2496_s8] sm:$0xff] %v2050_v32   ;;  %v1212_v39 = vadd.f32 %v1201_v4, %v1090_v34 }
 0x110   : > { %v1339_v46 = vadd.f32 %v1328_v33, %v1212_v39 }
 0x111   : > { %v958_v38 = vpop.f32.mrf.mxu1  ;;  %v1330_v45 = vpop.f32.mrf.mxu0 }
 0x112   : > { %v968_v40 = vadd.f32 %v958_v38, %v862_v37  ;;  %v1333_v41 = vpop.f32.mrf.mxu2  ;;  %v1344_v50 = vmax.f32 %v1339_v46, 0.0 }
 0x114   : > { %v1091_v44 = vadd.f32 %v1081_v8, %v968_v40 }
 0x116   : > { %v1213_v47 = vadd.f32 %v1203_v12, %v1091_v44 }
 0x118   : > { %v1340_v36 = vadd.f32 %v1330_v45, %v1213_v47 }
 0x119   : > { %v961_v49 = vpop.f32.mrf.mxu1 }
 0x11a   : > { %v1345_v0 = vmax.f32 %v1340_v36, 0.0  ;;  %v969_v51 = vadd.f32 %v961_v49, %v863_v48  ;;  %v1335_v52 = vpop.f32.mrf.mxu2 }
 0x11c   : > { %v2055_v26 = vpack.c.bf16 %v1345_v0, %v1344_v50  ;;  %v1092_v53 = vadd.f32 %v1084_v19, %v969_v51 }
 0x11e   : > { %2057 = vst [vmem:[%s2496_s8 + $0x8] sm:$0xff] %v2055_v26   ;;  %v1214_v54 = vadd.f32 %v1206_v25, %v1092_v53 }
 0x120   : > { %v1341_v55 = vadd.f32 %v1333_v41, %v1214_v54 }
 0x121   : > { %v963_v56 = vpop.f32.mrf.mxu1 }
 0x122   : > { %v1346_v57 = vmax.f32 %v1341_v55, 0.0 }
 0x124   : > { %v1351_v43 = vpack.c.bf16 %v1346_v57, %v1346_v57 }
 0x126   : > { %1356 = vst [vmem:[%s2496_s8 + $0x10] sm:$0xf] %v1351_v43 }
 0x127 PF: > { %s13_s14 = sadd.s32 1, %s2123_s14   ;;  %s2515_s12 = smov %s2119_s13 }
 0x128   : > { %p10_p5 = scmp.ge.s32.totalorder %s13_s14, 4   ;;  %s2516_s13 = smov %s2518_s15 }
 0x12a   :  { %12 = sbr.rel (!%p10_p5) target bundleno = 2 (0x2), region = 77 }

// kernel: repvgg_forward.8
= control target key start
LH: loop header
LB: loop body
LE: loop exit
PB: predicated region body
PF: predicated region fallthrough
CT: control target
= control target key end

     0   :  { %s3561_s12 = smov 0   ;;  %s3563_s13 = smov 0   ;;  %s4215_s0 = inlined_call_operand.vmem [shape: bf16[2,2,168,128], index: 0, kind: input, shape index: {}]   ;;  %s4216_s1 = inlined_call_operand.vmem [shape: bf16[9,128,128], index: 1, kind: input, shape index: {}]   ;;  %s4217_s2 = inlined_call_operand.vmem [shape: f32[1,128], index: 2, kind: input, shape index: {}]   ;;  %s4218_s3 = inlined_call_operand.vmem [shape: bf16[2,144,128], index: 3, kind: output, shape index: {}]  }
   0x1   :  { %s3565_s14 = smov 0  }
   0x2 LB: > { %s25_s15 = sadd.s32 1, %s3535_s13  ;;  %p2551_p0 = scmp.ge.s32.totalorder %s3539_s14, 1  ;;  %s3539_s14 = sphi %s3565_s14, %s13_s14   ;;  %s3535_s13 = sphi %s3563_s13, %s4220_s13   ;;  %s3531_s12 = sphi %s3561_s12, %s4219_s12  }
   0x3   : > { %p27_p1 = scmp.ge.s32.totalorder %s25_s15, 2  ;;  %p168_p2 = scmp.lt.s32.totalorder %s3539_s14, 3 }
   0x5   : > { %s4222_s15 = smov (%p27_p1, %s25_s15), 0  ;;  %p169_p3 = pnand %p2551_p0, %p168_p2 }
   0x6   : > { %p202_p4 = scmp.lt.s32.totalorder (!%p169_p3), %s3531_s12, 1 }
   0x7   : > { %172 = sbr.rel (%p169_p3) target bundleno = 515 (0x203), region = 32 }
   0xc   : > { %v3292_v0 = vld [vmem:[%s4216_s1 + $0x38] sm:$0xff]  ;;  %v3291_v1 = vld [vmem:[%s4216_s1 + $0x30] sm:$0xff]  ;;  %v3290_v2 = vld [vmem:[%s4216_s1 + $0x28] sm:$0xff]  ;;  %s4224_s12 = smov (!%p202_p4, %s3531_s12), 1  ;;  %vm728_vm0 = vsmask.f32 7424 }
   0xd   : > { %3463 = vmatpush.bf16.msra.mxu1 %v3292_v0  ;;  %3464 = vmatpush.bf16.msra.mxu2 %v3292_v0  ;;  %v3289_v3 = vld [vmem:[%s4216_s1 + $0x20] sm:$0xff]  ;;  %v3288_v4 = vld [vmem:[%s4216_s1 + $0x18] sm:$0xff]  ;;  %v3287_v5 = vld [vmem:[%s4216_s1 + $0x10] sm:$0xff]  ;;  %s3487_s30 = smul.u32 168, %s4224_s12  ;;  %vm1533_vm1 = vcmask 1046528  }
   0xe   : > { %3465 = vmatpush.bf16.msra.mxu3 %v3292_v0  ;;  %362 = vmatpush.bf16.msra.mxu0 %v3292_v0  ;;  %v3286_v6 = vld [vmem:[%s4216_s1 + $0x8] sm:$0xff]  ;;  %v3285_v7 = vld [vmem:[%s4216_s1] sm:$0xff]  ;;  %v3326_v8 = vld [vmem:[%s4216_s1 + $0xb8] sm:$0xff]  ;;  %vm2167_vm2 = vsmask.f32 6400 }
   0xf   : > { %s3613_s8 = scalar_lea.vmem %s4215_s0, %s3487_s30  ;;  %v3309_v9 = vld [vmem:[%s4216_s1 + $0x78] sm:$0xff]  ;;  %v3325_v14 = vld [vmem:[%s4216_s1 + $0xb0] sm:$0xff]  ;;  %v3324_v20 = vld [vmem:[%s4216_s1 + $0xa8] sm:$0xff] }
  0x10   : > { %v3278_v10 = vld [vmem:[%s3613_s8 + $0x10] sm:$0xff]  ;;  %v3281_v11 = vld [vmem:[%s3613_s8 + $0x28] sm:$0xff]  ;;  %v3342_v12 = vld [vmem:[%s4216_s1 + $0xf8] sm:$0xff] }
  0x11   : > { %3466 = vmatpush.bf16.msra.mxu1 %v3291_v1  ;;  %3467 = vmatpush.bf16.msra.mxu2 %v3291_v1  ;;  %v3359_v13 = vld [vmem:[%s4216_s1 + $0x138] sm:$0xff]  ;;  %v3308_v15 = vld [vmem:[%s4216_s1 + $0x70] sm:$0xff]  ;;  %v3276_v16 = vld [vmem:[%s3613_s8] sm:$0xff] }
  0x12   : > { %3468 = vmatpush.bf16.msra.mxu3 %v3291_v1  ;;  %363 = vmatpush.bf16.msra.mxu0 %v3291_v1  ;;  %v3284_v17 = vld [vmem:[%s3613_s8 + $0x40] sm:$0xff]  ;;  %v3341_v18 = vld [vmem:[%s4216_s1 + $0xf0] sm:$0xff]  ;;  %v3307_v21 = vld [vmem:[%s4216_s1 + $0x68] sm:$0xff] }
  0x13   : > { %v3358_v19 = vld [vmem:[%s4216_s1 + $0x130] sm:$0xff]  ;;  %v3340_v22 = vld [vmem:[%s4216_s1 + $0xe8] sm:$0xff]  ;;  %v3323_v24 = vld [vmem:[%s4216_s1 + $0xa0] sm:$0xff] }
  0x14   : > { %v3357_v23 = vld [vmem:[%s4216_s1 + $0x128] sm:$0xff]  ;;  %v3306_v25 = vld [vmem:[%s4216_s1 + $0x60] sm:$0xff]  ;;  %v3322_v30 = vld [vmem:[%s4216_s1 + $0x98] sm:$0xff] }
  0x15   : > { %3469 = vmatpush.bf16.msra.mxu1 %v3290_v2  ;;  %3470 = vmatpush.bf16.msra.mxu2 %v3290_v2  ;;  %v934_v26 = vld [vmem:[%s3613_s8 + $0x4] sm:$0xff]   ;;  %v3305_v31 = vld [vmem:[%s4216_s1 + $0x58] sm:$0xff]  ;;  %v3282_v33 = vld [vmem:[%s3613_s8 + $0x30] sm:$0xff] }
  0x16   : > { %3471 = vmatpush.bf16.msra.mxu3 %v3290_v2  ;;  %364 = vmatpush.bf16.msra.mxu0 %v3290_v2  ;;  %v3663_v27 = vld [vmem:[%s3613_s8 + $0x4] sm:$0xf0]  ;;  %v3339_v28 = vld [vmem:[%s4216_s1 + $0xe0] sm:$0xff]  ;;  %v3279_v32 = vld [vmem:[%s3613_s8 + $0x18] sm:$0xff]  ;;  %v1021_v45 = vshll.u32 %v934_v26, 16  ;;  %v1019_v51 = vshrl.u32 %v934_v26, 16 }
  0x17   : > { %v3356_v29 = vld [vmem:[%s4216_s1 + $0x120] sm:$0xff]  ;;  %v3338_v34 = vld [vmem:[%s4216_s1 + $0xd8] sm:$0xff]  ;;  %v3321_v36 = vld [vmem:[%s4216_s1 + $0x90] sm:$0xff] }
  0x18   : > { %v3355_v35 = vld [vmem:[%s4216_s1 + $0x118] sm:$0xff]  ;;  %v3304_v37 = vld [vmem:[%s4216_s1 + $0x50] sm:$0xff]  ;;  %v3277_v38 = vld [vmem:[%s3613_s8 + $0x8] sm:$0xff]  ;;  %v1023_v52 = vrot.slane %v1021_v45, 1 }
  0x19   : > { %3472 = vmatpush.bf16.msra.mxu1 %v3289_v3  ;;  %3473 = vmatpush.bf16.msra.mxu2 %v3289_v3  ;;  %v3343_v39 = vld [vmem:[%s3613_s8 + $0x58] sm:$0xff]  ;;  %v3337_v40 = vld [vmem:[%s4216_s1 + $0xd0] sm:$0xff]  ;;  %v3320_v42 = vld [vmem:[%s4216_s1 + $0x88] sm:$0xff] }
  0x1a   : > { %3474 = vmatpush.bf16.msra.mxu3 %v3289_v3  ;;  %365 = vmatpush.bf16.msra.mxu0 %v3289_v3  ;;  %v3354_v41 = vld [vmem:[%s4216_s1 + $0x110] sm:$0xff]  ;;  %v3303_v43 = vld [vmem:[%s4216_s1 + $0x48] sm:$0xff]  ;;  %v3709_v46 = vld [vmem:[%s3613_s8 + $0x60] sm:$0xff]  ;;  %v1310_v47 = vshll.u32 %v3343_v39, 16  ;;  %v1308_v57 = vshrl.u32 %v3343_v39, 16  ;;  %v1024_v62 = vor.u32 %v1023_v52, %v1019_v51 }
  0x1b   : > { %v3706_v44 = vld [vmem:[%s3613_s8 + $0xc] sm:$0xff]  ;;  %v3319_v50 = vld [vmem:[%s4216_s1 + $0x80] sm:$0xff]  ;;  %v3384_v55 = vld [vmem:[%s4216_s1 + $0x1b8] sm:$0xff]  ;;  %v1315_v59 = vshll.u32 %v3709_v46, 16 }
  0x1c   : > { %v3336_v48 = vld [vmem:[%s4216_s1 + $0xc8] sm:$0xff]  ;;  %v1026_v53 = vshll.u32 %v3706_v44, 16  ;;  %v3302_v54 = vld [vmem:[%s4216_s1 + $0x40] sm:$0xff]  ;;  %v3367_v56 = vld [vmem:[%s4216_s1 + $0x178] sm:$0xff]  ;;  %v1312_v58 = vrot.slane %v1310_v47, 1 }
  0x1d   : > { %3475 = vmatpush.bf16.msra.mxu1 %v3288_v4  ;;  %3476 = vmatpush.bf16.msra.mxu2 %v3288_v4  ;;  %v3353_v49 = vld [vmem:[%s4216_s1 + $0x108] sm:$0xff]  ;;  %v3335_v60 = vld [vmem:[%s4216_s1 + $0xc0] sm:$0xff]  ;;  %v3401_v0 = vld [vmem:[%s4216_s1 + $0x1f8] sm:$0xff] }
  0x1e   : > { %3477 = vmatpush.bf16.msra.mxu3 %v3288_v4  ;;  %366 = vmatpush.bf16.msra.mxu0 %v3288_v4  ;;  %v3352_v61 = vld [vmem:[%s4216_s1 + $0x100] sm:$0xff]  ;;  %v1028_v63 = vrot.slane %v1026_v53, 1  ;;  %v3409_v1 = vld [vmem:[%s4216_s1 + $0x238] sm:$0xff]  ;;  %v1313_v4 = vor.u32 %v1312_v58, %v1308_v57  ;;  %v3407_v39 = vld [vmem:[%s4216_s1 + $0x228] sm:$0xff] }
  0x1f   : > { %v3280_v2 = vld [vmem:[%s3613_s8 + $0x20] sm:$0xff]  ;;  %v3283_v3 = vld [vmem:[%s3613_s8 + $0x38] sm:$0xff] }
  0x20   : > { %v3294_v53 = vld [vmem:[%s3613_s8 + $0x5c] sm:$0xff] }
  0x21   : > { %3478 = vmatpush.bf16.msra.mxu1 %v3287_v5  ;;  %3479 = vmatpush.bf16.msra.mxu2 %v3287_v5 }
  0x22   : > { %3480 = vmatpush.bf16.msra.mxu3 %v3287_v5  ;;  %367 = vmatpush.bf16.msra.mxu0 %v3287_v5  ;;  %v1317_v5 = vrot.slane %v1315_v59, 1  ;;  %v3381_v59 = vld [vmem:[%s4216_s1 + $0x1a0] sm:$0xff] }
  0x25   : > { %3481 = vmatpush.bf16.msra.mxu1 %v3286_v6  ;;  %3482 = vmatpush.bf16.msra.mxu2 %v3286_v6 }
  0x26   : > { %3483 = vmatpush.bf16.msra.mxu3 %v3286_v6  ;;  %368 = vmatpush.bf16.msra.mxu0 %v3286_v6  ;;  %v3310_v6 = vld [vmem:[%s3613_s8] sm:$0xff] }
  0x29   : > { %3484 = vmatpush.bf16.msra.mxu1 %v3285_v7  ;;  %3485 = vmatpush.bf16.msra.mxu2 %v3285_v7 }
  0x2a   : > { %3486 = vmatpush.bf16.msra.mxu3 %v3285_v7  ;;  %369 = vmatpush.bf16.msra.mxu0 %v3285_v7  ;;  %v1029_v7 = vsel %vm728_vm0, %v1024_v62, %v1028_v63  ;;  %v3364_v62 = vld [vmem:[%s4216_s1 + $0x160] sm:$0xff] }
  0x2c   : > { %380 = vmatmul.bf16.vlgmr.msra.gmra.mxu1 %v3278_v10  ;;  %395 = vmatmul.bf16.vlgmr.msra.gmra.mxu2 %v3281_v11  ;;  %v3400_v10 = vld [vmem:[%s4216_s1 + $0x1f0] sm:$0xff] }
  0x2d   : > { %862 = vmatpush.bf16.msrb.mxu2 %v3326_v8  ;;  %572 = vmatpush.bf16.msrb.mxu1 %v3309_v9  ;;  %v1318_v8 = vsel %vm728_vm0, %v1313_v4, %v1317_v5  ;;  %v3383_v9 = vld [vmem:[%s4216_s1 + $0x1b0] sm:$0xff] }
  0x2e   : > { %1151 = vmatpush.bf16.msrb.mxu3 %v3342_v12  ;;  %1440 = vmatpush.bf16.msrb.mxu0 %v3359_v13  ;;  %v3366_v11 = vld [vmem:[%s4216_s1 + $0x170] sm:$0xff]  ;;  %v3311_v12 = vld [vmem:[%s3613_s8 + $0x8] sm:$0xff]  ;;  %v732_v13 = vshll.u32 %v3310_v6, 16 }
  0x2f   : > { %370 = vmatmul.bf16.vlgmr.msra.gmra.mxu0 %v3276_v16  ;;  %410 = vmatmul.bf16.vlgmr.msra.gmra.mxu3 %v3284_v17  ;;  %v3345_v16 = vld [vmem:[%s3613_s8 + $0x68] sm:$0xff]  ;;  %v730_v17 = vshrl.u32 %v3310_v6, 16 }
  0x30   : > { %v1327_v47 = vshrl.u32 %v3345_v16, 16 }
  0x31   : > { %863 = vmatpush.bf16.msrb.mxu2 %v3325_v14  ;;  %573 = vmatpush.bf16.msrb.mxu1 %v3308_v15  ;;  %v3408_v14 = vld [vmem:[%s4216_s1 + $0x230] sm:$0xff] }
  0x32   : > { %1152 = vmatpush.bf16.msrb.mxu3 %v3341_v18  ;;  %1441 = vmatpush.bf16.msrb.mxu0 %v3358_v19  ;;  %v3762_v15 = vld [vmem:[%s3613_s8 + $0x14] sm:$0xff]  ;;  %v734_v18 = vrot.slane %v732_v13, 1  ;;  %v737_v19 = vshll.u32 %v3311_v12, 16 }
  0x33   : > { %v1038_v45 = vshrl.u32 %v3762_v15, 16 }
  0x35   : > { %864 = vmatpush.bf16.msrb.mxu2 %v3324_v20  ;;  %574 = vmatpush.bf16.msrb.mxu1 %v3307_v21  ;;  %v1030_v20 = vshrl.u32 %v3706_v44, 16  ;;  %v1034_v21 = vshll.u32 %v3762_v15, 16 }
  0x36   : > { %1153 = vmatpush.bf16.msrb.mxu3 %v3340_v22  ;;  %1442 = vmatpush.bf16.msrb.mxu0 %v3357_v23  ;;  %v1319_v22 = vshrl.u32 %v3709_v46, 16  ;;  %v1323_v23 = vshll.u32 %v3345_v16, 16 }
  0x37   : > { %v1032_v26 = vor.u32 %v1030_v20, %v1028_v63  ;;  %v3806_v63 = vld [vmem:[%s3613_s8 + $0x24] sm:$0xff] }
  0x38   : > { %v1050_v4 = vshll.u32 %v3806_v63, 16  ;;  %v3314_v20 = vld [vmem:[%s3613_s8 + $0x20] sm:$0xff] }
  0x39   : > { %865 = vmatpush.bf16.msrb.mxu2 %v3323_v24  ;;  %575 = vmatpush.bf16.msrb.mxu1 %v3306_v25  ;;  %v735_v24 = vor.u32 %v734_v18, %v730_v17  ;;  %v739_v25 = vrot.slane %v737_v19, 1  ;;  %v3406_v18 = vld [vmem:[%s4216_s1 + $0x220] sm:$0xff]  ;;  %v3380_v19 = vld [vmem:[%s4216_s1 + $0x198] sm:$0xff] }
  0x3a   : > { %1154 = vmatpush.bf16.msrb.mxu3 %v3339_v28  ;;  %1443 = vmatpush.bf16.msrb.mxu0 %v3356_v29  ;;  %v1036_v28 = vrot.slane %v1034_v21, 1  ;;  %v3293_v29 = vld [vmem:[%s3613_s8 + $0x54] sm:$0xff] }
  0x3b   : > { %v3397_v21 = vld [vmem:[%s4216_s1 + $0x1d8] sm:$0xff] }
  0x3c   : > { %385 = vmatmul.bf16.gmra.mxu1 %v3279_v32  ;;  %400 = vmatmul.bf16.gmra.mxu2 %v3282_v33  ;;  %v740_v32 = vsel %vm728_vm0, %v735_v24, %v739_v25  ;;  %v1037_v33 = vsel %vm728_vm0, %v1032_v26, %v1036_v28  ;;  %v1040_v51 = vor.u32 %v1038_v45, %v1036_v28  ;;  %v3348_v24 = vld [vmem:[%s3613_s8 + $0x80] sm:$0xff]  ;;  %v761_v26 = vshll.u32 %v3314_v20, 16  ;;  %v3315_v45 = vld [vmem:[%s3613_s8 + $0x28] sm:$0xff] }
  0x3d   : > { %866 = vmatpush.bf16.msrb.mxu2 %v3322_v30  ;;  %576 = vmatpush.bf16.msrb.mxu1 %v3305_v31  ;;  %v1321_v30 = vor.u32 %v1319_v22, %v1317_v5  ;;  %v1325_v31 = vrot.slane %v1323_v23, 1  ;;  %v3363_v22 = vld [vmem:[%s4216_s1 + $0x158] sm:$0xff]  ;;  %v3829_v23 = vld [vmem:[%s3613_s8 + $0x2c] sm:$0xff]  ;;  %v1054_v28 = vshrl.u32 %v3806_v63, 16 }
  0x3e   : > { %1155 = vmatpush.bf16.msrb.mxu3 %v3338_v34  ;;  %1444 = vmatpush.bf16.msrb.mxu0 %v3355_v35  ;;  %v3382_v35 = vld [vmem:[%s4216_s1 + $0x1a8] sm:$0xff] }
  0x3f   : > { %375 = vmatmul.bf16.gmra.mxu0 %v3277_v38  ;;  %v1326_v34 = vsel %vm728_vm0, %v1321_v30, %v1325_v31  ;;  %v3312_v38 = vld [vmem:[%s3613_s8 + $0x10] sm:$0xff] }
  0x41   : > { %867 = vmatpush.bf16.msrb.mxu2 %v3321_v36  ;;  %577 = vmatpush.bf16.msrb.mxu1 %v3304_v37  ;;  %v3399_v36 = vld [vmem:[%s4216_s1 + $0x1e8] sm:$0xff] }
  0x42   : > { %1156 = vmatpush.bf16.msrb.mxu3 %v3337_v40  ;;  %1445 = vmatpush.bf16.msrb.mxu0 %v3354_v41  ;;  %v3365_v37 = vld [vmem:[%s4216_s1 + $0x168] sm:$0xff]  ;;  %v3786_v40 = vld [vmem:[%s3613_s8 + $0x1c] sm:$0xff]  ;;  %v3346_v41 = vld [vmem:[%s3613_s8 + $0x70] sm:$0xff] }
  0x43   : > { %v1042_v46 = vshll.u32 %v3786_v40, 16  ;;  %v1335_v5 = vshrl.u32 %v3346_v41, 16 }
  0x45   : > { %868 = vmatpush.bf16.msrb.mxu2 %v3320_v42  ;;  %578 = vmatpush.bf16.msrb.mxu1 %v3303_v43  ;;  %v741_v42 = vshrl.u32 %v3311_v12, 16  ;;  %v745_v43 = vshll.u32 %v3312_v38, 16  ;;  %v1044_v52 = vrot.slane %v1042_v46, 1  ;;  %v3843_v46 = vld [vmem:[%s3613_s8 + $0x34] sm:$0xff] }
  0x46   : > { %1157 = vmatpush.bf16.msrb.mxu3 %v3336_v48  ;;  %1446 = vmatpush.bf16.msrb.mxu0 %v3353_v49  ;;  %v1331_v48 = vshll.u32 %v3346_v41, 16 }
  0x47   : > { %v743_v49 = vor.u32 %v741_v42, %v739_v25  ;;  %v1045_v57 = vsel %vm728_vm0, %v1040_v51, %v1044_v52  ;;  %v1066_v51 = vshll.u32 %v3843_v46, 16 }
  0x49   : > { %869 = vmatpush.bf16.msrb.mxu2 %v3319_v50  ;;  %579 = vmatpush.bf16.msrb.mxu1 %v3302_v54  ;;  %v747_v50 = vrot.slane %v745_v43, 1  ;;  %v1329_v54 = vor.u32 %v1327_v47, %v1325_v31  ;;  %v1347_v31 = vshll.u32 %v3348_v24, 16  ;;  %v3405_v43 = vld [vmem:[%s4216_s1 + $0x218] sm:$0xff]  ;;  %v3349_v47 = vld [vmem:[%s3613_s8 + $0x88] sm:$0xff] }
  0x4a   : > { %1158 = vmatpush.bf16.msrb.mxu3 %v3335_v60  ;;  %1447 = vmatpush.bf16.msrb.mxu0 %v3352_v61  ;;  %v3398_v60 = vld [vmem:[%s4216_s1 + $0x1e0] sm:$0xff]  ;;  %v3313_v61 = vld [vmem:[%s3613_s8 + $0x18] sm:$0xff] }
  0x4b   : > { %v757_v25 = vshrl.u32 %v3313_v61, 16 }
  0x4c   : > { %390 = vmatmul.bf16.gmra.mxu1 %v3280_v2  ;;  %405 = vmatmul.bf16.gmra.mxu2 %v3283_v3  ;;  %v753_v2 = vshll.u32 %v3313_v61, 16  ;;  %v1046_v3 = vshrl.u32 %v3786_v40, 16 }
  0x4d   : > { %1842 = vmatpush.bf16.msra.mxu2 %v3384_v55  ;;  %1610 = vmatpush.bf16.msra.mxu1 %v3367_v56  ;;  %v1333_v55 = vrot.slane %v1331_v48, 1  ;;  %v748_v56 = vsel %vm728_vm0, %v743_v49, %v747_v50  ;;  %v765_v48 = vshrl.u32 %v3314_v20, 16  ;;  %v769_v49 = vshll.u32 %v3315_v45, 16 }
  0x4e   : > { %2074 = vmatpush.bf16.msra.mxu3 %v3401_v0  ;;  %2314 = vmatpush.bf16.msra.mxu0 %v3409_v1  ;;  %v3347_v0 = vld [vmem:[%s3613_s8 + $0x78] sm:$0xff]  ;;  %v749_v1 = vshrl.u32 %v3312_v38, 16  ;;  %v1349_v38 = vrot.slane %v1347_v31, 1  ;;  %v3361_v31 = vld [vmem:[%s4216_s1 + $0x148] sm:$0xff] }
  0x4f   : > { %1159 = vmatmul.bf16.vlgmr.msrb.gmra.mxu3 %v1029_v7  ;;  %1448 = vmatmul.bf16.vlgmr.msrb.gmra.mxu0 %v1318_v8  ;;  %v1334_v58 = vsel %vm728_vm0, %v1329_v54, %v1333_v55  ;;  %v1339_v6 = vshll.u32 %v3347_v0, 16  ;;  %v755_v8 = vrot.slane %v753_v2, 1  ;;  %v1337_v12 = vor.u32 %v1335_v5, %v1333_v55  ;;  %v3362_v2 = vld [vmem:[%s4216_s1 + $0x150] sm:$0xff]  ;;  %v3863_v5 = vld [vmem:[%s3613_s8 + $0x3c] sm:$0xff] }
  0x50   : > { %v751_v7 = vor.u32 %v749_v1, %v747_v50  ;;  %v1343_v30 = vshrl.u32 %v3347_v0, 16  ;;  %v1062_v50 = vshrl.u32 %v3829_v23, 16  ;;  %v1355_v54 = vshll.u32 %v3349_v47, 16 }
  0x51   : > { %1843 = vmatpush.bf16.msra.mxu2 %v3383_v9  ;;  %1611 = vmatpush.bf16.msra.mxu1 %v3366_v11  ;;  %v1048_v9 = vor.u32 %v1046_v3, %v1044_v52  ;;  %v3295_v11 = vld [vmem:[%s3613_s8 + $0x64] sm:$0xff]  ;;  %v1341_v13 = vrot.slane %v1339_v6, 1  ;;  %v3379_v52 = vld [vmem:[%s4216_s1 + $0x190] sm:$0xff] }
  0x52   : > { %2075 = vmatpush.bf16.msra.mxu3 %v3400_v10  ;;  %2315 = vmatpush.bf16.msra.mxu0 %v3408_v14  ;;  %v1052_v10 = vrot.slane %v1050_v4, 1  ;;  %v756_v14 = vsel %vm728_vm0, %v751_v7, %v755_v8  ;;  %v1357_v61 = vrot.slane %v1355_v54, 1  ;;  %v3316_v4 = vld [vmem:[%s3613_s8 + $0x30] sm:$0xff] }
  0x53   : > { %v1342_v17 = vsel %vm728_vm0, %v1337_v12, %v1341_v13  ;;  %v3350_v6 = vld [vmem:[%s3613_s8 + $0x90] sm:$0xff]  ;;  %v1359_v12 = vshrl.u32 %v3349_v47, 16  ;;  %v3403_v47 = vld [vmem:[%s4216_s1 + $0x208] sm:$0xff] }
  0x54   : > { %v1053_v16 = vsel %vm728_vm0, %v1048_v9, %v1052_v10  ;;  %v3404_v7 = vld [vmem:[%s4216_s1 + $0x210] sm:$0xff]  ;;  %v777_v9 = vshll.u32 %v3316_v4, 16 }
  0x55   : > { %1844 = vmatpush.bf16.msra.mxu2 %v3382_v35  ;;  %1612 = vmatpush.bf16.msra.mxu1 %v3365_v37  ;;  %v1345_v37 = vor.u32 %v1343_v30, %v1341_v13  ;;  %v1363_v13 = vshll.u32 %v3350_v6, 16  ;;  %v1361_v20 = vor.u32 %v1359_v12, %v1357_v61 }
  0x56   : > { %2076 = vmatpush.bf16.msra.mxu3 %v3399_v36  ;;  %2316 = vmatpush.bf16.msra.mxu0 %v3407_v39  ;;  %v3296_v36 = vld [vmem:[%s3613_s8 + $0x6c] sm:$0xff] }
  0x57   : > { %v1350_v42 = vsel %vm728_vm0, %v1345_v37, %v1349_v38  ;;  %v3903_v37 = vld [vmem:[%s3613_s8 + $0x98] sm:$0xff] }
  0x59   : > { %1845 = vmatpush.bf16.msra.mxu2 %v3381_v59  ;;  %1613 = vmatpush.bf16.msra.mxu1 %v3364_v62  ;;  %v3297_v59 = vld [vmem:[%s3613_s8 + $0x74] sm:$0xff] }
  0x5a   : > { %2077 = vmatpush.bf16.msra.mxu3 %v3398_v60  ;;  %2317 = vmatpush.bf16.msra.mxu0 %v3406_v18  ;;  %v3396_v62 = vld [vmem:[%s4216_s1 + $0x1d0] sm:$0xff] }
  0x5c   : > { %580 = vmatmul.bf16.vlgmr.msrb.gmra.mxu1 %v3293_v29  ;;  %870 = vmatmul.bf16.vlgmr.msrb.gmra.mxu2 %v740_v32  ;;  %v1058_v29 = vshll.u32 %v3829_v23, 16  ;;  %v759_v32 = vor.u32 %v757_v25, %v755_v8  ;;  %v773_v8 = vshrl.u32 %v3315_v45, 16 }
  0x5d   : > { %1846 = vmatpush.bf16.msra.mxu2 %v3380_v19  ;;  %1614 = vmatpush.bf16.msra.mxu1 %v3363_v22  ;;  %v3298_v19 = vld [vmem:[%s3613_s8 + $0x7c] sm:$0xff]  ;;  %v3378_v22 = vld [vmem:[%s4216_s1 + $0x188] sm:$0xff] }
  0x5e   : > { %2078 = vmatpush.bf16.msra.mxu3 %v3397_v21  ;;  %v1060_v35 = vrot.slane %v1058_v29, 1  ;;  %2318 = vmatpush.bf16.msra.mxu0 %v3405_v43  ;;  %v1365_v21 = vrot.slane %v1363_v13, 1 }
  0x5f   : > { %1164 = vmatmul.bf16.gmra.mxu3 %v1037_v33  ;;  %1453 = vmatmul.bf16.gmra.mxu0 %v1326_v34  ;;  %v763_v33 = vrot.slane %v761_v26, 1  ;;  %v1056_v34 = vor.u32 %v1054_v28, %v1052_v10  ;;  %v1070_v10 = vshrl.u32 %v3843_v46, 16  ;;  %v3395_v28 = vld [vmem:[%s4216_s1 + $0x1c8] sm:$0xff] }
  0x60   : > { %v1366_v30 = vsel %vm728_vm0, %v1361_v20, %v1365_v21 }
  0x61   : > { %v764_v39 = vsel %vm728_vm0, %v759_v32, %v763_v33  ;;  %v1061_v41 = vsel %vm728_vm0, %v1056_v34, %v1060_v35  ;;  %1847 = vmatpush.bf16.msra.mxu2 %v3379_v52  ;;  %v767_v55 = vor.u32 %v765_v48, %v763_v33  ;;  %1615 = vmatpush.bf16.msra.mxu1 %v3362_v2  ;;  %v3889_v32 = vld [vmem:[%s3613_s8 + $0x38] sm:$0xff]  ;;  %v3894_v33 = vld [vmem:[%s4217_s2] ss:$0 sm:$0xff]  ;;  %v3897_v34 = vld [vmem:[%s3613_s8 + $0x44] sm:$0xff] }
  0x62   : > { %2079 = vmatpush.bf16.msra.mxu3 %v3396_v62  ;;  %2319 = vmatpush.bf16.msra.mxu0 %v3404_v7  ;;  %v1082_v43 = vshll.u32 %v3897_v34, 16  ;;  %v1086_v20 = vshrl.u32 %v3897_v34, 16 }
  0x65   : > { %1848 = vmatpush.bf16.msra.mxu2 %v3378_v22  ;;  %1616 = vmatpush.bf16.msra.mxu1 %v3361_v31  ;;  %v3402_v22 = vld [vmem:[%s4216_s1 + $0x200] sm:$0xff] }
  0x66   : > { %2080 = vmatpush.bf16.msra.mxu3 %v3395_v28  ;;  %2320 = vmatpush.bf16.msra.mxu0 %v3403_v47 }
  0x6a   : > { %2321 = vmatpush.bf16.msra.mxu0 %v3402_v22 }
  0x6c   : > { %585 = vmatmul.bf16.gmra.mxu1 %v3294_v53  ;;  %875 = vmatmul.bf16.gmra.mxu2 %v748_v56  ;;  %v1351_v53 = vshrl.u32 %v3348_v24, 16  ;;  %v771_v56 = vrot.slane %v769_v49, 1 }
  0x6e   : > { %v1353_v60 = vor.u32 %v1351_v53, %v1349_v38  ;;  %v772_v0 = vsel %vm728_vm0, %v767_v55, %v771_v56  ;;  %v1084_v55 = vrot.slane %v1082_v43, 1 }
  0x6f   : > { %1169 = vmatmul.bf16.gmra.mxu3 %v1045_v57  ;;  %1458 = vmatmul.bf16.gmra.mxu0 %v1334_v58  ;;  %v1064_v57 = vor.u32 %v1062_v50, %v1060_v35  ;;  %v1068_v58 = vrot.slane %v1066_v51, 1  ;;  %v1367_v50 = vshrl.u32 %v3350_v6, 16  ;;  %v1371_v51 = vshll.u32 %v3903_v37, 16 }
  0x70   : > { %v1358_v3 = vsel %vm728_vm0, %v1353_v60, %v1357_v61 }
  0x71   : > { %v1069_v1 = vsel %vm728_vm0, %v1064_v57, %v1068_v58  ;;  %v952_v57 = vld [vmem:[%s3613_s8 + $0x4c] sm:$0x1]  ;;  %v1369_v60 = vor.u32 %v1367_v50, %v1365_v21  ;;  %v1373_v61 = vrot.slane %v1371_v51, 1  ;;  %v3057_v51 = vld [vmem:[%s3613_s8 + $0x8] sm:$0xe] }
  0x73   : > { %v1374_v7 = vsel %vm728_vm0, %v1369_v60, %v1373_v61 }
  0x7c   : > { %590 = vmatmul.bf16.gmra.mxu1 %v3295_v11  ;;  %880 = vmatmul.bf16.gmra.mxu2 %v756_v14  ;;  %v1074_v11 = vshll.u32 %v3863_v5, 16  ;;  %v775_v14 = vor.u32 %v773_v8, %v771_v56  ;;  %v3394_v8 = vld [vmem:[%s4216_s1 + $0x1c0] sm:$0xff] }
  0x7d   : > { %2081 = vmatpush.bf16.msra.mxu3 %v3394_v8 }
  0x7e   : > { %v1076_v18 = vrot.slane %v1074_v11, 1  ;;  %v3942_v11 = vld [vmem:[%s3613_s8 + $0x40] sm:$0xff] }
  0x7f   : > { %1174 = vmatmul.bf16.gmra.mxu3 %v1053_v16  ;;  %1463 = vmatmul.bf16.gmra.mxu0 %v1342_v17  ;;  %v779_v16 = vrot.slane %v777_v9, 1  ;;  %v1072_v17 = vor.u32 %v1070_v10, %v1068_v58  ;;  %v3360_v10 = vld [vmem:[%s4216_s1 + $0x140] sm:$0xff] }
  0x80   : > { %1617 = vmatpush.bf16.msra.mxu1 %v3360_v10 }
  0x81   : > { %v780_v25 = vsel %vm728_vm0, %v775_v14, %v779_v16  ;;  %v1077_v26 = vsel %vm728_vm0, %v1072_v17, %v1076_v18 }
  0x8c   : > { %595 = vmatmul.bf16.gmra.mxu1 %v3296_v36  ;;  %885 = vmatmul.bf16.gmra.mxu2 %v764_v39  ;;  %v781_v39 = vshrl.u32 %v3316_v4, 16  ;;  %v3377_v4 = vld [vmem:[%s4216_s1 + $0x180] sm:$0xff] }
  0x8d   : > { %1849 = vmatpush.bf16.msra.mxu2 %v3377_v4 }
  0x8e   : > { %v783_v52 = vor.u32 %v781_v39, %v779_v16 }
  0x8f   : > { %1179 = vmatmul.bf16.gmra.mxu3 %v1061_v41  ;;  %1468 = vmatmul.bf16.gmra.mxu0 %v1350_v42  ;;  %v785_v41 = vshll.u32 %v3889_v32, 16  ;;  %v1078_v42 = vshrl.u32 %v3863_v5, 16 }
  0x91   : > { %v787_v53 = vrot.slane %v785_v41, 1  ;;  %v1080_v54 = vor.u32 %v1078_v42, %v1076_v18  ;;  %v789_v18 = vshrl.u32 %v3889_v32, 16  ;;  %v662_v41 = vld [vmem:[%s3613_s8 + $0x48] sm:$0x1] }
  0x93   : > { %v1085_v2 = vsel %vm728_vm0, %v1080_v54, %v1084_v55  ;;  %v717_v54 = vunpack.c.l.b16 %v662_v41 }
  0x9c   : > { %600 = vmatmul.bf16.gmra.mxu1 %v3297_v59  ;;  %890 = vmatmul.bf16.gmra.mxu2 %v772_v0  ;;  %v3299_v59 = vld [vmem:[%s3613_s8 + $0x84] sm:$0xff]  ;;  %v788_v0 = vsel %vm728_vm0, %v783_v52, %v787_v53  ;;  %v3368_v52 = vld [vmem:[%s3613_s8 + $0x8] sm:$0xf0] }
  0x9f   : > { %1184 = vmatmul.bf16.gmra.mxu3 %v1069_v1  ;;  %1473 = vmatmul.bf16.gmra.mxu0 %v1358_v3  ;;  %v2906_v1 = vld [vmem:[%s3613_s8 + $0xa0] sm:$0x1]  ;;  %v1007_v3 = vunpack.c.l.b16 %v952_v57  ;;  %v3975_v57 = vor.u32 %v3368_v52, %v3057_v51  ;;  %v3301_v52 = vld [vmem:[%s3613_s8 + $0x94] sm:$0xff] }
  0xa0   : > { %v1296_v9 = vunpack.c.l.b16 %v2906_v1 }
  0xa1   : > { %v3944_v12 = vpack.c.b16 %v1007_v3, %v1007_v3  ;;  %v3385_v3 = vld [vmem:[%s3613_s8 + $0x5c] sm:$0xf0]  ;;  %v2169_v4 = vshrl.u32 %v3975_v57, 16 }
  0xa2   : > { %v1306_v16 = vpack.c.b16 %v1296_v9, %v1296_v9  ;;  %v2172_v9 = vshll.u32 %v3975_v57, 16 }
  0xa3   : > { %v1090_v21 = vshll.u32 %v3944_v12, 16 }
  0xa4   : > { %v1379_v28 = vshll.u32 %v1306_v16, 16 }
  0xa5   : > { %v1092_v39 = vrot.slane %v1090_v21, 1  ;;  %v3997_v21 = vld [vmem:[%s3613_s8 + $0x64] sm:$0xff] }
  0xa6   : > { %v1381_v50 = vrot.slane %v1379_v28, 1  ;;  %v2171_v28 = vrot.slane %v2169_v4, 1 }
  0xa9   : > { %v3875_v24 = vpop.f32.mrf.mxu1 }
  0xac   : > { %605 = vmatmul.bf16.gmra.mxu1 %v3298_v19  ;;  %895 = vmatmul.bf16.gmra.mxu2 %v780_v25  ;;  %v3882_v29 = vpop.f32.mrf.mxu0  ;;  %v793_v19 = vshll.u32 %v3942_v11, 16 }
  0xae   : > { %v795_v31 = vrot.slane %v793_v19, 1 }
  0xaf   : > { %1189 = vmatmul.bf16.gmra.mxu3 %v1077_v26  ;;  %v396_v35 = vpop.f32.mrf.mxu2  ;;  %1478 = vmatmul.bf16.gmra.mxu0 %v1366_v30  ;;  %v1375_v26 = vshrl.u32 %v3903_v37, 16  ;;  %v791_v30 = vor.u32 %v789_v18, %v787_v53  ;;  %v797_v18 = vshrl.u32 %v3942_v11, 16  ;;  %v1999_v11 = vrot.slane %v3997_v21, 1 }
  0xb0   : > { %v3900_v36 = vadd.f32 %v3894_v33, %v396_v35  ;;  %v1088_v35 = vor.u32 %v1086_v20, %v1084_v55 }
  0xb1   : > { %v3905_v38 = vpop.f32.mrf.mxu1  ;;  %v1377_v47 = vor.u32 %v1375_v26, %v1373_v61  ;;  %v796_v53 = vsel %vm728_vm0, %v791_v30, %v795_v31  ;;  %v3981_v61 = vld [vmem:[%s3613_s8 + $0x10] sm:$0xff]  ;;  %v2174_v30 = vrot.slane %v2172_v9, 2  ;;  %v799_v41 = vor.u32 %v797_v18, %v795_v31 }
  0xb2   : > { %v411_v45 = vpop.f32.mrf.mxu3  ;;  %v2177_v10 = vshrl.u32 %v3981_v61, 16 }
  0xb3   : > { %v3914_v48 = vadd.f32 %v3894_v33, %v411_v45  ;;  %v3300_v45 = vld [vmem:[%s3613_s8 + $0x8c] sm:$0xff]  ;;  %v1382_v60 = vsel %vm728_vm0, %v1377_v47, %v1381_v50  ;;  %v416_v50 = vadd.f32 %v3894_v33, %v3882_v29 }
  0xb4   : > { %v3916_v49 = vpop.f32.mrf.mxu0 }
  0xb5   : > { %v417_v9 = vadd.f32 %v3894_v33, %v3916_v49  ;;  %v1535_v49 = vrot.slane %v3706_v44, 1 }
  0xb7   : > { %v398_v56 = vpop.f32.mrf.mxu2 }
  0xb8   : > { %v3921_v58 = vadd.f32 %v3894_v33, %v398_v56  ;;  %v1093_v56 = vsel %vm728_vm0, %v1088_v35, %v1092_v39  ;;  %v2179_v35 = vrot.slane %v2177_v10, 1 }
  0xb9   : > { %v3924_v62 = vpop.f32.mrf.mxu1 }
  0xba   : > { %v3961_v32 = vpop.f32.mrf.mxu3 }
  0xbc   : > { %610 = vmatmul.bf16.gmra.mxu1 %v3299_v59  ;;  %900 = vmatmul.bf16.gmra.mxu2 %v788_v0  ;;  %v3932_v6 = vpop.f32.mrf.mxu0  ;;  %v727_v0 = vpack.c.b16 %v717_v54, %v717_v54 }
  0xbe   : > { %v801_v19 = vshll.u32 %v727_v0, 16 }
  0xbf   : > { %1194 = vmatmul.bf16.gmra.mxu3 %v1085_v2  ;;  %v401_v13 = vpop.f32.mrf.mxu2  ;;  %1483 = vmatmul.bf16.gmra.mxu0 %v1374_v7  ;;  %v3160_v2 = vld [vmem:[%s3613_s8 + $0x5c] sm:$0xe] }
  0xc0   : > { %v3947_v14 = vadd.f32 %v3894_v33, %v401_v13  ;;  %v2180_v13 = vshll.u32 %v3981_v61, 16  ;;  %v3161_v22 = vor.u32 %v3385_v3, %v3160_v2  ;;  %v4013_v3 = vld [vmem:[%s3613_s8 + $0x18] sm:$0xff] }
  0xc1   : > { %v3949_v17 = vpop.f32.mrf.mxu1  ;;  %v2189_v18 = vshll.u32 %v4013_v3, 16 }
  0xc2   : > { %v2182_v39 = vrot.slane %v2180_v13, 2 }
  0xc4   : > { %v3958_v25 = vpop.f32.mrf.mxu0  ;;  %v2183_v54 = vor.u32 %v2182_v39, %v2179_v35 }
  0xc7   : > { %v403_v42 = vpop.f32.mrf.mxu2 }
  0xc8   : > { %v3965_v43 = vadd.f32 %v3894_v33, %v403_v42  ;;  %v803_v42 = vrot.slane %v801_v19, 1 }
  0xc9   : > { %v391_v37 = vpop.f32.mrf.mxu1 }
  0xca   : > { %v3972_v55 = vadd.f32 %v3894_v33, %v391_v37  ;;  %v804_v31 = vsel %vm728_vm0, %v799_v41, %v803_v42  ;;  %v2191_v41 = vrot.slane %v2189_v18, 2 }
  0xcc   : > { %615 = vmatmul.bf16.gmra.mxu1 %v3300_v45  ;;  %905 = vmatmul.bf16.gmra.mxu2 %v796_v53  ;;  %v3977_v59 = vpop.f32.mrf.mxu0  ;;  %v1998_v45 = vrot.slane %v3161_v22, 1  ;;  %v2175_v53 = vor.u32 %v2174_v30, %v2171_v28  ;;  %v3387_v30 = vld [vmem:[%s3613_s8 + $0x6c] sm:$0xff] }
  0xce   : > { %v2000_v0 = vsel %vm1533_vm1, %v1998_v45, %v1999_v11  ;;  %v2184_v2 = vsel %vm2167_vm2, %v2175_v53, %v2183_v54 }
  0xcf   : > { %1199 = vmatmul.bf16.gmra.mxu3 %v1093_v56  ;;  %v406_v1 = vpop.f32.mrf.mxu2  ;;  %1488 = vmatmul.bf16.gmra.mxu0 %v1382_v60 }
  0xd0   : > { %v3987_v7 = vadd.f32 %v3894_v33, %v406_v1  ;;  %v3515_v1 = vld [vmem:[%s3613_s8 + $0x4] sm:$0xe] }
  0xd1   : > { %v393_v16 = vpop.f32.mrf.mxu1  ;;  %v3516_v21 = vor.u32 %v3515_v1, %v3663_v27  ;;  %v418_v27 = vadd.f32 %v3894_v33, %v3932_v6 }
  0xd2   : > { %v1160_v8 = vpop.f32.mrf.mxu3  ;;  %v3994_v20 = vadd.f32 %v3894_v33, %v393_v16  ;;  %v2186_v16 = vshrl.u32 %v4013_v3, 16 }
  0xd3   : > { %v1534_v45 = vrot.slane %v3516_v21, 1 }
  0xd4   : > { %v3999_v26 = vpop.f32.mrf.mxu0  ;;  %v2188_v39 = vrot.slane %v2186_v16, 1 }
  0xd7   : > { %v408_v47 = vpop.f32.mrf.mxu2 }
  0xd8   : > { %v4005_v51 = vadd.f32 %v3894_v33, %v408_v47  ;;  %v1766_v47 = vrot.slane %v3975_v57, 1 }
  0xd9   : > { %v581_v56 = vpop.f32.mrf.mxu1 }
  0xda   : > { %v1162_v37 = vpop.f32.mrf.mxu3  ;;  %v626_v60 = vadd.f32 %v581_v56, %v416_v50  ;;  %v1767_v50 = vrot.slane %v3981_v61, 1 }
  0xdc   : > { %620 = vmatmul.bf16.gmra.mxu1 %v3301_v52  ;;  %910 = vmatmul.bf16.gmra.mxu2 %v804_v31  ;;  %v1454_v29 = vpop.f32.mrf.mxu0  ;;  %v2001_v52 = vrot.slane %v3387_v30, 1  ;;  %v2192_v31 = vor.u32 %v2191_v41, %v2188_v39  ;;  %v1537_v41 = vrot.slane %v3762_v15, 1 }
  0xde   : > { %v2002_v57 = vsel %vm1533_vm1, %v1999_v11, %v2001_v52 }
  0xdf   : > { %2082 = vmatmul.bf16.vlgmr.msra.gmra.mxu3 %v2000_v0  ;;  %v871_v4 = vpop.f32.mrf.mxu2  ;;  %2322 = vmatmul.bf16.vlgmr.msra.gmra.mxu0 %v2184_v2  ;;  %v1768_v0 = vsel %vm1533_vm1, %v1766_v47, %v1767_v50  ;;  %v2193_v2 = vsel %vm2167_vm2, %v2183_v54, %v2192_v31 }
  0xe0   : > { %v916_v10 = vadd.f32 %v871_v4, %v626_v60  ;;  %v4034_v4 = vld [vmem:[%s3613_s8 + $0x20] sm:$0xff] }
  0xe1   : > { %v583_v19 = vpop.f32.mrf.mxu1  ;;  %v2195_v11 = vshrl.u32 %v4034_v4, 16  ;;  %v2198_v18 = vshll.u32 %v4034_v4, 16 }
  0xe2   : > { %v1165_v13 = vpop.f32.mrf.mxu3  ;;  %v1205_v22 = vadd.f32 %v1160_v8, %v916_v10  ;;  %v627_v28 = vadd.f32 %v583_v19, %v417_v9 }
  0xe3   : > { %v2197_v30 = vrot.slane %v2195_v11, 1 }
  0xe4   : > { %v1456_v35 = vpop.f32.mrf.mxu0  ;;  %v4022_v42 = vadd.f32 %v3977_v59, %v1205_v22  ;;  %v1536_v59 = vsel %vm1533_vm1, %v1534_v45, %v1535_v49  ;;  %v3388_v22 = vld [vmem:[%s3613_s8 + $0x74] sm:$0xff]  ;;  %v1769_v45 = vrot.slane %v4013_v3, 1 }
  0xe7   : > { %v873_v53 = vpop.f32.mrf.mxu2 }
  0xe8   : > { %v917_v8 = vadd.f32 %v873_v53, %v627_v28  ;;  %v420_v53 = vadd.f32 %v3894_v33, %v3875_v24 }
  0xe9   : > { %v586_v60 = vpop.f32.mrf.mxu1 }
  0xea   : > { %v1167_v56 = vpop.f32.mrf.mxu3  ;;  %v1206_v1 = vadd.f32 %v1162_v37, %v917_v8  ;;  %v628_v44 = vadd.f32 %v586_v60, %v418_v27  ;;  %v419_v37 = vadd.f32 %v3894_v33, %v3958_v25  ;;  %v2003_v25 = vrot.slane %v3388_v22, 1 }
  0xeb   : > { %v1771_v22 = vrot.slane %v4034_v4, 1 }
  0xec   : > { %1618 = vmatmul.bf16.vlgmr.msra.gmra.mxu1 %v1536_v59  ;;  %1850 = vmatmul.bf16.vlgmr.msra.gmra.mxu2 %v1768_v0  ;;  %v1459_v61 = vpop.f32.mrf.mxu0  ;;  %v4037_v6 = vadd.f32 %v3999_v26, %v1206_v1  ;;  %v2200_v26 = vrot.slane %v2198_v18, 2  ;;  %v1538_v59 = vsel %vm1533_vm1, %v1535_v49, %v1537_v41  ;;  %v1770_v0 = vsel %vm1533_vm1, %v1767_v50, %v1769_v45 }
  0xed   : > { %v2004_v15 = vsel %vm1533_vm1, %v2001_v52, %v2003_v25  ;;  %v421_v49 = vadd.f32 %v3894_v33, %v3905_v38 }
  0xef   : > { %2087 = vmatmul.bf16.gmra.mxu3 %v2002_v57  ;;  %v876_v9 = vpop.f32.mrf.mxu2  ;;  %2327 = vmatmul.bf16.gmra.mxu0 %v2193_v2  ;;  %v4055_v57 = vld [vmem:[%s3613_s8 + $0x28] sm:$0xff] }
  0xf0   : > { %v918_v10 = vadd.f32 %v876_v9, %v628_v44  ;;  %v2204_v52 = vshrl.u32 %v4055_v57, 16  ;;  %v2207_v9 = vshll.u32 %v4055_v57, 16 }
  0xf1   : > { %v588_v19 = vpop.f32.mrf.mxu1 }
  0xf2   : > { %v1170_v16 = vpop.f32.mrf.mxu3  ;;  %v1207_v21 = vadd.f32 %v1165_v13, %v918_v10  ;;  %v629_v54 = vadd.f32 %v588_v19, %v419_v37  ;;  %v2201_v13 = vor.u32 %v2200_v26, %v2197_v30  ;;  %v2206_v19 = vrot.slane %v2204_v52, 1 }
  0xf3   : > { %v422_v26 = vadd.f32 %v3894_v33, %v3924_v62 }
  0xf4   : > { %v1461_v28 = vpop.f32.mrf.mxu0  ;;  %v4044_v39 = vadd.f32 %v1454_v29, %v1207_v21  ;;  %v2202_v44 = vsel %vm2167_vm2, %v2192_v31, %v2201_v13  ;;  %v3389_v31 = vld [vmem:[%s3613_s8 + $0x7c] sm:$0xff] }
  0xf5   : > { %v2005_v38 = vrot.slane %v3389_v31, 1 }
  0xf7   : > { %v878_v47 = vpop.f32.mrf.mxu2 }
  0xf8   : > { %v919_v27 = vadd.f32 %v878_v47, %v629_v54  ;;  %v1539_v54 = vrot.slane %v3786_v40, 1  ;;  %v2006_v40 = vsel %vm1533_vm1, %v2003_v25, %v2005_v38 }
  0xf9   : > { %v591_v60 = vpop.f32.mrf.mxu1 }
  0xfa   : > { %v1172_v8 = vpop.f32.mrf.mxu3  ;;  %v1208_v29 = vadd.f32 %v1167_v56, %v919_v27  ;;  %v630_v1 = vadd.f32 %v591_v60, %v420_v53  ;;  %v1540_v60 = vsel %vm1533_vm1, %v1537_v41, %v1539_v54  ;;  %v423_v41 = vadd.f32 %v3894_v33, %v3949_v17 }
  0xfc   : > { %1623 = vmatmul.bf16.gmra.mxu1 %v1538_v59  ;;  %1855 = vmatmul.bf16.gmra.mxu2 %v1770_v0  ;;  %v1464_v3 = vpop.f32.mrf.mxu0  ;;  %v4057_v24 = vadd.f32 %v1456_v35, %v1208_v29  ;;  %v2209_v35 = vrot.slane %v2207_v9, 2  ;;  %v1772_v59 = vsel %vm1533_vm1, %v1769_v45, %v1771_v22 }
  0xff   : > { %2092 = vmatmul.bf16.gmra.mxu3 %v2004_v15  ;;  %v881_v2 = vpop.f32.mrf.mxu2  ;;  %2332 = vmatmul.bf16.gmra.mxu0 %v2202_v44 }
 0x100   : > { %v920_v50 = vadd.f32 %v881_v2, %v630_v1  ;;  %v4075_v1 = vld [vmem:[%s3613_s8 + $0x30] sm:$0xff] }
 0x101   : > { %v593_v37 = vpop.f32.mrf.mxu1  ;;  %v2213_v25 = vshrl.u32 %v4075_v1, 16  ;;  %v2216_v44 = vshll.u32 %v4075_v1, 16 }
 0x102   : > { %v1175_v56 = vpop.f32.mrf.mxu3  ;;  %v1209_v10 = vadd.f32 %v1170_v16, %v920_v50  ;;  %v631_v11 = vadd.f32 %v593_v37, %v421_v49  ;;  %v2210_v16 = vor.u32 %v2209_v35, %v2206_v19 }
 0x103   : > { %v2215_v9 = vrot.slane %v2213_v25, 1 }
 0x104   : > { %v1466_v18 = vpop.f32.mrf.mxu0  ;;  %v4064_v21 = vadd.f32 %v1459_v61, %v1209_v10  ;;  %v2211_v29 = vsel %vm2167_vm2, %v2201_v13, %v2210_v16  ;;  %v3390_v13 = vld [vmem:[%s3613_s8 + $0x84] sm:$0xff]  ;;  %v1541_v10 = vrot.slane %v3806_v63, 1 }
 0x105   : > { %v2007_v17 = vrot.slane %v3390_v13, 1 }
 0x107   : > { %v883_v30 = vpop.f32.mrf.mxu2 }
 0x108   : > { %v921_v47 = vadd.f32 %v883_v30, %v631_v11  ;;  %v1773_v11 = vrot.slane %v4055_v57, 1 }
 0x109   : > { %v596_v27 = vpop.f32.mrf.mxu1 }
 0x10a   : > { %v1177_v53 = vpop.f32.mrf.mxu3  ;;  %v1210_v61 = vadd.f32 %v1172_v8, %v921_v47  ;;  %v632_v0 = vadd.f32 %v596_v27, %v422_v26  ;;  %v1774_v47 = vsel %vm1533_vm1, %v1771_v22, %v1773_v11 }
 0x10c   : > { %1628 = vmatmul.bf16.gmra.mxu1 %v1540_v60  ;;  %1860 = vmatmul.bf16.gmra.mxu2 %v1772_v59  ;;  %v1469_v4 = vpop.f32.mrf.mxu0  ;;  %v4077_v62 = vadd.f32 %v1461_v28, %v1210_v61  ;;  %v2218_v28 = vrot.slane %v2216_v44, 2  ;;  %v4094_v59 = vld [vmem:[%s3613_s8 + $0x38] sm:$0xff]  ;;  %v1775_v44 = vrot.slane %v4075_v1, 1 }
 0x10e   : > { %v2219_v30 = vor.u32 %v2218_v28, %v2215_v9 }
 0x10f   : > { %2097 = vmatmul.bf16.gmra.mxu3 %v2006_v40  ;;  %v886_v15 = vpop.f32.mrf.mxu2  ;;  %2337 = vmatmul.bf16.gmra.mxu0 %v2211_v29 }
 0x110   : > { %v922_v45 = vadd.f32 %v886_v15, %v632_v0  ;;  %v2220_v57 = vsel %vm2167_vm2, %v2210_v16, %v2219_v30  ;;  %v3391_v15 = vld [vmem:[%s3613_s8 + $0x8c] sm:$0xff] }
 0x111   : > { %v598_v2 = vpop.f32.mrf.mxu1 }
 0x112   : > { %v1180_v8 = vpop.f32.mrf.mxu3  ;;  %v1211_v49 = vadd.f32 %v1175_v56, %v922_v45  ;;  %v633_v50 = vadd.f32 %v598_v2, %v423_v41  ;;  %v1542_v56 = vsel %vm1533_vm1, %v1539_v54, %v1541_v10  ;;  %v2009_v2 = vrot.slane %v3391_v15, 1 }
 0x114   : > { %v1471_v52 = vpop.f32.mrf.mxu0  ;;  %v4084_v37 = vadd.f32 %v1464_v3, %v1211_v49  ;;  %v2008_v3 = vsel %vm1533_vm1, %v2005_v38, %v2007_v17 }
 0x117   : > { %v888_v31 = vpop.f32.mrf.mxu2 }
 0x118   : > { %v923_v19 = vadd.f32 %v888_v31, %v633_v50 }
 0x119   : > { %v601_v26 = vpop.f32.mrf.mxu1 }
 0x11a   : > { %v1182_v35 = vpop.f32.mrf.mxu3  ;;  %v1212_v27 = vadd.f32 %v1177_v53, %v923_v19  ;;  %v634_v60 = vadd.f32 %v601_v26, %v3972_v55  ;;  %v2222_v53 = vshrl.u32 %v4094_v59, 16  ;;  %v2225_v55 = vshll.u32 %v4094_v59, 16  ;;  %v4112_v26 = vld [vmem:[%s3613_s8 + $0x40] sm:$0xff] }
 0x11c   : > { %1633 = vmatmul.bf16.gmra.mxu1 %v1542_v56  ;;  %1865 = vmatmul.bf16.gmra.mxu2 %v1774_v47  ;;  %v1474_v63 = vpop.f32.mrf.mxu0  ;;  %v4096_v61 = vadd.f32 %v1466_v18, %v1212_v27  ;;  %v2224_v16 = vrot.slane %v2222_v53, 1  ;;  %v2227_v45 = vrot.slane %v2225_v55, 2  ;;  %v1543_v18 = vrot.slane %v3829_v23, 1 }
 0x11d   : > { %v1777_v53 = vrot.slane %v4094_v59, 1 }
 0x11e   : > { %v2228_v9 = vor.u32 %v2227_v45, %v2224_v16 }
 0x11f   : > { %2102 = vmatmul.bf16.gmra.mxu3 %v2008_v3  ;;  %v891_v0 = vpop.f32.mrf.mxu2  ;;  %2342 = vmatmul.bf16.gmra.mxu0 %v2220_v57  ;;  %v3392_v3 = vld [vmem:[%s3613_s8 + $0x94] sm:$0xff] }
 0x120   : > { %v924_v54 = vadd.f32 %v891_v0, %v634_v60  ;;  %v2229_v1 = vsel %vm2167_vm2, %v2219_v30, %v2228_v9  ;;  %v2011_v55 = vrot.slane %v3392_v3, 1 }
 0x121   : > { %v603_v38 = vpop.f32.mrf.mxu1 }
 0x122   : > { %v1185_v22 = vpop.f32.mrf.mxu3  ;;  %v1213_v40 = vadd.f32 %v1180_v8, %v924_v54  ;;  %v635_v29 = vadd.f32 %v603_v38, %v3994_v20  ;;  %v1544_v8 = vsel %vm1533_vm1, %v1541_v10, %v1543_v18  ;;  %v1776_v20 = vsel %vm1533_vm1, %v1773_v11, %v1775_v44 }
 0x124   : > { %v1476_v41 = vpop.f32.mrf.mxu0  ;;  %v4102_v25 = vadd.f32 %v1469_v4, %v1213_v40  ;;  %v2010_v4 = vsel %vm1533_vm1, %v2007_v17, %v2009_v2 }
 0x127   : > { %v893_v49 = vpop.f32.mrf.mxu2 }
 0x128   : > { %v925_v50 = vadd.f32 %v893_v49, %v635_v29 }
 0x129   : > { %v606_v28 = vpop.f32.mrf.mxu1 }
 0x12a   : > { %v1187_v13 = vpop.f32.mrf.mxu3  ;;  %v1214_v31 = vadd.f32 %v1182_v35, %v925_v50  ;;  %v636_v19 = vadd.f32 %v606_v28, %v3900_v36  ;;  %v2231_v35 = vshrl.u32 %v4112_v26, 16  ;;  %v2234_v36 = vshll.u32 %v4112_v26, 16  ;;  %v4130_v50 = vld [vmem:[%s3613_s8 + $0x48] sm:$0xff] }
 0x12c   : > { %1638 = vmatmul.bf16.gmra.mxu1 %v1544_v8  ;;  %1870 = vmatmul.bf16.gmra.mxu2 %v1776_v20  ;;  %v1479_v23 = vpop.f32.mrf.mxu0  ;;  %v4114_v56 = vadd.f32 %v1471_v52, %v1214_v31  ;;  %v2233_v30 = vrot.slane %v2231_v35, 1  ;;  %v2236_v0 = vrot.slane %v2234_v36, 2  ;;  %v1545_v52 = vrot.slane %v3843_v46, 1  ;;  %v2146_v35 = vld [vmem:[%s3613_s8 + $0x50] sm:$0x3] }
 0x12e   : > { %v2237_v15 = vor.u32 %v2236_v0, %v2233_v30 }
 0x12f   : > { %2107 = vmatmul.bf16.gmra.mxu3 %v2010_v4  ;;  %v896_v47 = vpop.f32.mrf.mxu2  ;;  %2347 = vmatmul.bf16.gmra.mxu0 %v2229_v1 }
 0x130   : > { %v926_v10 = vadd.f32 %v896_v47, %v636_v19  ;;  %v2238_v59 = vsel %vm2167_vm2, %v2228_v9, %v2237_v15  ;;  %v3393_v19 = vld [vmem:[%s3613_s8 + $0x9c] sm:$0xff]  ;;  %v1547_v47 = vrot.slane %v3863_v5, 1  ;;  %v3141_v5 = vld [vmem:[%s3613_s8 + $0xa4] sm:$0x1] }
 0x131   : > { %v608_v17 = vpop.f32.mrf.mxu1  ;;  %v2013_v36 = vrot.slane %v3393_v19, 1 }
 0x132   : > { %v1190_v11 = vpop.f32.mrf.mxu3  ;;  %v1215_v27 = vadd.f32 %v1185_v22, %v926_v10  ;;  %v637_v60 = vadd.f32 %v608_v17, %v3921_v58  ;;  %v1546_v22 = vsel %vm1533_vm1, %v1543_v18, %v1545_v52  ;;  %v1778_v58 = vsel %vm1533_vm1, %v1775_v44, %v1777_v53 }
 0x133   : > { %v1779_v10 = vrot.slane %v4112_v26, 1 }
 0x134   : > { %v1481_v57 = vpop.f32.mrf.mxu0  ;;  %v4120_v54 = vadd.f32 %v1474_v63, %v1215_v27  ;;  %v2012_v63 = vsel %vm1533_vm1, %v2009_v2, %v2011_v55  ;;  %v2243_v2 = vshll.u32 %v4130_v50, 16 }
 0x135   : > { %v1780_v0 = vsel %vm1533_vm1, %v1777_v53, %v1779_v10 }
 0x136   : > { %v2245_v1 = vrot.slane %v2243_v2, 2 }
 0x137   : > { %v898_v38 = vpop.f32.mrf.mxu2 }
 0x138   : > { %v927_v40 = vadd.f32 %v898_v38, %v637_v60 }
 0x139   : > { %v611_v16 = vpop.f32.mrf.mxu1 }
 0x13a   : > { %v1192_v29 = vpop.f32.mrf.mxu3  ;;  %v1216_v45 = vadd.f32 %v1187_v13, %v927_v40  ;;  %v638_v49 = vadd.f32 %v611_v16, %v3947_v14  ;;  %v2240_v14 = vshrl.u32 %v4130_v50, 16  ;;  %v2014_v40 = vsel %vm1533_vm1, %v2011_v55, %v2013_v36 }
 0x13c   : > { %1643 = vmatmul.bf16.gmra.mxu1 %v1546_v22  ;;  %1875 = vmatmul.bf16.gmra.mxu2 %v1778_v58  ;;  %v1484_v46 = vpop.f32.mrf.mxu0  ;;  %v4132_v28 = vadd.f32 %v1476_v41, %v1216_v45  ;;  %v2242_v4 = vrot.slane %v2240_v14, 1  ;;  %v1987_v45 = vunpack.c.l.b16 %v3141_v5 }
 0x13e   : > { %v2246_v3 = vor.u32 %v2245_v1, %v2242_v4 }
 0x13f   : > { %2112 = vmatmul.bf16.gmra.mxu3 %v2012_v63  ;;  %v901_v8 = vpop.f32.mrf.mxu2  ;;  %2352 = vmatmul.bf16.gmra.mxu0 %v2238_v59 }
 0x140   : > { %v928_v18 = vadd.f32 %v901_v8, %v638_v49  ;;  %v2247_v16 = vsel %vm2167_vm2, %v2237_v15, %v2246_v3  ;;  %v1997_v8 = vpack.c.b16 %v1987_v45, %v1987_v45 }
 0x141   : > { %v613_v13 = vpop.f32.mrf.mxu1 }
 0x142   : > { %v1195_v44 = vpop.f32.mrf.mxu3  ;;  %v1217_v20 = vadd.f32 %v1190_v11, %v928_v18  ;;  %v639_v31 = vadd.f32 %v613_v13, %v3965_v43  ;;  %v2165_v11 = vunpack.c.l.b16 %v2146_v35  ;;  %v1548_v43 = vsel %vm1533_vm1, %v1545_v52, %v1547_v47 }
 0x143   : > { %v1781_v13 = vrot.slane %v4130_v50, 1 }
 0x144   : > { %v1486_v9 = vpop.f32.mrf.mxu0  ;;  %v4138_v41 = vadd.f32 %v1479_v23, %v1217_v20  ;;  %v2166_v22 = vpack.c.b16 %v2165_v11, %v2165_v11  ;;  %v2015_v20 = vrot.slane %v1997_v8, 1  ;;  %v1700_v11 = vld [vmem:[%s3613_s8 + $0x50] sm:$0x1]  ;;  %s3488_s8 = smul.u32 72, %s4224_s12 }
 0x146   : > { %v2252_v63 = vshll.u32 %v2166_v22, 16  ;;  %s4179_s9 = scalar_lea.vmem %s4218_s3, %s3488_s8 }
 0x147   : > { %v903_v17 = vpop.f32.mrf.mxu2 }
 0x148   : > { %v929_v27 = vadd.f32 %v903_v17, %v639_v31  ;;  %v2254_v15 = vrot.slane %v2252_v63, 2 }
 0x149   : > { %v616_v30 = vpop.f32.mrf.mxu1 }
 0x14a   : > { %v1197_v60 = vpop.f32.mrf.mxu3  ;;  %v1218_v38 = vadd.f32 %v1192_v29, %v929_v27  ;;  %v640_v23 = vadd.f32 %v616_v30, %v3987_v7  ;;  %v2249_v29 = vshrl.u32 %v2166_v22, 16 }
 0x14c   : > { %1648 = vmatmul.bf16.gmra.mxu1 %v1548_v43  ;;  %1880 = vmatmul.bf16.gmra.mxu2 %v1780_v0  ;;  %v1489_v26 = vpop.f32.mrf.mxu0  ;;  %v4149_v58 = vadd.f32 %v1481_v57, %v1218_v38  ;;  %v2251_v14 = vrot.slane %v2249_v29, 1  ;;  %v1549_v57 = vrot.slane %v3897_v34, 1  ;;  %v1755_v43 = vunpack.c.l.b16 %v1700_v11 }
 0x14e   : > { %v2255_v1 = vor.u32 %v2254_v15, %v2251_v14  ;;  %v1765_v38 = vpack.c.b16 %v1755_v43, %v1755_v43 }
 0x14f   : > { %2117 = vmatmul.bf16.gmra.mxu3 %v2014_v40  ;;  %v906_v49 = vpop.f32.mrf.mxu2  ;;  %2357 = vmatmul.bf16.gmra.mxu0 %v2247_v16 }
 0x150   : > { %v930_v52 = vadd.f32 %v906_v49, %v640_v23  ;;  %v2256_v50 = vsel %vm2167_vm2, %v2246_v3, %v2255_v1  ;;  %v1551_v3 = vrot.slane %v3944_v12, 1 }
 0x151   : > { %v618_v7 = vpop.f32.mrf.mxu1 }
 0x152   : > { %v1200_v53 = vpop.f32.mrf.mxu3  ;;  %v1219_v59 = vadd.f32 %v1195_v44, %v930_v52  ;;  %v641_v55 = vadd.f32 %v618_v7, %v4005_v51  ;;  %v1550_v44 = vsel %vm1533_vm1, %v1547_v47, %v1549_v57  ;;  %v1782_v51 = vsel %vm1533_vm1, %v1779_v10, %v1781_v13 }
 0x153   : > { %v433_v47 = vadd.f32 %v3894_v33, %v3961_v32  ;;  %v1552_v52 = vsel %vm1533_vm1, %v1549_v57, %v1551_v3 }
 0x154   : > { %v1491_v18 = vpop.f32.mrf.mxu0  ;;  %v4152_v2 = vadd.f32 %v1484_v46, %v1219_v59  ;;  %v2016_v46 = vsel %vm1533_vm1, %v2013_v36, %v2015_v20 }
 0x157   : > { %v908_v31 = vpop.f32.mrf.mxu2 }
 0x158   : > { %v931_v19 = vadd.f32 %v908_v31, %v641_v55 }
 0x159   : > { %v621_v35 = vpop.f32.mrf.mxu1 }
 0x15a   : > { %v1202_v4 = vpop.f32.mrf.mxu3  ;;  %v1220_v17 = vadd.f32 %v1197_v60, %v931_v19  ;;  %v642_v27 = vadd.f32 %v621_v35, %v3914_v48 }
 0x15c   : > { %1653 = vmatmul.bf16.gmra.mxu1 %v1550_v44  ;;  %1885 = vmatmul.bf16.gmra.mxu2 %v1782_v51  ;;  %v2323_v34 = vpop.f32.mrf.mxu0  ;;  %v4162_v30 = vadd.f32 %v1486_v9, %v1220_v17  ;;  %v1783_v9 = vrot.slane %v1765_v38, 1 }
 0x15e   : > { %v1784_v33 = vsel %vm1533_vm1, %v1781_v13, %v1783_v9 }
 0x15f   : > { %2122 = vmatmul.bf16.gmra.mxu3 %v2016_v46  ;;  %v911_v0 = vpop.f32.mrf.mxu2  ;;  %2362 = vmatmul.bf16.gmra.mxu0 %v2256_v50 }
 0x160   : > { %v932_v10 = vadd.f32 %v911_v0, %v642_v27 }
 0x161   : > { %v623_v48 = vpop.f32.mrf.mxu1 }
 0x162   : > { %v2083_v60 = vpop.f32.mrf.mxu3  ;;  %v1221_v36 = vadd.f32 %v1200_v53, %v932_v10  ;;  %v643_v23 = vadd.f32 %v623_v48, %v433_v47 }
 0x164   : > { %v2325_v40 = vpop.f32.mrf.mxu0  ;;  %v4166_v5 = vadd.f32 %v1489_v26, %v1221_v36 }
 0x167   : > { %v913_v16 = vpop.f32.mrf.mxu2 }
 0x168   : > { %v933_v22 = vadd.f32 %v913_v16, %v643_v23 }
 0x169   : > { %v1619_v49 = vpop.f32.mrf.mxu1 }
 0x16a   : > { %v2085_v45 = vpop.f32.mrf.mxu3  ;;  %v1222_v32 = vadd.f32 %v1202_v4, %v933_v22  ;;  %v1664_v63 = vadd.f32 %v1619_v49, %v4022_v42 }
 0x16c   : > { %1658 = vmatmul.bf16.gmra.mxu1 %v1552_v52  ;;  %1890 = vmatmul.bf16.gmra.mxu2 %v1784_v33  ;;  %v2328_v29 = vpop.f32.mrf.mxu0  ;;  %v4171_v53 = vadd.f32 %v1491_v18, %v1222_v32 }
 0x16f   : > { %v1851_v26 = vpop.f32.mrf.mxu2 }
 0x170   : > { %v1896_v59 = vadd.f32 %v1851_v26, %v1664_v63 }
 0x171   : > { %v1621_v7 = vpop.f32.mrf.mxu1 }
 0x172   : > { %v2088_v12 = vpop.f32.mrf.mxu3  ;;  %v2128_v8 = vadd.f32 %v2083_v60, %v1896_v59  ;;  %v1665_v14 = vadd.f32 %v1621_v7, %v4037_v6 }
 0x174   : > { %v2330_v55 = vpop.f32.mrf.mxu0  ;;  %v2368_v31 = vadd.f32 %v2323_v34, %v2128_v8 }
 0x176   : > { %v2386_v1 = vmax.f32 %v2368_v31, 0.0 }
 0x177   : > { %v1853_v15 = vpop.f32.mrf.mxu2 }
 0x178   : > { %v1897_v57 = vadd.f32 %v1853_v15, %v1665_v14 }
 0x179   : > { %v1624_v20 = vpop.f32.mrf.mxu1 }
 0x17a   : > { %v2090_v13 = vpop.f32.mrf.mxu3  ;;  %v2129_v19 = vadd.f32 %v2085_v45, %v1897_v57  ;;  %v1666_v6 = vadd.f32 %v1624_v20, %v4044_v39 }
 0x17c   : > { %v2369_v4 = vadd.f32 %v2325_v40, %v2129_v19  ;;  %v2333_v18 = vpop.f32.mrf.mxu0 }
 0x17e   : > { %v2387_v35 = vmax.f32 %v2369_v4, 0.0 }
 0x17f   : > { %v1856_v42 = vpop.f32.mrf.mxu2 }
 0x180   : > { %v3413_v44 = vpack.c.bf16 %v2387_v35, %v2386_v1  ;;  %v1898_v27 = vadd.f32 %v1856_v42, %v1666_v6 }
 0x181   : > { %v1626_v17 = vpop.f32.mrf.mxu1 }
 0x182   : > { %v2093_v51 = vpop.f32.mrf.mxu3  ;;  %3414 = vst [vmem:[%s4179_s9] sm:$0xff] %v3413_v44   ;;  %v2130_v11 = vadd.f32 %v2088_v12, %v1898_v27  ;;  %v1667_v34 = vadd.f32 %v1626_v17, %v4057_v24 }
 0x184   : > { %v2335_v46 = vpop.f32.mrf.mxu0  ;;  %v2370_v10 = vadd.f32 %v2328_v29, %v2130_v11 }
 0x186   : > { %v2388_v36 = vmax.f32 %v2370_v10, 0.0 }
 0x187   : > { %v1858_v50 = vpop.f32.mrf.mxu2 }
 0x188   : > { %v1899_v43 = vadd.f32 %v1858_v50, %v1667_v34 }
 0x189   : > { %v1629_v47 = vpop.f32.mrf.mxu1 }
 0x18a   : > { %v2095_v0 = vpop.f32.mrf.mxu3  ;;  %v2131_v60 = vadd.f32 %v2090_v13, %v1899_v43  ;;  %v1668_v3 = vadd.f32 %v1629_v47, %v4064_v21 }
 0x18c   : > { %v2371_v48 = vadd.f32 %v2330_v55, %v2131_v60  ;;  %v2338_v38 = vpop.f32.mrf.mxu0 }
 0x18e   : > { %v2389_v23 = vmax.f32 %v2371_v48, 0.0 }
 0x18f   : > { %v1861_v39 = vpop.f32.mrf.mxu2 }
 0x190   : > { %v3418_v40 = vpack.c.bf16 %v2389_v23, %v2388_v36  ;;  %v1900_v22 = vadd.f32 %v1861_v39, %v1668_v3 }
 0x191   : > { %v1631_v16 = vpop.f32.mrf.mxu1 }
 0x192   : > { %v2098_v9 = vpop.f32.mrf.mxu3  ;;  %3455 = vst [vmem:[%s4179_s9 + $0x8] sm:$0xff] %v3418_v40   ;;  %v2132_v24 = vadd.f32 %v2093_v51, %v1900_v22  ;;  %v1669_v45 = vadd.f32 %v1631_v16, %v4077_v62 }
 0x194   : > { %v2340_v52 = vpop.f32.mrf.mxu0  ;;  %v2372_v26 = vadd.f32 %v2333_v18, %v2132_v24 }
 0x196   : > { %v2390_v7 = vmax.f32 %v2372_v26, 0.0 }
 0x197   : > { %v1863_v49 = vpop.f32.mrf.mxu2 }
 0x198   : > { %v1901_v33 = vadd.f32 %v1863_v49, %v1669_v45 }
 0x199   : > { %v1634_v29 = vpop.f32.mrf.mxu1 }
 0x19a   : > { %v2100_v32 = vpop.f32.mrf.mxu3  ;;  %v2133_v63 = vadd.f32 %v2095_v0, %v1901_v33  ;;  %v1670_v8 = vadd.f32 %v1634_v29, %v4084_v37 }
 0x19c   : > { %v2373_v12 = vadd.f32 %v2335_v46, %v2133_v63  ;;  %v2343_v57 = vpop.f32.mrf.mxu0 }
 0x19e   : > { %v2391_v59 = vmax.f32 %v2373_v12, 0.0 }
 0x19f   : > { %v1866_v55 = vpop.f32.mrf.mxu2 }
 0x1a0   : > { %v3423_v21 = vpack.c.bf16 %v2391_v59, %v2390_v7  ;;  %v1902_v62 = vadd.f32 %v1866_v55, %v1670_v8 }
 0x1a1   : > { %v1636_v15 = vpop.f32.mrf.mxu1 }
 0x1a2   : > { %v2103_v14 = vpop.f32.mrf.mxu3  ;;  %3456 = vst [vmem:[%s4179_s9 + $0x10] sm:$0xff] %v3423_v21   ;;  %v2134_v13 = vadd.f32 %v2098_v9, %v1902_v62  ;;  %v1671_v20 = vadd.f32 %v1636_v15, %v4096_v61 }
 0x1a4   : > { %v2374_v1 = vadd.f32 %v2338_v38, %v2134_v13  ;;  %v2345_v42 = vpop.f32.mrf.mxu0 }
 0x1a6   : > { %v2392_v6 = vmax.f32 %v2374_v1, 0.0 }
 0x1a7   : > { %v1868_v31 = vpop.f32.mrf.mxu2 }
 0x1a8   : > { %v1903_v19 = vadd.f32 %v1868_v31, %v1671_v20 }
 0x1a9   : > { %v1639_v4 = vpop.f32.mrf.mxu1 }
 0x1aa   : > { %v2105_v18 = vpop.f32.mrf.mxu3  ;;  %v2135_v35 = vadd.f32 %v2100_v32, %v1903_v19  ;;  %v1672_v27 = vadd.f32 %v1639_v4, %v4102_v25 }
 0x1ac   : > { %v2375_v44 = vadd.f32 %v2340_v52, %v2135_v35  ;;  %v2348_v50 = vpop.f32.mrf.mxu0 }
 0x1ae   : > { %v2393_v51 = vmax.f32 %v2375_v44, 0.0 }
 0x1af   : > { %v1871_v37 = vpop.f32.mrf.mxu2 }
 0x1b0   : > { %v3428_v17 = vpack.c.bf16 %v2393_v51, %v2392_v6  ;;  %v1904_v11 = vadd.f32 %v1871_v37, %v1672_v27 }
 0x1b1   : > { %v1641_v46 = vpop.f32.mrf.mxu1 }
 0x1b2   : > { %3457 = vst [vmem:[%s4179_s9 + $0x18] sm:$0xff] %v3428_v17   ;;  %v2108_v34 = vpop.f32.mrf.mxu3  ;;  %v2136_v61 = vadd.f32 %v2103_v14, %v1904_v11  ;;  %v1673_v43 = vadd.f32 %v1641_v46, %v4114_v56 }
 0x1b4   : > { %v2376_v60 = vadd.f32 %v2343_v57, %v2136_v61  ;;  %v2350_v25 = vpop.f32.mrf.mxu0 }
 0x1b6   : > { %v2394_v23 = vmax.f32 %v2376_v60, 0.0 }
 0x1b7   : > { %v1873_v0 = vpop.f32.mrf.mxu2 }
 0x1b8   : > { %v1905_v47 = vadd.f32 %v1873_v0, %v1673_v43 }
 0x1b9   : > { %v1644_v10 = vpop.f32.mrf.mxu1 }
 0x1ba   : > { %v2137_v48 = vadd.f32 %v2105_v18, %v1905_v47  ;;  %v2110_v36 = vpop.f32.mrf.mxu3  ;;  %v1674_v9 = vadd.f32 %v1644_v10, %v4120_v54 }
 0x1bc   : > { %v2377_v38 = vadd.f32 %v2345_v42, %v2137_v48  ;;  %v2353_v32 = vpop.f32.mrf.mxu0 }
 0x1be   : > { %v2395_v39 = vmax.f32 %v2377_v38, 0.0 }
 0x1bf   : > { %v1876_v40 = vpop.f32.mrf.mxu2 }
 0x1c0   : > { %v3433_v3 = vpack.c.bf16 %v2395_v39, %v2394_v23  ;;  %v1906_v22 = vadd.f32 %v1876_v40, %v1674_v9 }
 0x1c1   : > { %v1646_v16 = vpop.f32.mrf.mxu1 }
 0x1c2   : > { %3458 = vst [vmem:[%s4179_s9 + $0x20] sm:$0xff] %v3433_v3   ;;  %v2138_v24 = vadd.f32 %v2108_v34, %v1906_v22  ;;  %v1675_v56 = vadd.f32 %v1646_v16, %v4132_v28  ;;  %v2113_v49 = vpop.f32.mrf.mxu3 }
 0x1c4   : > { %v2378_v29 = vadd.f32 %v2348_v50, %v2138_v24  ;;  %v2355_v28 = vpop.f32.mrf.mxu0 }
 0x1c6   : > { %v2396_v12 = vmax.f32 %v2378_v29, 0.0 }
 0x1c7   : > { %v1878_v45 = vpop.f32.mrf.mxu2 }
 0x1c8   : > { %v1907_v52 = vadd.f32 %v1878_v45, %v1675_v56 }
 0x1c9   : > { %v1649_v33 = vpop.f32.mrf.mxu1 }
 0x1ca   : > { %v2139_v26 = vadd.f32 %v2110_v36, %v1907_v52  ;;  %v1676_v54 = vadd.f32 %v1649_v33, %v4138_v41  ;;  %v2115_v8 = vpop.f32.mrf.mxu3 }
 0x1cc   : > { %v2379_v63 = vadd.f32 %v2350_v25, %v2139_v26  ;;  %v2358_v1 = vpop.f32.mrf.mxu0 }
 0x1ce   : > { %v2397_v7 = vmax.f32 %v2379_v63, 0.0 }
 0x1cf   : > { %v1881_v59 = vpop.f32.mrf.mxu2 }
 0x1d0   : > { %v3438_v55 = vpack.c.bf16 %v2397_v7, %v2396_v12  ;;  %v1908_v14 = vadd.f32 %v1881_v59, %v1676_v54 }
 0x1d1   : > { %v1651_v21 = vpop.f32.mrf.mxu1 }
 0x1d2   : > { %3459 = vst [vmem:[%s4179_s9 + $0x28] sm:$0xff] %v3438_v55   ;;  %v2140_v15 = vadd.f32 %v2113_v49, %v1908_v14  ;;  %v1677_v57 = vadd.f32 %v1651_v21, %v4149_v58  ;;  %v2118_v4 = vpop.f32.mrf.mxu3 }
 0x1d4   : > { %v2380_v31 = vadd.f32 %v2353_v32, %v2140_v15  ;;  %v2360_v46 = vpop.f32.mrf.mxu0 }
 0x1d6   : > { %v2398_v35 = vmax.f32 %v2380_v31, 0.0 }
 0x1d7   : > { %v1883_v62 = vpop.f32.mrf.mxu2 }
 0x1d8   : > { %v1909_v13 = vadd.f32 %v1883_v62, %v1677_v57 }
 0x1d9   : > { %v1654_v20 = vpop.f32.mrf.mxu1 }
 0x1da   : > { %v2141_v19 = vadd.f32 %v2115_v8, %v1909_v13  ;;  %v1678_v6 = vadd.f32 %v1654_v20, %v4152_v2  ;;  %v2120_v17 = vpop.f32.mrf.mxu3 }
 0x1dc   : > { %v2381_v18 = vadd.f32 %v2355_v28, %v2141_v19  ;;  %v2363_v36 = vpop.f32.mrf.mxu0 }
 0x1de   : > { %v2399_v42 = vmax.f32 %v2381_v18, 0.0 }
 0x1df   : > { %v1886_v41 = vpop.f32.mrf.mxu2 }
 0x1e0   : > { %v3443_v44 = vpack.c.bf16 %v2399_v42, %v2398_v35  ;;  %v1910_v37 = vadd.f32 %v1886_v41, %v1678_v6 }
 0x1e1   : > { %v1656_v51 = vpop.f32.mrf.mxu1 }
 0x1e2   : > { %3460 = vst [vmem:[%s4179_s9 + $0x30] sm:$0xff] %v3443_v44   ;;  %v2142_v27 = vadd.f32 %v2118_v4, %v1910_v37  ;;  %v1679_v58 = vadd.f32 %v1656_v51, %v4162_v30  ;;  %v2123_v60 = vpop.f32.mrf.mxu3 }
 0x1e4   : > { %v2382_v61 = vadd.f32 %v2358_v1, %v2142_v27  ;;  %v2365_v24 = vpop.f32.mrf.mxu0 }
 0x1e6   : > { %v2400_v47 = vmax.f32 %v2382_v61, 0.0 }
 0x1e7   : > { %v1888_v11 = vpop.f32.mrf.mxu2 }
 0x1e8   : > { %v1911_v34 = vadd.f32 %v1888_v11, %v1679_v58 }
 0x1e9   : > { %v1659_v50 = vpop.f32.mrf.mxu1 }
 0x1ea   : > { %v2143_v43 = vadd.f32 %v2120_v17, %v1911_v34  ;;  %v1680_v38 = vadd.f32 %v1659_v50, %v4166_v5  ;;  %v2125_v9 = vpop.f32.mrf.mxu3 }
 0x1ec   : > { %v2383_v0 = vadd.f32 %v2360_v46, %v2143_v43 }
 0x1ee   : > { %v2401_v10 = vmax.f32 %v2383_v0, 0.0 }
 0x1ef   : > { %v1891_v48 = vpop.f32.mrf.mxu2 }
 0x1f0   : > { %v3448_v2 = vpack.c.bf16 %v2401_v10, %v2400_v47  ;;  %v1912_v23 = vadd.f32 %v1891_v48, %v1680_v38 }
 0x1f1   : > { %v1661_v39 = vpop.f32.mrf.mxu1 }
 0x1f2   : > { %3461 = vst [vmem:[%s4179_s9 + $0x38] sm:$0xff] %v3448_v2   ;;  %v2144_v30 = vadd.f32 %v2123_v60, %v1912_v23  ;;  %v1681_v40 = vadd.f32 %v1661_v39, %v4171_v53 }
 0x1f4   : > { %v2384_v16 = vadd.f32 %v2363_v36, %v2144_v30 }
 0x1f6   : > { %v2402_v45 = vmax.f32 %v2384_v16, 0.0 }
 0x1f7   : > { %v1893_v25 = vpop.f32.mrf.mxu2 }
 0x1f8   : > { %v1913_v3 = vadd.f32 %v1893_v25, %v1681_v40 }
 0x1fa   : > { %v2145_v22 = vadd.f32 %v2125_v9, %v1913_v3 }
 0x1fc   : > { %v2385_v56 = vadd.f32 %v2365_v24, %v2145_v22 }
 0x1fe   : > { %v2403_v49 = vmax.f32 %v2385_v56, 0.0 }
 0x200   : > { %v3453_v52 = vpack.c.bf16 %v2403_v49, %v2402_v45 }
 0x202   : > { %3462 = vst [vmem:[%s4179_s9 + $0x40] sm:$0xff] %v3453_v52  }
 0x203 PF: > { %s13_s14 = sadd.s32 1, %s3539_s14   ;;  %s4219_s12 = smov %s3535_s13 }
 0x204   : > { %p10_p5 = scmp.ge.s32.totalorder %s13_s14, 4   ;;  %s4220_s13 = smov %s4222_s15 }
 0x206   :  { %12 = sbr.rel (!%p10_p5) target bundleno = 2 (0x2), region = 77 }

// kernel: repvgg_forward.10
= control target key start
LH: loop header
LB: loop body
LE: loop exit
PB: predicated region body
PF: predicated region fallthrough
CT: control target
= control target key end

     0   :  { %s1860_s12 = smov 0   ;;  %s1862_s13 = smov 0   ;;  %s2197_s0 = inlined_call_operand.vmem [shape: bf16[2,1,40,128], index: 0, kind: input, shape index: {}]   ;;  %s2198_s1 = inlined_call_operand.vmem [shape: bf16[9,128,128], index: 1, kind: input, shape index: {}]   ;;  %s2199_s2 = inlined_call_operand.vmem [shape: f32[1,128], index: 2, kind: input, shape index: {}]   ;;  %s2200_s3 = inlined_call_operand.vmem [shape: bf16[2,24,128], index: 3, kind: output, shape index: {}]  }
   0x1   :  { %s1864_s14 = smov 0  }
   0x2 LB: > { %s25_s15 = sadd.s32 1, %s1834_s13  ;;  %p1269_p0 = scmp.ge.s32.totalorder %s1838_s14, 1  ;;  %s1838_s14 = sphi %s1864_s14, %s13_s14   ;;  %s1834_s13 = sphi %s1862_s13, %s2202_s13   ;;  %s1830_s12 = sphi %s1860_s12, %s2201_s12  }
   0x3   : > { %p27_p1 = scmp.ge.s32.totalorder %s25_s15, 2  ;;  %p168_p2 = scmp.lt.s32.totalorder %s1838_s14, 3 }
   0x5   : > { %s2204_s15 = smov (%p27_p1, %s25_s15), 0  ;;  %p169_p3 = pnand %p1269_p0, %p168_p2 }
   0x6   : > { %p202_p4 = scmp.lt.s32.totalorder (!%p169_p3), %s1830_s12, 1 }
   0x7   : > { %172 = sbr.rel (%p169_p3) target bundleno = 249 (0xf9), region = 32 }
   0xc   : > { %v1702_v0 = vld [vmem:[%s2198_s1 + $0x38] sm:$0xff]  ;;  %v1701_v4 = vld [vmem:[%s2198_s1 + $0x30] sm:$0xff]  ;;  %s2206_s12 = smov (!%p202_p4, %s1830_s12), 1  ;;  %v1700_v8 = vld [vmem:[%s2198_s1 + $0x28] sm:$0xff]  ;;  %vm355_vm0 = vsmask.f32 7424 }
   0xd   : > { %v1710_v1 = vld [vmem:[%s2198_s1 + $0x78] sm:$0xff]  ;;  %303 = vmatpush.bf16.msra.mxu0 %v1702_v0  ;;  %v1709_v5 = vld [vmem:[%s2198_s1 + $0x70] sm:$0xff]  ;;  %s1789_s5 = smul.u32 20, %s2206_s12  ;;  %v1708_v9 = vld [vmem:[%s2198_s1 + $0x68] sm:$0xff]  ;;  %vm463_vm1 = vcmask 1046528   ;;  %vm563_vm2 = vcmask 1044480  }
   0xe   : > { %v1718_v2 = vld [vmem:[%s2198_s1 + $0xb8] sm:$0xff]  ;;  %421 = vmatpush.bf16.msra.mxu1 %v1710_v1  ;;  %v1717_v6 = vld [vmem:[%s2198_s1 + $0xb0] sm:$0xff]  ;;  %v1716_v10 = vld [vmem:[%s2198_s1 + $0xa8] sm:$0xff]  ;;  %vm659_vm3 = vsmask.f32 4352  ;;  %vm869_vm4 = vcmask 1045504  }
   0xf   : > { %v1726_v3 = vld [vmem:[%s2198_s1 + $0xf8] sm:$0xff]  ;;  %517 = vmatpush.bf16.msra.mxu2 %v1718_v2  ;;  %v1725_v7 = vld [vmem:[%s2198_s1 + $0xf0] sm:$0xff]  ;;  %v1724_v11 = vld [vmem:[%s2198_s1 + $0xe8] sm:$0xff]  ;;  %s1920_s20 = scalar_lea.vmem %s2197_s0, %s1789_s5  ;;  %vm965_vm5 = vsmask.f32 5376  ;;  %s1790_s5 = smul.u32 12, %s2206_s12 }
  0x10   : > { %617 = vmatpush.bf16.msra.mxu3 %v1726_v3  ;;  %v1699_v12 = vld [vmem:[%s2198_s1 + $0x20] sm:$0xff]  ;;  %v1935_v16 = vld [vmem:[%s1920_s20 + $0x8] sm:$0xff]   ;;  %v1698_v18 = vld [vmem:[%s2198_s1 + $0x18] sm:$0xff] }
  0x11   : > { %304 = vmatpush.bf16.msra.mxu0 %v1701_v4  ;;  %v1707_v13 = vld [vmem:[%s2198_s1 + $0x60] sm:$0xff]  ;;  %v327_v17 = vld [vmem:[%s1920_s20 + $0xc] sm:$0x1]  ;;  %v1706_v19 = vld [vmem:[%s2198_s1 + $0x58] sm:$0xff]  ;;  %v1945_v20 = vunpack.c.l.b16 %v1935_v16  ;;  %s221_s8 = scalar_lea.vmem %s2200_s3, %s1790_s5 }
  0x12   : > { %422 = vmatpush.bf16.msra.mxu1 %v1709_v5  ;;  %v1715_v14 = vld [vmem:[%s2198_s1 + $0xa0] sm:$0xff]  ;;  %v352_v21 = vunpack.c.l.b16 %v327_v17  ;;  %v1714_v22 = vld [vmem:[%s2198_s1 + $0x98] sm:$0xff]  ;;  %v539_v27 = vld [vmem:[%s1920_s20 + $0xc] sm:$0x7] }
  0x13   : > { %518 = vmatpush.bf16.msra.mxu2 %v1717_v6  ;;  %v1723_v15 = vld [vmem:[%s2198_s1 + $0xe0] sm:$0xff]  ;;  %v1722_v23 = vld [vmem:[%s2198_s1 + $0xd8] sm:$0xff]  ;;  %v1697_v28 = vld [vmem:[%s2198_s1 + $0x10] sm:$0xff]  ;;  %v560_v37 = vunpack.c.l.b16 %v539_v27 }
  0x14   : > { %618 = vmatpush.bf16.msra.mxu3 %v1725_v7  ;;  %v1768_v24 = vld [vmem:[%s1920_s20] sm:$0xff]   ;;  %v1705_v29 = vld [vmem:[%s2198_s1 + $0x50] sm:$0xff]  ;;  %v1964_v30 = vpack.c.b16 %v352_v21, %v1945_v20  ;;  %v1696_v38 = vld [vmem:[%s2198_s1 + $0x8] sm:$0xff] }
  0x15   : > { %305 = vmatpush.bf16.msra.mxu0 %v1700_v8  ;;  %v442_v25 = vld [vmem:[%s1920_s20] sm:$0xe]  ;;  %v359_v31 = vshll.u32 %v1768_v24, 16  ;;  %v1713_v32 = vld [vmem:[%s2198_s1 + $0x90] sm:$0xff]  ;;  %v1972_v34 = vunpack.c.h.b16 %v1768_v24  ;;  %v1704_v39 = vld [vmem:[%s2198_s1 + $0x48] sm:$0xff]  ;;  %v357_v40 = vshrl.u32 %v1768_v24, 16  ;;  %v1992_v47 = vpack.c.b16 %v560_v37, %v1945_v20 }
  0x16   : > { %423 = vmatpush.bf16.msra.mxu1 %v1708_v9  ;;  %v538_v26 = vld [vmem:[%s1920_s20] sm:$0x8]  ;;  %v1721_v33 = vld [vmem:[%s2198_s1 + $0xd0] sm:$0xff]  ;;  %v461_v35 = vunpack.c.l.b16 %v442_v25  ;;  %v364_v42 = vshll.u32 %v1964_v30, 16  ;;  %v1712_v43 = vld [vmem:[%s2198_s1 + $0x88] sm:$0xff]  ;;  %v465_v55 = vrot.slane %v1964_v30, 1 }
  0x17   : > { %519 = vmatpush.bf16.msra.mxu2 %v1716_v10  ;;  %v559_v36 = vunpack.c.l.b16 %v538_v26  ;;  %v361_v41 = vrot.slane %v359_v31, 1  ;;  %v1720_v44 = vld [vmem:[%s2198_s1 + $0xc8] sm:$0xff]  ;;  %v1695_v48 = vld [vmem:[%s2198_s1] sm:$0xff]  ;;  %v565_v57 = vrot.slane %v1992_v47, 3  ;;  %v1734_v58 = vld [vmem:[%s2198_s1 + $0x138] sm:$0xff] }
  0x18   : > { %619 = vmatpush.bf16.msra.mxu3 %v1724_v11  ;;  %v462_v45 = vpack.c.b16 %v1972_v34, %v461_v35  ;;  %v1703_v49 = vld [vmem:[%s2198_s1 + $0x40] sm:$0xff]  ;;  %v2000_v51 = vrot.slane %v364_v42, 1  ;;  %v1742_v59 = vld [vmem:[%s2198_s1 + $0x178] sm:$0xff]  ;;  %v1733_v2 = vld [vmem:[%s2198_s1 + $0x130] sm:$0xff]  ;;  %v669_v42 = vshrl.u32 %v1935_v16, 16 }
  0x19   : > { %306 = vmatpush.bf16.msra.mxu0 %v1699_v12  ;;  %v1989_v46 = vpack.c.b16 %v1972_v34, %v559_v36  ;;  %v362_v50 = vor.u32 %v361_v41, %v357_v40  ;;  %v1711_v52 = vld [vmem:[%s2198_s1 + $0x80] sm:$0xff]  ;;  %v1750_v63 = vld [vmem:[%s2198_s1 + $0x1b8] sm:$0xff]  ;;  %v1741_v3 = vld [vmem:[%s2198_s1 + $0x170] sm:$0xff] }
  0x1a   : > { %424 = vmatpush.bf16.msra.mxu1 %v1707_v13  ;;  %v1719_v53 = vld [vmem:[%s2198_s1 + $0xc0] sm:$0xff]  ;;  %v464_v54 = vrot.slane %v462_v45, 1  ;;  %v1758_v1 = vld [vmem:[%s2198_s1 + $0x1f8] sm:$0xff]  ;;  %v1749_v4 = vld [vmem:[%s2198_s1 + $0x1b0] sm:$0xff] }
  0x1b   : > { %520 = vmatpush.bf16.msra.mxu2 %v1715_v14  ;;  %v564_v56 = vrot.slane %v1989_v46, 3  ;;  %v1694_v60 = vld [vmem:[%s1920_s20] sm:$0xff]  ;;  %v367_v61 = vsel %vm355_vm0, %v362_v50, %v2000_v51  ;;  %v1757_v5 = vld [vmem:[%s2198_s1 + $0x1f0] sm:$0xff]  ;;  %v1732_v6 = vld [vmem:[%s2198_s1 + $0x128] sm:$0xff]  ;;  %v661_v40 = vshrl.u32 %v1989_v46, 16  ;;  %v664_v41 = vshll.u32 %v1989_v46, 16 }
  0x1c   : > { %620 = vmatpush.bf16.msra.mxu3 %v1723_v15  ;;  %v466_v62 = vsel %vm463_vm1, %v464_v54, %v465_v55  ;;  %v1740_v7 = vld [vmem:[%s2198_s1 + $0x168] sm:$0xff]  ;;  %v1731_v11 = vld [vmem:[%s2198_s1 + $0x120] sm:$0xff]  ;;  %v944_v15 = vld [vmem:[%s1920_s20 + $0x10] sm:$0x7]  ;;  %v671_v54 = vrot.slane %v669_v42, 3 }
  0x1d   : > { %307 = vmatpush.bf16.msra.mxu0 %v1698_v18  ;;  %v566_v0 = vsel %vm563_vm2, %v564_v56, %v565_v57  ;;  %v1748_v8 = vld [vmem:[%s2198_s1 + $0x1a8] sm:$0xff]  ;;  %v1739_v12 = vld [vmem:[%s2198_s1 + $0x160] sm:$0xff]  ;;  %v368_v18 = vshrl.u32 %v1964_v30, 16  ;;  %v963_v26 = vunpack.c.l.b16 %v944_v15  ;;  %v1730_v27 = vld [vmem:[%s2198_s1 + $0x118] sm:$0xff] }
  0x1e   : > { %425 = vmatpush.bf16.msra.mxu1 %v1706_v19  ;;  %v228_v9 = vld [vmem:[%s1920_s20 + $0x8] sm:$0xf]  ;;  %v838_v13 = vld [vmem:[%s1920_s20 + $0x4] sm:$0xc]  ;;  %v657_v19 = vunpack.c.h.b16 %v1935_v16  ;;  %v841_v35 = vld [vmem:[%s1920_s20 + $0x10] sm:$0x3] }
  0x1f   : > { %521 = vmatpush.bf16.msra.mxu2 %v1714_v22  ;;  %v1756_v10 = vld [vmem:[%s2198_s1 + $0x1e8] sm:$0xff]  ;;  %v250_v17 = vunpack.c.l.b16 %v228_v9  ;;  %v1747_v21 = vld [vmem:[%s2198_s1 + $0x1a0] sm:$0xff]  ;;  %v863_v25 = vunpack.c.l.b16 %v838_v13  ;;  %v370_v31 = vor.u32 %v368_v18, %v2000_v51  ;;  %v1745_v45 = vld [vmem:[%s2198_s1 + $0x190] sm:$0xff] }
  0x20   : > { %621 = vmatpush.bf16.msra.mxu3 %v1722_v23  ;;  %v2064_v14 = vld [vmem:[%s1920_s20 + $0x8] sm:$0xff]   ;;  %v1755_v22 = vld [vmem:[%s2198_s1 + $0x1e0] sm:$0xff]  ;;  %v1753_v30 = vld [vmem:[%s2198_s1 + $0x1d0] sm:$0xff]  ;;  %v766_v18 = vpack.c.b16 %v657_v19, %v657_v19 }
  0x21   : > { %308 = vmatpush.bf16.msra.mxu0 %v1697_v28  ;;  %v1773_v23 = vunpack.c.l.b16 %v2064_v14  ;;  %v1774_v24 = vunpack.c.h.b16 %v2064_v14  ;;  %v1738_v28 = vld [vmem:[%s2198_s1 + $0x158] sm:$0xff]  ;;  %v1728_v50 = vld [vmem:[%s2198_s1 + $0x108] sm:$0xff]  ;;  %v1765_v15 = vld [vmem:[%s2198_s1 + $0x230] sm:$0xff] }
  0x22   : > { %426 = vmatpush.bf16.msra.mxu1 %v1705_v29  ;;  %v252_v29 = vpack.c.b16 %v250_v17, %v250_v17  ;;  %v1736_v51 = vld [vmem:[%s2198_s1 + $0x148] sm:$0xff]  ;;  %v1762_v17 = vld [vmem:[%s2198_s1 + $0x218] sm:$0xff] }
  0x23   : > { %522 = vmatpush.bf16.msra.mxu2 %v1713_v32  ;;  %v1746_v32 = vld [vmem:[%s2198_s1 + $0x198] sm:$0xff]  ;;  %v2093_v36 = vpack.c.b16 %v1773_v23, %v863_v25  ;;  %v2095_v37 = vpack.c.b16 %v963_v26, %v1774_v24  ;;  %v1759_v25 = vld [vmem:[%s2198_s1 + $0x200] sm:$0xff] }
  0x24   : > { %622 = vmatpush.bf16.msra.mxu3 %v1721_v33  ;;  %v1754_v33 = vld [vmem:[%s2198_s1 + $0x1d8] sm:$0xff] }
  0x25   : > { %309 = vmatpush.bf16.msra.mxu0 %v1696_v38  ;;  %v1729_v38 = vld [vmem:[%s2198_s1 + $0x110] sm:$0xff]  ;;  %v967_v47 = vshrl.u32 %v2093_v36, 16  ;;  %v975_v46 = vshrl.u32 %v2095_v37, 16 }
  0x26   : > { %427 = vmatpush.bf16.msra.mxu1 %v1704_v39  ;;  %v1737_v39 = vld [vmem:[%s2198_s1 + $0x150] sm:$0xff] }
  0x27   : > { %523 = vmatpush.bf16.msra.mxu2 %v1712_v43  ;;  %v672_v43 = vshll.u32 %v1935_v16, 16  ;;  %v1760_v16 = vld [vmem:[%s2198_s1 + $0x208] sm:$0xff] }
  0x28   : > { %623 = vmatpush.bf16.msra.mxu3 %v1720_v44  ;;  %v866_v44 = vunpack.c.l.b16 %v841_v35 }
  0x29   : > { %310 = vmatpush.bf16.msra.mxu0 %v1695_v48  ;;  %v970_v48 = vshll.u32 %v2093_v36, 16 }
  0x2a   : > { %428 = vmatpush.bf16.msra.mxu1 %v1703_v49  ;;  %v978_v49 = vshll.u32 %v2095_v37, 16  ;;  %v868_v56 = vpack.c.b16 %v866_v44, %v1774_v24 }
  0x2b   : > { %524 = vmatpush.bf16.msra.mxu2 %v1711_v52  ;;  %v663_v52 = vrot.slane %v661_v40, 3 }
  0x2c   : > { %624 = vmatpush.bf16.msra.mxu3 %v1719_v53  ;;  %311 = vmatmul.bf16.vlgmr.msra.gmra.mxu0 %v1694_v60  ;;  %v666_v53 = vrot.slane %v664_v41, 4  ;;  %v972_v60 = vrot.slane %v970_v48, 3 }
  0x2d   : > { %727 = vmatpush.bf16.msrb.mxu0 %v1734_v58  ;;  %429 = vmatmul.bf16.vlgmr.msra.gmra.mxu1 %v367_v61  ;;  %v1752_v58 = vld [vmem:[%s2198_s1 + $0x1c8] sm:$0xff]  ;;  %v977_v61 = vrot.slane %v975_v46, 2 }
  0x2e   : > { %817 = vmatpush.bf16.msrb.mxu1 %v1742_v59  ;;  %525 = vmatmul.bf16.vlgmr.msra.gmra.mxu2 %v466_v62  ;;  %v969_v59 = vrot.slane %v967_v47, 2  ;;  %v980_v62 = vrot.slane %v978_v49, 3  ;;  %v1815_v47 = vld [vmem:[%s2199_s2] ss:$0 sm:$0xff] }
  0x2f   : > { %625 = vmatmul.bf16.vlgmr.msra.gmra.mxu3 %v566_v0  ;;  %923 = vmatpush.bf16.msrb.mxu2 %v1750_v63  ;;  %v1727_v63 = vld [vmem:[%s2198_s1 + $0x100] sm:$0xff] }
  0x30   : > { %1033 = vmatpush.bf16.msrb.mxu3 %v1758_v1  ;;  %v1735_v0 = vld [vmem:[%s2198_s1 + $0x140] sm:$0xff]  ;;  %v1766_v1 = vld [vmem:[%s2198_s1 + $0x238] sm:$0xff]  ;;  %v981_v9 = vor.u32 %v980_v62, %v977_v61 }
  0x31   : > { %728 = vmatpush.bf16.msrb.mxu0 %v1733_v2  ;;  %v667_v2 = vor.u32 %v666_v53, %v663_v52 }
  0x32   : > { %818 = vmatpush.bf16.msrb.mxu1 %v1741_v3 }
  0x33   : > { %924 = vmatpush.bf16.msrb.mxu2 %v1749_v4  ;;  %v1743_v4 = vld [vmem:[%s2198_s1 + $0x180] sm:$0xff] }
  0x34   : > { %1034 = vmatpush.bf16.msrb.mxu3 %v1757_v5  ;;  %v1751_v5 = vld [vmem:[%s2198_s1 + $0x1c0] sm:$0xff] }
  0x35   : > { %729 = vmatpush.bf16.msrb.mxu0 %v1732_v6  ;;  %v870_v6 = vrot.slane %v2093_v36, 2 }
  0x36   : > { %819 = vmatpush.bf16.msrb.mxu1 %v1740_v7  ;;  %v871_v7 = vrot.slane %v868_v56, 2 }
  0x37   : > { %925 = vmatpush.bf16.msrb.mxu2 %v1748_v8  ;;  %v973_v8 = vor.u32 %v972_v60, %v969_v59 }
  0x38   : > { %1035 = vmatpush.bf16.msrb.mxu3 %v1756_v10  ;;  %v765_v10 = vpack.c.b16 %v1945_v20, %v1972_v34  ;;  %v1764_v20 = vld [vmem:[%s2198_s1 + $0x228] sm:$0xff]  ;;  %v1763_v34 = vld [vmem:[%s2198_s1 + $0x220] sm:$0xff] }
  0x39   : > { %730 = vmatpush.bf16.msrb.mxu0 %v1731_v11  ;;  %v982_v13 = vsel %vm965_vm5, %v973_v8, %v981_v9 }
  0x3a   : > { %820 = vmatpush.bf16.msrb.mxu1 %v1739_v12  ;;  %v872_v12 = vsel %vm869_vm4, %v870_v6, %v871_v7 }
  0x3b   : > { %926 = vmatpush.bf16.msrb.mxu2 %v1747_v21  ;;  %v1761_v21 = vld [vmem:[%s2198_s1 + $0x210] sm:$0xff] }
  0x3c   : > { %1036 = vmatpush.bf16.msrb.mxu3 %v1755_v22  ;;  %316 = vmatmul.bf16.gmra.mxu0 %v252_v29  ;;  %v1054_v22 = vld [vmem:[%s1920_s20 + $0x4] sm:$0x8] }
  0x3d   : > { %731 = vmatpush.bf16.msrb.mxu0 %v1730_v27  ;;  %434 = vmatmul.bf16.gmra.mxu1 %v370_v31  ;;  %v1073_v24 = vunpack.c.l.b16 %v1054_v22  ;;  %v1076_v27 = vrot.slane %v2095_v37, 3 }
  0x3e   : > { %821 = vmatpush.bf16.msrb.mxu1 %v1738_v28  ;;  %530 = vmatmul.bf16.gmra.mxu2 %v465_v55  ;;  %v674_v55 = vrot.slane %v672_v43, 4 }
  0x3f   : > { %630 = vmatmul.bf16.gmra.mxu3 %v565_v57  ;;  %927 = vmatpush.bf16.msrb.mxu2 %v1746_v32  ;;  %v1744_v57 = vld [vmem:[%s2198_s1 + $0x188] sm:$0xff]  ;;  %v1074_v19 = vpack.c.b16 %v1773_v23, %v1073_v24 }
  0x40   : > { %1037 = vmatpush.bf16.msrb.mxu3 %v1754_v33  ;;  %v675_v3 = vor.u32 %v674_v55, %v671_v54 }
  0x41   : > { %732 = vmatpush.bf16.msrb.mxu0 %v1729_v38  ;;  %v1075_v26 = vrot.slane %v1074_v19, 3 }
  0x42   : > { %822 = vmatpush.bf16.msrb.mxu1 %v1737_v39  ;;  %v676_v11 = vsel %vm659_vm3, %v667_v2, %v675_v3 }
  0x43   : > { %928 = vmatpush.bf16.msrb.mxu2 %v1745_v45  ;;  %v1077_v28 = vsel %vm563_vm2, %v1075_v26, %v1076_v27 }
  0x44   : > { %1038 = vmatpush.bf16.msrb.mxu3 %v1753_v30 }
  0x45   : > { %733 = vmatpush.bf16.msrb.mxu0 %v1728_v50 }
  0x46   : > { %823 = vmatpush.bf16.msrb.mxu1 %v1736_v51 }
  0x47   : > { %929 = vmatpush.bf16.msrb.mxu2 %v1744_v57 }
  0x48   : > { %1039 = vmatpush.bf16.msrb.mxu3 %v1752_v58 }
  0x49   : > { %734 = vmatpush.bf16.msrb.mxu0 %v1727_v63 }
  0x4a   : > { %824 = vmatpush.bf16.msrb.mxu1 %v1735_v0 }
  0x4b   : > { %930 = vmatpush.bf16.msrb.mxu2 %v1743_v4 }
  0x4c   : > { %1040 = vmatpush.bf16.msrb.mxu3 %v1751_v5  ;;  %735 = vmatmul.bf16.vlgmr.msrb.gmra.mxu0 %v676_v11 }
  0x4d   : > { %1128 = vmatpush.bf16.msra.mxu0 %v1766_v1  ;;  %825 = vmatmul.bf16.vlgmr.msrb.gmra.mxu1 %v765_v10 }
  0x4e   : > { %1781 = vmatpush.bf16.msra.mxu1 %v1766_v1  ;;  %931 = vmatmul.bf16.vlgmr.msrb.gmra.mxu2 %v872_v12 }
  0x4f   : > { %1041 = vmatmul.bf16.vlgmr.msrb.gmra.mxu3 %v982_v13 }
  0x51   : > { %1129 = vmatpush.bf16.msra.mxu0 %v1765_v15 }
  0x52   : > { %1782 = vmatpush.bf16.msra.mxu1 %v1765_v15 }
  0x55   : > { %1130 = vmatpush.bf16.msra.mxu0 %v1764_v20 }
  0x56   : > { %1783 = vmatpush.bf16.msra.mxu1 %v1764_v20 }
  0x59   : > { %1131 = vmatpush.bf16.msra.mxu0 %v1763_v34 }
  0x5a   : > { %1784 = vmatpush.bf16.msra.mxu1 %v1763_v34 }
  0x5c   : > { %740 = vmatmul.bf16.gmra.mxu0 %v675_v3 }
  0x5d   : > { %1132 = vmatpush.bf16.msra.mxu0 %v1762_v17  ;;  %830 = vmatmul.bf16.gmra.mxu1 %v766_v18 }
  0x5e   : > { %1785 = vmatpush.bf16.msra.mxu1 %v1762_v17  ;;  %936 = vmatmul.bf16.gmra.mxu2 %v871_v7 }
  0x5f   : > { %1046 = vmatmul.bf16.gmra.mxu3 %v981_v9 }
  0x61   : > { %1133 = vmatpush.bf16.msra.mxu0 %v1761_v21 }
  0x62   : > { %1786 = vmatpush.bf16.msra.mxu1 %v1761_v21 }
  0x65   : > { %1134 = vmatpush.bf16.msra.mxu0 %v1760_v16 }
  0x66   : > { %1787 = vmatpush.bf16.msra.mxu1 %v1760_v16 }
  0x69   : > { %1135 = vmatpush.bf16.msra.mxu0 %v1759_v25 }
  0x6a   : > { %1788 = vmatpush.bf16.msra.mxu1 %v1759_v25 }
  0x6c   : > { %1136 = vmatmul.bf16.vlgmr.msra.gmra.mxu0 %v1077_v28 }
  0x6d   : > { %1141 = vmatmul.bf16.vlgmr.msra.gmra.mxu1 %v1076_v27 }
  0xa9   : > { %v312_v29 = vpop.f32.mrf.mxu0 }
  0xaa   : > { %v430_v31 = vpop.f32.mrf.mxu1  ;;  %v321_v53 = vadd.f32 %v1815_v47, %v312_v29 }
  0xac   : > { %v439_v60 = vadd.f32 %v430_v31, %v321_v53 }
  0xb1   : > { %v526_v32 = vpop.f32.mrf.mxu2  ;;  %v314_v23 = vpop.f32.mrf.mxu0 }
  0xb2   : > { %v626_v14 = vpop.f32.mrf.mxu3  ;;  %v432_v33 = vpop.f32.mrf.mxu1  ;;  %v322_v59 = vadd.f32 %v1815_v47, %v314_v23  ;;  %v535_v62 = vadd.f32 %v526_v32, %v439_v60 }
  0xb4   : > { %v440_v63 = vadd.f32 %v432_v33, %v322_v59  ;;  %v635_v6 = vadd.f32 %v626_v14, %v535_v62 }
  0xb9   : > { %v528_v35 = vpop.f32.mrf.mxu2  ;;  %v317_v38 = vpop.f32.mrf.mxu0 }
  0xba   : > { %v628_v36 = vpop.f32.mrf.mxu3  ;;  %v435_v39 = vpop.f32.mrf.mxu1  ;;  %v323_v51 = vadd.f32 %v1815_v47, %v317_v38  ;;  %v536_v1 = vadd.f32 %v528_v35, %v440_v63 }
  0xbc   : > { %v441_v52 = vadd.f32 %v435_v39, %v323_v51  ;;  %v636_v8 = vadd.f32 %v628_v36, %v536_v1 }
  0xc1   : > { %v531_v40 = vpop.f32.mrf.mxu2  ;;  %v319_v42 = vpop.f32.mrf.mxu0 }
  0xc2   : > { %v631_v41 = vpop.f32.mrf.mxu3  ;;  %v437_v37 = vpop.f32.mrf.mxu1  ;;  %v537_v54 = vadd.f32 %v531_v40, %v441_v52 }
  0xc4   : > { %v637_v61 = vadd.f32 %v631_v41, %v537_v54 }
  0xc9   : > { %v533_v43 = vpop.f32.mrf.mxu2  ;;  %v736_v45 = vpop.f32.mrf.mxu0 }
  0xca   : > { %v633_v44 = vpop.f32.mrf.mxu3  ;;  %v826_v30 = vpop.f32.mrf.mxu1  ;;  %v745_v9 = vadd.f32 %v736_v45, %v635_v6 }
  0xcc   : > { %v835_v12 = vadd.f32 %v826_v30, %v745_v9 }
  0xd1   : > { %v932_v48 = vpop.f32.mrf.mxu2  ;;  %v738_v49 = vpop.f32.mrf.mxu0 }
  0xd2   : > { %v1042_v46 = vpop.f32.mrf.mxu3  ;;  %v828_v50 = vpop.f32.mrf.mxu1  ;;  %v746_v11 = vadd.f32 %v738_v49, %v636_v8  ;;  %v941_v18 = vadd.f32 %v932_v48, %v835_v12 }
  0xd4   : > { %v836_v21 = vadd.f32 %v828_v50, %v746_v11  ;;  %v1051_v19 = vadd.f32 %v1042_v46, %v941_v18 }
  0xd9   : > { %v934_v55 = vpop.f32.mrf.mxu2  ;;  %v741_v57 = vpop.f32.mrf.mxu0 }
  0xda   : > { %v1044_v56 = vpop.f32.mrf.mxu3  ;;  %v831_v58 = vpop.f32.mrf.mxu1  ;;  %v747_v0 = vadd.f32 %v741_v57, %v637_v61  ;;  %v942_v24 = vadd.f32 %v934_v55, %v836_v21 }
  0xdc   : > { %v837_v7 = vadd.f32 %v831_v58, %v747_v0  ;;  %v1052_v26 = vadd.f32 %v1044_v56, %v942_v24 }
  0xe1   : > { %v937_v2 = vpop.f32.mrf.mxu2  ;;  %v743_v4 = vpop.f32.mrf.mxu0 }
  0xe2   : > { %v1047_v3 = vpop.f32.mrf.mxu3  ;;  %v833_v5 = vpop.f32.mrf.mxu1  ;;  %v943_v10 = vadd.f32 %v937_v2, %v837_v7 }
  0xe4   : > { %v1053_v13 = vadd.f32 %v1047_v3, %v943_v10 }
  0xe9   : > { %v939_v15 = vpop.f32.mrf.mxu2  ;;  %v1137_v34 = vpop.f32.mrf.mxu0 }
  0xea   : > { %v1049_v20 = vpop.f32.mrf.mxu3  ;;  %v1142_v17 = vpop.f32.mrf.mxu1  ;;  %v1146_v27 = vadd.f32 %v1137_v34, %v1051_v19 }
  0xeb   : > { %v1148_v22 = vadd.f32 %v1142_v17, %v1053_v13 }
  0xec   : > { %v1149_v32 = vmax.f32 %v1146_v27, 0.0 }
  0xed   : > { %v1151_v16 = vmax.f32 %v1148_v22, 0.0 }
  0xef   : > { %v1154_v25 = vpack.c.bf16 %v1151_v16, %v1151_v16 }
  0xf1   : > { %1157 = vst [vmem:[%s221_s8 + $0x8] sm:$0xf] %v1154_v25  ;;  %v1139_v28 = vpop.f32.mrf.mxu0 }
  0xf2   : > { %v1144_v29 = vpop.f32.mrf.mxu1  ;;  %v1147_v31 = vadd.f32 %v1139_v28, %v1052_v26 }
  0xf4   : > { %v1150_v14 = vmax.f32 %v1147_v31, 0.0 }
  0xf6   : > { %v1778_v23 = vpack.c.bf16 %v1150_v14, %v1149_v32 }
  0xf8   : > { %1779 = vst [vmem:[%s221_s8] sm:$0xff] %v1778_v23  }
  0xf9 PF: > { %s13_s14 = sadd.s32 1, %s1838_s14   ;;  %s2201_s12 = smov %s1834_s13 }
  0xfa   : > { %p10_p5 = scmp.ge.s32.totalorder %s13_s14, 4   ;;  %s2202_s13 = smov %s2204_s15 }
  0xfc   :  { %12 = sbr.rel (!%p10_p5) target bundleno = 2 (0x2), region = 76 }

// kernel: repvgg_forward.11
= control target key start
LH: loop header
LB: loop body
LE: loop exit
PB: predicated region body
PF: predicated region fallthrough
CT: control target
= control target key end

     0   :  { %s1817_s12 = smov 0   ;;  %s1819_s13 = smov 0   ;;  %s2112_s0 = inlined_call_operand.vmem [shape: bf16[2,2,24,128], index: 0, kind: input, shape index: {}]   ;;  %s2113_s1 = inlined_call_operand.vmem [shape: bf16[9,128,128], index: 1, kind: input, shape index: {}]   ;;  %s2114_s2 = inlined_call_operand.vmem [shape: f32[1,128], index: 2, kind: input, shape index: {}]   ;;  %s2115_s3 = inlined_call_operand.vmem [shape: bf16[2,16,128], index: 3, kind: output, shape index: {}]  }
   0x1   :  { %s1821_s14 = smov 0  }
   0x2 LB: > { %s25_s15 = sadd.s32 1, %s1791_s13  ;;  %p1226_p0 = scmp.ge.s32.totalorder %s1795_s14, 1  ;;  %s1795_s14 = sphi %s1821_s14, %s13_s14   ;;  %s1791_s13 = sphi %s1819_s13, %s2117_s13   ;;  %s1787_s12 = sphi %s1817_s12, %s2116_s12  }
   0x3   : > { %p27_p1 = scmp.ge.s32.totalorder %s25_s15, 2  ;;  %p168_p2 = scmp.lt.s32.totalorder %s1795_s14, 3 }
   0x5   : > { %s2119_s15 = smov (%p27_p1, %s25_s15), 0  ;;  %p169_p3 = pnand %p1226_p0, %p168_p2 }
   0x6   : > { %p202_p4 = scmp.lt.s32.totalorder (!%p169_p3), %s1787_s12, 1 }
   0x7   : > { %172 = sbr.rel (%p169_p3) target bundleno = 249 (0xf9), region = 32 }
   0xc   : > { %v1672_v0 = vld [vmem:[%s2113_s1 + $0x38] sm:$0xff]  ;;  %v1671_v4 = vld [vmem:[%s2113_s1 + $0x30] sm:$0xff]  ;;  %s2121_s12 = smov (!%p202_p4, %s1787_s12), 1  ;;  %v1670_v8 = vld [vmem:[%s2113_s1 + $0x28] sm:$0xff]  ;;  %vm432_vm0 = vsmask.f32 7424 }
   0xd   : > { %v1689_v1 = vld [vmem:[%s2113_s1 + $0xb8] sm:$0xff]  ;;  %298 = vmatpush.bf16.msra.mxu0 %v1672_v0  ;;  %v1688_v5 = vld [vmem:[%s2113_s1 + $0xb0] sm:$0xff]  ;;  %v1687_v9 = vld [vmem:[%s2113_s1 + $0xa8] sm:$0xff]  ;;  %s1747_s17 = smul.u32 24, %s2121_s12  ;;  %vm535_vm1 = vsmask.f32 6400 }
   0xe   : > { %v1681_v2 = vld [vmem:[%s2113_s1 + $0x78] sm:$0xff]  ;;  %494 = vmatpush.bf16.msra.mxu2 %v1689_v1  ;;  %v1680_v6 = vld [vmem:[%s2113_s1 + $0x70] sm:$0xff]  ;;  %v1679_v10 = vld [vmem:[%s2113_s1 + $0x68] sm:$0xff]  ;;  %vm843_vm2 = vcmask 1044480   ;;  %vm749_vm3 = vcmask 1045504   ;;  %s1663_s5 = sshll.u32 %s2121_s12, 3 }
   0xf   : > { %v1697_v3 = vld [vmem:[%s2113_s1 + $0xf8] sm:$0xff]  ;;  %388 = vmatpush.bf16.msra.mxu1 %v1681_v2  ;;  %v1696_v7 = vld [vmem:[%s2113_s1 + $0xf0] sm:$0xff]  ;;  %v1695_v11 = vld [vmem:[%s2113_s1 + $0xe8] sm:$0xff]  ;;  %s1889_s28 = scalar_lea.vmem %s2112_s0, %s1747_s17  ;;  %vm1026_vm4 = vsmask.f32 4352  ;;  %s221_s8 = scalar_lea.vmem %s2115_s3, %s1663_s5 }
  0x10   : > { %602 = vmatpush.bf16.msra.mxu3 %v1697_v3  ;;  %v1669_v12 = vld [vmem:[%s2113_s1 + $0x20] sm:$0xff]  ;;  %v1668_v16 = vld [vmem:[%s2113_s1 + $0x18] sm:$0xff]  ;;  %v406_v21 = vld [vmem:[%s1889_s28 + $0x8] sm:$0x1] }
  0x11   : > { %299 = vmatpush.bf16.msra.mxu0 %v1671_v4  ;;  %v1686_v13 = vld [vmem:[%s2113_s1 + $0xa0] sm:$0xff]  ;;  %v1685_v17 = vld [vmem:[%s2113_s1 + $0x98] sm:$0xff]  ;;  %v1667_v22 = vld [vmem:[%s2113_s1 + $0x10] sm:$0xff]  ;;  %v429_v24 = vunpack.c.l.b16 %v406_v21 }
  0x12   : > { %495 = vmatpush.bf16.msra.mxu2 %v1688_v5  ;;  %v1678_v14 = vld [vmem:[%s2113_s1 + $0x60] sm:$0xff]  ;;  %v1677_v18 = vld [vmem:[%s2113_s1 + $0x58] sm:$0xff]  ;;  %v1684_v25 = vld [vmem:[%s2113_s1 + $0x90] sm:$0xff] }
  0x13   : > { %389 = vmatpush.bf16.msra.mxu1 %v1680_v6  ;;  %v1694_v15 = vld [vmem:[%s2113_s1 + $0xe0] sm:$0xff]  ;;  %v1693_v19 = vld [vmem:[%s2113_s1 + $0xd8] sm:$0xff]  ;;  %v511_v28 = vld [vmem:[%s1889_s28 + $0x8] sm:$0x3]  ;;  %v431_v31 = vpack.c.b16 %v429_v24, %v429_v24 }
  0x14   : > { %603 = vmatpush.bf16.msra.mxu3 %v1696_v7  ;;  %v1739_v20 = vld [vmem:[%s1889_s28] sm:$0xff]   ;;  %v1676_v29 = vld [vmem:[%s2113_s1 + $0x50] sm:$0xff]  ;;  %v532_v33 = vunpack.c.l.b16 %v511_v28  ;;  %v1666_v36 = vld [vmem:[%s2113_s1 + $0x8] sm:$0xff] }
  0x15   : > { %300 = vmatpush.bf16.msra.mxu0 %v1670_v8  ;;  %v1908_v23 = vunpack.c.h.b16 %v1739_v20  ;;  %v436_v26 = vshll.u32 %v1739_v20, 16  ;;  %v510_v27 = vld [vmem:[%s1889_s28] sm:$0xe]  ;;  %v1692_v30 = vld [vmem:[%s2113_s1 + $0xd0] sm:$0xff]  ;;  %v1683_v37 = vld [vmem:[%s2113_s1 + $0x88] sm:$0xff]  ;;  %v434_v38 = vshrl.u32 %v1739_v20, 16 }
  0x16   : > { %496 = vmatpush.bf16.msra.mxu2 %v1687_v9  ;;  %v531_v32 = vunpack.c.l.b16 %v510_v27  ;;  %v1922_v35 = vpack.c.b16 %v532_v33, %v532_v33  ;;  %v1675_v40 = vld [vmem:[%s2113_s1 + $0x48] sm:$0xff]  ;;  %v441_v42 = vshll.u32 %v431_v31, 16  ;;  %v1665_v50 = vld [vmem:[%s2113_s1] sm:$0xff]  ;;  %v1705_v53 = vld [vmem:[%s2113_s1 + $0x138] sm:$0xff] }
  0x17   : > { %390 = vmatpush.bf16.msra.mxu1 %v1679_v10  ;;  %v438_v39 = vrot.slane %v436_v26, 1  ;;  %v1691_v41 = vld [vmem:[%s2113_s1 + $0xc8] sm:$0xff]  ;;  %v1682_v51 = vld [vmem:[%s2113_s1 + $0x80] sm:$0xff]  ;;  %v1721_v54 = vld [vmem:[%s2113_s1 + $0x1b8] sm:$0xff] }
  0x18   : > { %604 = vmatpush.bf16.msra.mxu3 %v1695_v11  ;;  %v533_v34 = vpack.c.b16 %v1908_v23, %v531_v32  ;;  %v545_v45 = vshrl.u32 %v1922_v35, 16  ;;  %v548_v46 = vshll.u32 %v1922_v35, 16  ;;  %v443_v56 = vrot.slane %v441_v42, 1  ;;  %v1674_v57 = vld [vmem:[%s2113_s1 + $0x40] sm:$0xff]  ;;  %v1713_v59 = vld [vmem:[%s2113_s1 + $0x178] sm:$0xff]  ;;  %v1704_v0 = vld [vmem:[%s2113_s1 + $0x130] sm:$0xff] }
  0x19   : > { %301 = vmatpush.bf16.msra.mxu0 %v1669_v12  ;;  %v439_v55 = vor.u32 %v438_v39, %v434_v38  ;;  %v1690_v58 = vld [vmem:[%s2113_s1 + $0xc0] sm:$0xff]  ;;  %v1729_v60 = vld [vmem:[%s2113_s1 + $0x1f8] sm:$0xff]  ;;  %v1720_v1 = vld [vmem:[%s2113_s1 + $0x1b0] sm:$0xff] }
  0x1a   : > { %497 = vmatpush.bf16.msra.mxu2 %v1686_v13  ;;  %v537_v43 = vshrl.u32 %v533_v34, 16  ;;  %v540_v44 = vshll.u32 %v533_v34, 16  ;;  %v547_v49 = vrot.slane %v545_v45, 1  ;;  %v550_v52 = vrot.slane %v548_v46, 2  ;;  %v1664_v63 = vld [vmem:[%s1889_s28] sm:$0xff]  ;;  %v1673_v3 = vld [vmem:[%s1889_s28 + $0xc] sm:$0xff] }
  0x1b   : > { %391 = vmatpush.bf16.msra.mxu1 %v1678_v14  ;;  %v444_v2 = vsel %vm432_vm0, %v439_v55, %v443_v56  ;;  %v1712_v4 = vld [vmem:[%s2113_s1 + $0x170] sm:$0xff]  ;;  %v1703_v7 = vld [vmem:[%s2113_s1 + $0x128] sm:$0xff]  ;;  %v1726_v20 = vld [vmem:[%s2113_s1 + $0x1e0] sm:$0xff] }
  0x1c   : > { %605 = vmatpush.bf16.msra.mxu3 %v1694_v15  ;;  %v539_v47 = vrot.slane %v537_v43, 1  ;;  %v542_v48 = vrot.slane %v540_v44, 2  ;;  %v551_v62 = vor.u32 %v550_v52, %v547_v49  ;;  %v1728_v5 = vld [vmem:[%s2113_s1 + $0x1f0] sm:$0xff]  ;;  %v1719_v8 = vld [vmem:[%s2113_s1 + $0x1a8] sm:$0xff]  ;;  %v1717_v24 = vld [vmem:[%s2113_s1 + $0x198] sm:$0xff] }
  0x1d   : > { %302 = vmatpush.bf16.msra.mxu0 %v1668_v16  ;;  %v1416_v9 = vld [vmem:[%s1889_s28 + $0xc] sm:$0xe]  ;;  %v1985_v10 = vld [vmem:[%s1889_s28 + $0x10] sm:$0xf]  ;;  %v1418_v11 = vld [vmem:[%s1889_s28 + $0x14] sm:$0x3] }
  0x1e   : > { %498 = vmatpush.bf16.msra.mxu2 %v1685_v17  ;;  %v543_v61 = vor.u32 %v542_v48, %v539_v47  ;;  %v1711_v12 = vld [vmem:[%s2113_s1 + $0x168] sm:$0xff]  ;;  %v641_v14 = vunpack.c.l.b16 %v1416_v9  ;;  %v642_v15 = vunpack.c.l.b16 %v1985_v10  ;;  %v1702_v16 = vld [vmem:[%s2113_s1 + $0x120] sm:$0xff]  ;;  %v1709_v28 = vld [vmem:[%s2113_s1 + $0x158] sm:$0xff] }
  0x1f   : > { %392 = vmatpush.bf16.msra.mxu1 %v1677_v18  ;;  %v1727_v13 = vld [vmem:[%s2113_s1 + $0x1e8] sm:$0xff]  ;;  %v1718_v17 = vld [vmem:[%s2113_s1 + $0x1a0] sm:$0xff]  ;;  %v643_v18 = vunpack.c.l.b16 %v1418_v11  ;;  %v1564_v34 = vld [vmem:[%s1889_s28 + $0x14] sm:$0x7] }
  0x20   : > { %606 = vmatpush.bf16.msra.mxu3 %v1693_v19  ;;  %v552_v6 = vsel %vm535_vm1, %v543_v61, %v551_v62  ;;  %v1710_v19 = vld [vmem:[%s2113_s1 + $0x160] sm:$0xff]  ;;  %v644_v21 = vpack.c.b16 %v642_v15, %v641_v14  ;;  %v819_v27 = vld [vmem:[%s1889_s28 + $0x8] sm:$0x7]  ;;  %v1563_v33 = vld [vmem:[%s1889_s28 + $0xc] sm:$0x8]  ;;  %v934_v46 = vunpack.c.l.b16 %v1564_v34 }
  0x21   : > { %303 = vmatpush.bf16.msra.mxu0 %v1667_v22  ;;  %v1701_v22 = vld [vmem:[%s2113_s1 + $0x118] sm:$0xff]  ;;  %v818_v26 = vld [vmem:[%s1889_s28] sm:$0x8]  ;;  %v1708_v42 = vld [vmem:[%s2113_s1 + $0x150] sm:$0xff]  ;;  %v933_v45 = vunpack.c.l.b16 %v1563_v33 }
  0x22   : > { %499 = vmatpush.bf16.msra.mxu2 %v1684_v25  ;;  %v645_v25 = vpack.c.b16 %v643_v18, %v643_v18  ;;  %v647_v31 = vshrl.u32 %v644_v21, 16  ;;  %v839_v32 = vunpack.c.l.b16 %v818_v26  ;;  %v650_v38 = vshll.u32 %v644_v21, 16  ;;  %v1724_v43 = vld [vmem:[%s2113_s1 + $0x1d0] sm:$0xff]  ;;  %v1699_v49 = vld [vmem:[%s2113_s1 + $0x108] sm:$0xff]  ;;  %v1714_v61 = vld [vmem:[%s2113_s1 + $0x180] sm:$0xff] }
  0x23   : > { %393 = vmatpush.bf16.msra.mxu1 %v1676_v29  ;;  %v1725_v29 = vld [vmem:[%s2113_s1 + $0x1d8] sm:$0xff]  ;;  %v1707_v55 = vld [vmem:[%s2113_s1 + $0x148] sm:$0xff]  ;;  %v1734_v14 = vld [vmem:[%s2113_s1 + $0x220] sm:$0xff] }
  0x24   : > { %607 = vmatpush.bf16.msra.mxu3 %v1692_v30  ;;  %v728_v30 = vld [vmem:[%s1889_s28] sm:$0xc]  ;;  %v655_v39 = vshrl.u32 %v645_v25, 16  ;;  %v649_v47 = vrot.slane %v647_v31, 1  ;;  %v2037_v48 = vpack.c.b16 %v1908_v23, %v839_v32  ;;  %v1723_v56 = vld [vmem:[%s2113_s1 + $0x1c8] sm:$0xff]  ;;  %v1732_v18 = vld [vmem:[%s2113_s1 + $0x210] sm:$0xff] }
  0x25   : > { %304 = vmatpush.bf16.msra.mxu0 %v1666_v36  ;;  %v1700_v36 = vld [vmem:[%s2113_s1 + $0x110] sm:$0xff]  ;;  %v747_v44 = vunpack.c.l.b16 %v728_v30 }
  0x26   : > { %500 = vmatpush.bf16.msra.mxu2 %v1683_v37  ;;  %v1716_v37 = vld [vmem:[%s2113_s1 + $0x190] sm:$0xff]  ;;  %v657_v52 = vrot.slane %v655_v39, 1 }
  0x27   : > { %394 = vmatpush.bf16.msra.mxu1 %v1675_v40  ;;  %v658_v40 = vshll.u32 %v645_v25, 16 }
  0x28   : > { %608 = vmatpush.bf16.msra.mxu3 %v1691_v41  ;;  %v840_v41 = vunpack.c.l.b16 %v819_v27 }
  0x29   : > { %305 = vmatpush.bf16.msra.mxu0 %v1665_v50  ;;  %v1715_v50 = vld [vmem:[%s2113_s1 + $0x188] sm:$0xff] }
  0x2a   : > { %501 = vmatpush.bf16.msra.mxu2 %v1682_v51  ;;  %v652_v51 = vrot.slane %v650_v38, 2  ;;  %v1772_v38 = vld [vmem:[%s2114_s2] ss:$0 sm:$0xff] }
  0x2b   : > { %395 = vmatpush.bf16.msra.mxu1 %v1674_v57  ;;  %v748_v57 = vpack.c.b16 %v1908_v23, %v747_v44  ;;  %v1737_v23 = vld [vmem:[%s2113_s1 + $0x238] sm:$0xff] }
  0x2c   : > { %609 = vmatpush.bf16.msra.mxu3 %v1690_v58  ;;  %306 = vmatmul.bf16.vlgmr.msra.gmra.mxu0 %v1664_v63  ;;  %v935_v58 = vpack.c.b16 %v642_v15, %v933_v45  ;;  %v653_v62 = vor.u32 %v652_v51, %v649_v47 }
  0x2d   : > { %712 = vmatpush.bf16.msrb.mxu0 %v1705_v53  ;;  %502 = vmatmul.bf16.vlgmr.msra.gmra.mxu2 %v444_v2  ;;  %v660_v53 = vrot.slane %v658_v40, 2  ;;  %v1706_v2 = vld [vmem:[%s2113_s1 + $0x140] sm:$0xff] }
  0x2e   : > { %896 = vmatpush.bf16.msrb.mxu2 %v1721_v54  ;;  %396 = vmatmul.bf16.vlgmr.msra.gmra.mxu1 %v1673_v3  ;;  %v842_v54 = vpack.c.b16 %v840_v41, %v840_v41  ;;  %v1722_v3 = vld [vmem:[%s2113_s1 + $0x1c0] sm:$0xff] }
  0x2f   : > { %802 = vmatpush.bf16.msrb.mxu1 %v1713_v59  ;;  %610 = vmatmul.bf16.vlgmr.msra.gmra.mxu3 %v552_v6  ;;  %v936_v59 = vpack.c.b16 %v934_v46, %v934_v46  ;;  %v661_v63 = vor.u32 %v660_v53, %v657_v52  ;;  %v937_v6 = vrot.slane %v935_v58, 3 }
  0x30   : > { %989 = vmatpush.bf16.msrb.mxu3 %v1729_v60  ;;  %v1698_v60 = vld [vmem:[%s2113_s1 + $0x100] sm:$0xff] }
  0x31   : > { %713 = vmatpush.bf16.msrb.mxu0 %v1704_v0  ;;  %v844_v0 = vrot.slane %v2037_v48, 3 }
  0x32   : > { %897 = vmatpush.bf16.msrb.mxu2 %v1720_v1  ;;  %v845_v1 = vrot.slane %v842_v54, 3 }
  0x33   : > { %803 = vmatpush.bf16.msrb.mxu1 %v1712_v4  ;;  %v750_v4 = vrot.slane %v748_v57, 2 }
  0x34   : > { %990 = vmatpush.bf16.msrb.mxu3 %v1728_v5  ;;  %v751_v5 = vrot.slane %v1922_v35, 2  ;;  %v846_v9 = vsel %vm843_vm2, %v844_v0, %v845_v1  ;;  %v1736_v35 = vld [vmem:[%s2113_s1 + $0x230] sm:$0xff] }
  0x35   : > { %714 = vmatpush.bf16.msrb.mxu0 %v1703_v7  ;;  %v938_v7 = vrot.slane %v936_v59, 3 }
  0x36   : > { %898 = vmatpush.bf16.msrb.mxu2 %v1719_v8  ;;  %v662_v8 = vsel %vm535_vm1, %v653_v62, %v661_v63  ;;  %v752_v10 = vsel %vm749_vm3, %v750_v4, %v751_v5 }
  0x37   : > { %804 = vmatpush.bf16.msrb.mxu1 %v1711_v12  ;;  %v939_v11 = vsel %vm843_vm2, %v937_v6, %v938_v7  ;;  %v1735_v12 = vld [vmem:[%s2113_s1 + $0x228] sm:$0xff] }
  0x38   : > { %991 = vmatpush.bf16.msrb.mxu3 %v1727_v13  ;;  %v1005_v13 = vld [vmem:[%s1889_s28 + $0x8] sm:$0xf] }
  0x39   : > { %715 = vmatpush.bf16.msrb.mxu0 %v1702_v16  ;;  %v1024_v15 = vunpack.c.l.b16 %v1005_v13  ;;  %v1733_v16 = vld [vmem:[%s2113_s1 + $0x218] sm:$0xff] }
  0x3a   : > { %899 = vmatpush.bf16.msrb.mxu2 %v1718_v17 }
  0x3b   : > { %805 = vmatpush.bf16.msrb.mxu1 %v1710_v19  ;;  %v1025_v17 = vpack.c.b16 %v1024_v15, %v1024_v15  ;;  %v1028_v19 = vshrl.u32 %v2037_v48, 16 }
  0x3c   : > { %992 = vmatpush.bf16.msrb.mxu3 %v1726_v20  ;;  %v1031_v20 = vshll.u32 %v2037_v48, 16 }
  0x3d   : > { %716 = vmatpush.bf16.msrb.mxu0 %v1701_v22  ;;  %v1036_v21 = vshrl.u32 %v1025_v17, 16  ;;  %v1039_v22 = vshll.u32 %v1025_v17, 16  ;;  %v1030_v25 = vrot.slane %v1028_v19, 3 }
  0x3e   : > { %900 = vmatpush.bf16.msrb.mxu2 %v1717_v24  ;;  %v1731_v24 = vld [vmem:[%s2113_s1 + $0x208] sm:$0xff]  ;;  %v1033_v26 = vrot.slane %v1031_v20, 4 }
  0x3f   : > { %806 = vmatpush.bf16.msrb.mxu1 %v1709_v28  ;;  %v1038_v27 = vrot.slane %v1036_v21, 3  ;;  %v1041_v28 = vrot.slane %v1039_v22, 4 }
  0x40   : > { %993 = vmatpush.bf16.msrb.mxu3 %v1725_v29  ;;  %v1730_v29 = vld [vmem:[%s2113_s1 + $0x200] sm:$0xff]  ;;  %v1034_v30 = vor.u32 %v1033_v26, %v1030_v25 }
  0x41   : > { %717 = vmatpush.bf16.msrb.mxu0 %v1700_v36  ;;  %v1042_v31 = vor.u32 %v1041_v28, %v1038_v27 }
  0x42   : > { %901 = vmatpush.bf16.msrb.mxu2 %v1716_v37 }
  0x43   : > { %807 = vmatpush.bf16.msrb.mxu1 %v1708_v42  ;;  %v1043_v32 = vsel %vm1026_vm4, %v1034_v30, %v1042_v31 }
  0x44   : > { %994 = vmatpush.bf16.msrb.mxu3 %v1724_v43 }
  0x45   : > { %718 = vmatpush.bf16.msrb.mxu0 %v1699_v49 }
  0x46   : > { %902 = vmatpush.bf16.msrb.mxu2 %v1715_v50 }
  0x47   : > { %808 = vmatpush.bf16.msrb.mxu1 %v1707_v55 }
  0x48   : > { %995 = vmatpush.bf16.msrb.mxu3 %v1723_v56 }
  0x49   : > { %719 = vmatpush.bf16.msrb.mxu0 %v1698_v60 }
  0x4a   : > { %903 = vmatpush.bf16.msrb.mxu2 %v1714_v61 }
  0x4b   : > { %809 = vmatpush.bf16.msrb.mxu1 %v1706_v2 }
  0x4c   : > { %996 = vmatpush.bf16.msrb.mxu3 %v1722_v3  ;;  %720 = vmatmul.bf16.vlgmr.msrb.gmra.mxu0 %v662_v8 }
  0x4d   : > { %1093 = vmatpush.bf16.msra.mxu0 %v1737_v23  ;;  %904 = vmatmul.bf16.vlgmr.msrb.gmra.mxu2 %v846_v9 }
  0x4e   : > { %810 = vmatmul.bf16.vlgmr.msrb.gmra.mxu1 %v752_v10 }
  0x4f   : > { %997 = vmatmul.bf16.vlgmr.msrb.gmra.mxu3 %v939_v11 }
  0x51   : > { %1094 = vmatpush.bf16.msra.mxu0 %v1736_v35 }
  0x55   : > { %1095 = vmatpush.bf16.msra.mxu0 %v1735_v12 }
  0x59   : > { %1096 = vmatpush.bf16.msra.mxu0 %v1734_v14 }
  0x5d   : > { %1097 = vmatpush.bf16.msra.mxu0 %v1733_v16 }
  0x61   : > { %1098 = vmatpush.bf16.msra.mxu0 %v1732_v18 }
  0x65   : > { %1099 = vmatpush.bf16.msra.mxu0 %v1731_v24 }
  0x69   : > { %1100 = vmatpush.bf16.msra.mxu0 %v1730_v29 }
  0x6c   : > { %1101 = vmatmul.bf16.vlgmr.msra.gmra.mxu0 %v1043_v32 }
  0xa9   : > { %v307_v33 = vpop.f32.mrf.mxu0 }
  0xaa   : > { %v312_v40 = vadd.f32 %v1772_v38, %v307_v33 }
  0xab   : > { %v397_v34 = vpop.f32.mrf.mxu1 }
  0xac   : > { %v402_v43 = vadd.f32 %v397_v34, %v312_v40 }
  0xb0   : > { %v503_v36 = vpop.f32.mrf.mxu2 }
  0xb1   : > { %v309_v37 = vpop.f32.mrf.mxu0  ;;  %v508_v47 = vadd.f32 %v503_v36, %v402_v43 }
  0xb2   : > { %v611_v39 = vpop.f32.mrf.mxu3  ;;  %v313_v45 = vadd.f32 %v1772_v38, %v309_v37 }
  0xb3   : > { %v399_v41 = vpop.f32.mrf.mxu1  ;;  %v616_v50 = vadd.f32 %v611_v39, %v508_v47 }
  0xb4   : > { %v403_v48 = vadd.f32 %v399_v41, %v313_v45 }
  0xb8   : > { %v505_v42 = vpop.f32.mrf.mxu2 }
  0xb9   : > { %v509_v52 = vadd.f32 %v505_v42, %v403_v48 }
  0xba   : > { %v613_v46 = vpop.f32.mrf.mxu3 }
  0xbb   : > { %v617_v56 = vadd.f32 %v613_v46, %v509_v52 }
  0xc9   : > { %v721_v44 = vpop.f32.mrf.mxu0 }
  0xca   : > { %v726_v54 = vadd.f32 %v721_v44, %v616_v50 }
  0xcb   : > { %v811_v49 = vpop.f32.mrf.mxu1 }
  0xcc   : > { %v816_v57 = vadd.f32 %v811_v49, %v726_v54 }
  0xd0   : > { %v905_v51 = vpop.f32.mrf.mxu2 }
  0xd1   : > { %v723_v53 = vpop.f32.mrf.mxu0  ;;  %v910_v62 = vadd.f32 %v905_v51, %v816_v57 }
  0xd2   : > { %v998_v55 = vpop.f32.mrf.mxu3  ;;  %v727_v58 = vadd.f32 %v723_v53, %v617_v56 }
  0xd3   : > { %v813_v59 = vpop.f32.mrf.mxu1  ;;  %v1003_v23 = vadd.f32 %v998_v55, %v910_v62 }
  0xd4   : > { %v817_v63 = vadd.f32 %v813_v59, %v727_v58 }
  0xd8   : > { %v907_v60 = vpop.f32.mrf.mxu2 }
  0xd9   : > { %v911_v0 = vadd.f32 %v907_v60, %v817_v63 }
  0xda   : > { %v1000_v1 = vpop.f32.mrf.mxu3 }
  0xdb   : > { %v1004_v2 = vadd.f32 %v1000_v1, %v911_v0 }
  0xe9   : > { %v1102_v61 = vpop.f32.mrf.mxu0 }
  0xea   : > { %v1107_v3 = vadd.f32 %v1102_v61, %v1003_v23 }
  0xec   : > { %v1109_v6 = vmax.f32 %v1107_v3, 0.0 }
  0xf1   : > { %v1104_v4 = vpop.f32.mrf.mxu0 }
  0xf2   : > { %v1108_v5 = vadd.f32 %v1104_v4, %v1004_v2 }
  0xf4   : > { %v1110_v7 = vmax.f32 %v1108_v5, 0.0 }
  0xf6   : > { %v1745_v8 = vpack.c.bf16 %v1110_v7, %v1109_v6 }
  0xf8   : > { %1746 = vst [vmem:[%s221_s8] sm:$0xff] %v1745_v8  }
  0xf9 PF: > { %s13_s14 = sadd.s32 1, %s1795_s14   ;;  %s2116_s12 = smov %s1791_s13 }
  0xfa   : > { %p10_p5 = scmp.ge.s32.totalorder %s13_s14, 4   ;;  %s2117_s13 = smov %s2119_s15 }
  0xfc   :  { %12 = sbr.rel (!%p10_p5) target bundleno = 2 (0x2), region = 77 }

// kernel: repvgg_forward.12
= control target key start
LH: loop header
LB: loop body
LE: loop exit
PB: predicated region body
PF: predicated region fallthrough
CT: control target
= control target key end

     0   :  { %s1677_s12 = smov 0   ;;  %s1679_s13 = smov 0   ;;  %s1964_s0 = inlined_call_operand.vmem [shape: bf16[2,1,24,128], index: 0, kind: input, shape index: {}]   ;;  %s1965_s1 = inlined_call_operand.vmem [shape: bf16[9,128,128], index: 1, kind: input, shape index: {}]   ;;  %s1966_s2 = inlined_call_operand.vmem [shape: f32[1,128], index: 2, kind: input, shape index: {}]   ;;  %s1967_s3 = inlined_call_operand.vmem [shape: bf16[2,8,128], index: 3, kind: output, shape index: {}]  }
   0x1   :  { %s1681_s14 = smov 0  }
   0x2 LB: > { %s25_s15 = sadd.s32 1, %s1651_s13  ;;  %p1114_p0 = scmp.ge.s32.totalorder %s1655_s14, 1  ;;  %s1655_s14 = sphi %s1681_s14, %s13_s14   ;;  %s1651_s13 = sphi %s1679_s13, %s1969_s13   ;;  %s1647_s12 = sphi %s1677_s12, %s1968_s12  }
   0x3   : > { %p27_p1 = scmp.ge.s32.totalorder %s25_s15, 2  ;;  %p168_p2 = scmp.lt.s32.totalorder %s1655_s14, 3 }
   0x5   : > { %s1971_s15 = smov (%p27_p1, %s25_s15), 0  ;;  %p169_p3 = pnand %p1114_p0, %p168_p2 }
   0x6   : > { %p201_p4 = scmp.lt.s32.totalorder (!%p169_p3), %s1647_s12, 1 }
   0x7   : > { %172 = sbr.rel (%p169_p3) target bundleno = 242 (0xf2), region = 32 }
   0xc   : > { %v1542_v0 = vld [vmem:[%s1965_s1 + $0x38] sm:$0xff]  ;;  %v1541_v4 = vld [vmem:[%s1965_s1 + $0x30] sm:$0xff]  ;;  %s1973_s12 = smov (!%p201_p4, %s1647_s12), 1  ;;  %v1540_v8 = vld [vmem:[%s1965_s1 + $0x28] sm:$0xff] }
   0xd   : > { %v1558_v1 = vld [vmem:[%s1965_s1 + $0xb8] sm:$0xff]  ;;  %289 = vmatpush.bf16.msra.mxu0 %v1542_v0  ;;  %v1557_v5 = vld [vmem:[%s1965_s1 + $0xb0] sm:$0xff]  ;;  %v1556_v9 = vld [vmem:[%s1965_s1 + $0xa8] sm:$0xff]  ;;  %s1607_s17 = smul.u32 12, %s1973_s12  ;;  %s1116_s5 = sshll.u32 %s1973_s12, 2 }
   0xe   : > { %v1566_v2 = vld [vmem:[%s1965_s1 + $0xf8] sm:$0xff]  ;;  %468 = vmatpush.bf16.msra.mxu2 %v1558_v1  ;;  %v1565_v6 = vld [vmem:[%s1965_s1 + $0xf0] sm:$0xff]  ;;  %v1564_v10 = vld [vmem:[%s1965_s1 + $0xe8] sm:$0xff]  ;;  %s219_s8 = scalar_lea.vmem %s1967_s3, %s1116_s5 }
   0xf   : > { %v1550_v3 = vld [vmem:[%s1965_s1 + $0x78] sm:$0xff]  ;;  %556 = vmatpush.bf16.msra.mxu3 %v1566_v2  ;;  %v1549_v7 = vld [vmem:[%s1965_s1 + $0x70] sm:$0xff]  ;;  %v1548_v11 = vld [vmem:[%s1965_s1 + $0x68] sm:$0xff]  ;;  %s1749_s28 = scalar_lea.vmem %s1964_s0, %s1607_s17 }
  0x10   : > { %383 = vmatpush.bf16.msra.mxu1 %v1550_v3  ;;  %v1539_v12 = vld [vmem:[%s1965_s1 + $0x20] sm:$0xff]  ;;  %v1538_v16 = vld [vmem:[%s1965_s1 + $0x18] sm:$0xff]  ;;  %v1537_v21 = vld [vmem:[%s1965_s1 + $0x10] sm:$0xff] }
  0x11   : > { %290 = vmatpush.bf16.msra.mxu0 %v1541_v4  ;;  %v1555_v13 = vld [vmem:[%s1965_s1 + $0xa0] sm:$0xff]  ;;  %v1554_v17 = vld [vmem:[%s1965_s1 + $0x98] sm:$0xff]  ;;  %v1553_v22 = vld [vmem:[%s1965_s1 + $0x90] sm:$0xff] }
  0x12   : > { %469 = vmatpush.bf16.msra.mxu2 %v1557_v5  ;;  %v1563_v14 = vld [vmem:[%s1965_s1 + $0xe0] sm:$0xff]  ;;  %v1562_v18 = vld [vmem:[%s1965_s1 + $0xd8] sm:$0xff]  ;;  %v1561_v23 = vld [vmem:[%s1965_s1 + $0xd0] sm:$0xff] }
  0x13   : > { %557 = vmatpush.bf16.msra.mxu3 %v1565_v6  ;;  %v1547_v15 = vld [vmem:[%s1965_s1 + $0x60] sm:$0xff]  ;;  %v1546_v19 = vld [vmem:[%s1965_s1 + $0x58] sm:$0xff]  ;;  %v1545_v25 = vld [vmem:[%s1965_s1 + $0x50] sm:$0xff] }
  0x14   : > { %384 = vmatpush.bf16.msra.mxu1 %v1549_v7  ;;  %v304_v20 = vld [vmem:[%s1749_s28 + $0x4] sm:$0x1]  ;;  %v397_v26 = vld [vmem:[%s1749_s28] sm:$0xe]  ;;  %v1536_v31 = vld [vmem:[%s1965_s1 + $0x8] sm:$0xff] }
  0x15   : > { %291 = vmatpush.bf16.msra.mxu0 %v1540_v8  ;;  %v325_v24 = vunpack.c.l.b16 %v304_v20  ;;  %v1778_v27 = vld [vmem:[%s1749_s28] sm:$0xff]   ;;  %v1552_v32 = vld [vmem:[%s1965_s1 + $0x88] sm:$0xff]  ;;  %v416_v33 = vunpack.c.l.b16 %v397_v26  ;;  %v1574_v43 = vld [vmem:[%s1965_s1 + $0x138] sm:$0xff] }
  0x16   : > { %470 = vmatpush.bf16.msra.mxu2 %v1556_v9  ;;  %v324_v28 = vunpack.c.l.b16 %v1778_v27  ;;  %v1782_v29 = vld [vmem:[%s1749_s28] sm:$0xc]  ;;  %v483_v30 = vld [vmem:[%s1749_s28 + $0x4] sm:$0x3]  ;;  %v1560_v35 = vld [vmem:[%s1965_s1 + $0xc8] sm:$0xff]  ;;  %v848_v9 = vunpack.c.h.b16 %v1778_v27 }
  0x17   : > { %558 = vmatpush.bf16.msra.mxu3 %v1564_v10  ;;  %v1544_v36 = vld [vmem:[%s1965_s1 + $0x48] sm:$0xff]  ;;  %v503_v37 = vunpack.c.l.b16 %v1782_v29  ;;  %v504_v38 = vunpack.c.l.b16 %v483_v30  ;;  %v1535_v40 = vld [vmem:[%s1965_s1] sm:$0xff]  ;;  %v417_v42 = vpack.c.b16 %v325_v24, %v416_v33  ;;  %v1590_v44 = vld [vmem:[%s1965_s1 + $0x1b8] sm:$0xff] }
  0x18   : > { %385 = vmatpush.bf16.msra.mxu1 %v1548_v11  ;;  %v326_v34 = vpack.c.b16 %v325_v24, %v324_v28  ;;  %v1551_v41 = vld [vmem:[%s1965_s1 + $0x80] sm:$0xff]  ;;  %v1598_v50 = vld [vmem:[%s1965_s1 + $0x1f8] sm:$0xff]  ;;  %v1573_v53 = vld [vmem:[%s1965_s1 + $0x130] sm:$0xff] }
  0x19   : > { %292 = vmatpush.bf16.msra.mxu0 %v1539_v12  ;;  %v1559_v45 = vld [vmem:[%s1965_s1 + $0xc0] sm:$0xff]  ;;  %v505_v47 = vpack.c.b16 %v504_v38, %v503_v37  ;;  %v1582_v51 = vld [vmem:[%s1965_s1 + $0x178] sm:$0xff]  ;;  %v418_v52 = vrot.slane %v417_v42, 1  ;;  %v1589_v54 = vld [vmem:[%s1965_s1 + $0x1b0] sm:$0xff] }
  0x1a   : > { %471 = vmatpush.bf16.msra.mxu2 %v1555_v13  ;;  %v330_v39 = vshll.u32 %v326_v34, 16  ;;  %v1543_v46 = vld [vmem:[%s1965_s1 + $0x40] sm:$0xff]  ;;  %v328_v48 = vshrl.u32 %v326_v34, 16  ;;  %v1597_v58 = vld [vmem:[%s1965_s1 + $0x1f0] sm:$0xff]  ;;  %v1572_v60 = vld [vmem:[%s1965_s1 + $0x128] sm:$0xff] }
  0x1b   : > { %559 = vmatpush.bf16.msra.mxu3 %v1563_v14  ;;  %v224_v55 = vld [vmem:[%s1749_s28] sm:$0xf]  ;;  %v506_v56 = vrot.slane %v505_v47, 2  ;;  %v1581_v59 = vld [vmem:[%s1965_s1 + $0x170] sm:$0xff]  ;;  %v1588_v61 = vld [vmem:[%s1965_s1 + $0x1a8] sm:$0xff] }
  0x1c   : > { %386 = vmatpush.bf16.msra.mxu1 %v1547_v15  ;;  %v332_v49 = vrot.slane %v330_v39, 1  ;;  %v1596_v62 = vld [vmem:[%s1965_s1 + $0x1e8] sm:$0xff]  ;;  %v1571_v0 = vld [vmem:[%s1965_s1 + $0x120] sm:$0xff]  ;;  %v1570_v7 = vld [vmem:[%s1965_s1 + $0x118] sm:$0xff] }
  0x1d   : > { %293 = vmatpush.bf16.msra.mxu0 %v1538_v16  ;;  %v1580_v63 = vld [vmem:[%s1965_s1 + $0x168] sm:$0xff]  ;;  %v1587_v1 = vld [vmem:[%s1965_s1 + $0x1a0] sm:$0xff]  ;;  %v1586_v8 = vld [vmem:[%s1965_s1 + $0x198] sm:$0xff] }
  0x1e   : > { %472 = vmatpush.bf16.msra.mxu2 %v1554_v17  ;;  %v333_v57 = vor.u32 %v332_v49, %v328_v48  ;;  %v570_v2 = vld [vmem:[%s1749_s28 + $0x4] sm:$0x7]  ;;  %v1863_v5 = vld [vmem:[%s1749_s28 + $0x8] sm:$0x1]  ;;  %v1594_v11 = vld [vmem:[%s1965_s1 + $0x1d8] sm:$0xff] }
  0x1f   : > { %560 = vmatpush.bf16.msra.mxu3 %v1562_v18  ;;  %v1595_v3 = vld [vmem:[%s1965_s1 + $0x1e0] sm:$0xff]  ;;  %v589_v6 = vunpack.c.l.b16 %v570_v2  ;;  %v849_v10 = vunpack.c.l.b16 %v1863_v5  ;;  %v1578_v12 = vld [vmem:[%s1965_s1 + $0x158] sm:$0xff]  ;;  %v1569_v14 = vld [vmem:[%s1965_s1 + $0x110] sm:$0xff] }
  0x20   : > { %387 = vmatpush.bf16.msra.mxu1 %v1546_v19  ;;  %v1579_v4 = vld [vmem:[%s1965_s1 + $0x160] sm:$0xff]  ;;  %v1585_v15 = vld [vmem:[%s1965_s1 + $0x190] sm:$0xff]  ;;  %v1576_v26 = vld [vmem:[%s1965_s1 + $0x148] sm:$0xff] }
  0x21   : > { %294 = vmatpush.bf16.msra.mxu0 %v1537_v21  ;;  %v590_v13 = vpack.c.b16 %v589_v6, %v503_v37  ;;  %v850_v16 = vpack.c.b16 %v849_v10, %v848_v9  ;;  %v1593_v17 = vld [vmem:[%s1965_s1 + $0x1d0] sm:$0xff]  ;;  %v662_v21 = vld [vmem:[%s1749_s28] sm:$0x8]  ;;  %v747_v39 = vld [vmem:[%s1749_s28 + $0x4] sm:$0xf] }
  0x22   : > { %473 = vmatpush.bf16.msra.mxu2 %v1553_v22  ;;  %v1577_v18 = vld [vmem:[%s1965_s1 + $0x150] sm:$0xff]  ;;  %v1568_v22 = vld [vmem:[%s1965_s1 + $0x108] sm:$0xff]  ;;  %v681_v27 = vunpack.c.l.b16 %v662_v21  ;;  %v1567_v30 = vld [vmem:[%s1965_s1 + $0x100] sm:$0xff] }
  0x23   : > { %561 = vmatpush.bf16.msra.mxu3 %v1561_v23  ;;  %v592_v19 = vshrl.u32 %v590_v13, 16  ;;  %v595_v20 = vshll.u32 %v590_v13, 16  ;;  %v1584_v23 = vld [vmem:[%s1965_s1 + $0x188] sm:$0xff]  ;;  %v854_v24 = vshll.u32 %v850_v16, 16  ;;  %v852_v33 = vshrl.u32 %v850_v16, 16 }
  0x24   : > { %388 = vmatpush.bf16.msra.mxu1 %v1545_v25  ;;  %v1592_v25 = vld [vmem:[%s1965_s1 + $0x1c8] sm:$0xff]  ;;  %v682_v37 = vpack.c.b16 %v589_v6, %v681_v27  ;;  %v921_v47 = vld [vmem:[%s1749_s28 + $0x4] sm:$0xe] }
  0x25   : > { %295 = vmatpush.bf16.msra.mxu0 %v1536_v31  ;;  %v594_v28 = vrot.slane %v592_v19, 2  ;;  %v597_v29 = vrot.slane %v595_v20, 3  ;;  %v1583_v31 = vld [vmem:[%s1965_s1 + $0x180] sm:$0xff]  ;;  %v856_v34 = vrot.slane %v854_v24, 1  ;;  %v940_v48 = vunpack.c.l.b16 %v921_v47  ;;  %v1600_v49 = vld [vmem:[%s1965_s1 + $0x208] sm:$0xff] }
  0x26   : > { %474 = vmatpush.bf16.msra.mxu2 %v1552_v32  ;;  %v1606_v32 = vld [vmem:[%s1965_s1 + $0x238] sm:$0xff]  ;;  %v683_v42 = vrot.slane %v682_v37, 3 }
  0x27   : > { %562 = vmatpush.bf16.msra.mxu3 %v1560_v35  ;;  %v1591_v35 = vld [vmem:[%s1965_s1 + $0x1c0] sm:$0xff]  ;;  %v598_v38 = vor.u32 %v597_v29, %v594_v28 }
  0x28   : > { %389 = vmatpush.bf16.msra.mxu1 %v1544_v36  ;;  %v1575_v36 = vld [vmem:[%s1965_s1 + $0x140] sm:$0xff] }
  0x29   : > { %296 = vmatpush.bf16.msra.mxu0 %v1535_v40  ;;  %v1605_v40 = vld [vmem:[%s1965_s1 + $0x230] sm:$0xff] }
  0x2a   : > { %475 = vmatpush.bf16.msra.mxu2 %v1551_v41  ;;  %v857_v41 = vor.u32 %v856_v34, %v852_v33 }
  0x2b   : > { %563 = vmatpush.bf16.msra.mxu3 %v1559_v45  ;;  %v1602_v45 = vld [vmem:[%s1965_s1 + $0x218] sm:$0xff] }
  0x2c   : > { %390 = vmatpush.bf16.msra.mxu1 %v1543_v46  ;;  %297 = vmatmul.bf16.vlgmr.msra.gmra.mxu0 %v224_v55  ;;  %v1601_v46 = vld [vmem:[%s1965_s1 + $0x210] sm:$0xff] }
  0x2d   : > { %648 = vmatpush.bf16.msrb.mxu0 %v1574_v43  ;;  %476 = vmatmul.bf16.vlgmr.msra.gmra.mxu2 %v418_v52  ;;  %v1604_v43 = vld [vmem:[%s1965_s1 + $0x228] sm:$0xff] }
  0x2e   : > { %813 = vmatpush.bf16.msrb.mxu2 %v1590_v44  ;;  %564 = vmatmul.bf16.vlgmr.msra.gmra.mxu3 %v506_v56  ;;  %v1603_v44 = vld [vmem:[%s1965_s1 + $0x220] sm:$0xff] }
  0x2f   : > { %907 = vmatpush.bf16.msrb.mxu3 %v1598_v50  ;;  %391 = vmatmul.bf16.vlgmr.msra.gmra.mxu1 %v333_v57  ;;  %v941_v50 = vpack.c.b16 %v849_v10, %v940_v48 }
  0x30   : > { %733 = vmatpush.bf16.msrb.mxu1 %v1582_v51  ;;  %v1599_v51 = vld [vmem:[%s1965_s1 + $0x200] sm:$0xff] }
  0x31   : > { %649 = vmatpush.bf16.msrb.mxu0 %v1573_v53  ;;  %v942_v52 = vrot.slane %v941_v50, 1 }
  0x32   : > { %814 = vmatpush.bf16.msrb.mxu2 %v1589_v54 }
  0x33   : > { %908 = vmatpush.bf16.msrb.mxu3 %v1597_v58 }
  0x34   : > { %734 = vmatpush.bf16.msrb.mxu1 %v1581_v59 }
  0x35   : > { %650 = vmatpush.bf16.msrb.mxu0 %v1572_v60 }
  0x36   : > { %815 = vmatpush.bf16.msrb.mxu2 %v1588_v61  ;;  %v1632_v61 = vld [vmem:[%s1966_s2] ss:$0 sm:$0xff] }
  0x37   : > { %909 = vmatpush.bf16.msrb.mxu3 %v1596_v62 }
  0x38   : > { %735 = vmatpush.bf16.msrb.mxu1 %v1580_v63 }
  0x39   : > { %651 = vmatpush.bf16.msrb.mxu0 %v1571_v0 }
  0x3a   : > { %816 = vmatpush.bf16.msrb.mxu2 %v1587_v1 }
  0x3b   : > { %910 = vmatpush.bf16.msrb.mxu3 %v1595_v3 }
  0x3c   : > { %736 = vmatpush.bf16.msrb.mxu1 %v1579_v4 }
  0x3d   : > { %652 = vmatpush.bf16.msrb.mxu0 %v1570_v7 }
  0x3e   : > { %817 = vmatpush.bf16.msrb.mxu2 %v1586_v8 }
  0x3f   : > { %911 = vmatpush.bf16.msrb.mxu3 %v1594_v11 }
  0x40   : > { %737 = vmatpush.bf16.msrb.mxu1 %v1578_v12 }
  0x41   : > { %653 = vmatpush.bf16.msrb.mxu0 %v1569_v14 }
  0x42   : > { %818 = vmatpush.bf16.msrb.mxu2 %v1585_v15 }
  0x43   : > { %912 = vmatpush.bf16.msrb.mxu3 %v1593_v17 }
  0x44   : > { %738 = vmatpush.bf16.msrb.mxu1 %v1577_v18 }
  0x45   : > { %654 = vmatpush.bf16.msrb.mxu0 %v1568_v22 }
  0x46   : > { %819 = vmatpush.bf16.msrb.mxu2 %v1584_v23 }
  0x47   : > { %913 = vmatpush.bf16.msrb.mxu3 %v1592_v25 }
  0x48   : > { %739 = vmatpush.bf16.msrb.mxu1 %v1576_v26 }
  0x49   : > { %655 = vmatpush.bf16.msrb.mxu0 %v1567_v30 }
  0x4a   : > { %820 = vmatpush.bf16.msrb.mxu2 %v1583_v31 }
  0x4b   : > { %914 = vmatpush.bf16.msrb.mxu3 %v1591_v35 }
  0x4c   : > { %740 = vmatpush.bf16.msrb.mxu1 %v1575_v36  ;;  %656 = vmatmul.bf16.vlgmr.msrb.gmra.mxu0 %v598_v38 }
  0x4d   : > { %992 = vmatpush.bf16.msra.mxu0 %v1606_v32  ;;  %821 = vmatmul.bf16.vlgmr.msrb.gmra.mxu2 %v747_v39 }
  0x4e   : > { %915 = vmatmul.bf16.vlgmr.msrb.gmra.mxu3 %v857_v41 }
  0x4f   : > { %741 = vmatmul.bf16.vlgmr.msrb.gmra.mxu1 %v683_v42 }
  0x51   : > { %993 = vmatpush.bf16.msra.mxu0 %v1605_v40 }
  0x55   : > { %994 = vmatpush.bf16.msra.mxu0 %v1604_v43 }
  0x59   : > { %995 = vmatpush.bf16.msra.mxu0 %v1603_v44 }
  0x5d   : > { %996 = vmatpush.bf16.msra.mxu0 %v1602_v45 }
  0x61   : > { %997 = vmatpush.bf16.msra.mxu0 %v1601_v46 }
  0x65   : > { %998 = vmatpush.bf16.msra.mxu0 %v1600_v49 }
  0x69   : > { %999 = vmatpush.bf16.msra.mxu0 %v1599_v51 }
  0x6c   : > { %1000 = vmatmul.bf16.vlgmr.msra.gmra.mxu0 %v942_v52 }
  0xa9   : > { %v298_v53 = vpop.f32.mrf.mxu0 }
  0xaa   : > { %v302_v62 = vadd.f32 %v1632_v61, %v298_v53 }
  0xac   : > { %v392_v54 = vpop.f32.mrf.mxu1 }
  0xad   : > { %v396_v1 = vadd.f32 %v392_v54, %v302_v62 }
  0xb0   : > { %v477_v55 = vpop.f32.mrf.mxu2 }
  0xb1   : > { %v565_v56 = vpop.f32.mrf.mxu3  ;;  %v300_v57 = vpop.f32.mrf.mxu0  ;;  %v481_v3 = vadd.f32 %v477_v55, %v396_v1 }
  0xb3   : > { %v569_v7 = vadd.f32 %v565_v56, %v481_v3 }
  0xb4   : > { %v394_v58 = vpop.f32.mrf.mxu1 }
  0xb8   : > { %v479_v59 = vpop.f32.mrf.mxu2 }
  0xb9   : > { %v567_v60 = vpop.f32.mrf.mxu3 }
  0xc9   : > { %v657_v63 = vpop.f32.mrf.mxu0 }
  0xca   : > { %v661_v9 = vadd.f32 %v657_v63, %v569_v7 }
  0xcc   : > { %v742_v0 = vpop.f32.mrf.mxu1 }
  0xcd   : > { %v746_v11 = vadd.f32 %v742_v0, %v661_v9 }
  0xd0   : > { %v822_v2 = vpop.f32.mrf.mxu2 }
  0xd1   : > { %v916_v4 = vpop.f32.mrf.mxu3  ;;  %v659_v5 = vpop.f32.mrf.mxu0  ;;  %v826_v12 = vadd.f32 %v822_v2, %v746_v11 }
  0xd3   : > { %v920_v13 = vadd.f32 %v916_v4, %v826_v12 }
  0xd4   : > { %v744_v6 = vpop.f32.mrf.mxu1 }
  0xd8   : > { %v824_v8 = vpop.f32.mrf.mxu2 }
  0xd9   : > { %v918_v10 = vpop.f32.mrf.mxu3 }
  0xe9   : > { %v1001_v14 = vpop.f32.mrf.mxu0 }
  0xea   : > { %v1005_v15 = vadd.f32 %v1001_v14, %v920_v13 }
  0xec   : > { %v1006_v16 = vmax.f32 %v1005_v15, 0.0 }
  0xee   : > { %v1007_v17 = vpack.c.bf16 %v1006_v16, %v1006_v16 }
  0xf0   : > { %1008 = vst [vmem:[%s219_s8] sm:$0xf] %v1007_v17 }
  0xf1   : > { %v1003_v18 = vpop.f32.mrf.mxu0 }
  0xf2 PF: > { %s13_s14 = sadd.s32 1, %s1655_s14   ;;  %s1968_s12 = smov %s1651_s13 }
  0xf3   : > { %p10_p5 = scmp.ge.s32.totalorder %s13_s14, 4   ;;  %s1969_s13 = smov %s1971_s15 }
  0xf5   :  { %12 = sbr.rel (!%p10_p5) target bundleno = 2 (0x2), region = 76 }

// kernel: repvgg_forward.15
= control target key start
LH: loop header
LB: loop body
LE: loop exit
PB: predicated region body
PF: predicated region fallthrough
CT: control target
= control target key end

     0   :  { %s194_s0 = inlined_call_operand.vmem [shape: bf16[2,1,128], index: 0, kind: input, shape index: {}]   ;;  %s195_s1 = inlined_call_operand.vmem [shape: f32[128,128], index: 1, kind: input, shape index: {}]   ;;  %s196_s2 = inlined_call_operand.vmem [shape: f32[1,128], index: 2, kind: input, shape index: {}]   ;;  %s197_s3 = inlined_call_operand.hbm [shape: f32[2,128], index: 3, kind: output, shape index: {}]  }
   0x1   :  { %v36_v0 = vld [vmem:[%s195_s1 + $0x78] sm:$0xff]  ;;  %v35_v1 = vld [vmem:[%s195_s1 + $0x70] sm:$0xff]  ;;  %v34_v2 = vld [vmem:[%s195_s1 + $0x68] sm:$0xff] }
   0x2   :  { %48 = vmatpush.msra.mxu0 %v36_v0  ;;  %v33_v3 = vld [vmem:[%s195_s1 + $0x60] sm:$0xff]  ;;  %v32_v4 = vld [vmem:[%s195_s1 + $0x58] sm:$0xff] }
   0x4   :  { %49 = vmatpush.msra.mxu0 %v35_v1 }
   0x6   :  { %50 = vmatpush.msra.mxu0 %v34_v2 }
   0x7   :  { %8 = vsyncpa [#allocation3], 0  ;;  %v31_v5 = vld [vmem:[%s195_s1 + $0x50] sm:$0xff]  ;;  %v30_v6 = vld [vmem:[%s195_s1 + $0x48] sm:$0xff]  ;;  %vm45_vm0 = vcmask 1041409   ;;  %s113_s22 = smov [#allocation2]  }
   0x8   :  { %51 = vmatpush.msra.mxu0 %v33_v3  ;;  %v29_v7 = vld [vmem:[%s195_s1 + $0x40] sm:$0xff]  ;;  %v28_v8 = vld [vmem:[%s195_s1 + $0x38] sm:$0xff]  ;;  %v27_v9 = vld [vmem:[%s195_s1 + $0x30] sm:$0xff]  ;;  %s74_s23 = sshll.u32 %s113_s22, 4  ;;  %s76_s26 = sshll.u32 %s197_s3, 4  ;;  %s75_s23 = int_to_ptr.vmem [resolvable:$true] %s74_s23  ;;  %s77_s26 = int_to_ptr.hbm [resolvable:$true] %s76_s26 }
   0x9   :  { %v26_v10 = vld [vmem:[%s195_s1 + $0x28] sm:$0xff]  ;;  %v15_v11 = vld [vmem:[%s194_s0] sm:$0x1]  ;;  %v16_v12 = vld [vmem:[%s194_s0 + $0x1] sm:$0x1] }
   0xa   :  { %52 = vmatpush.msra.mxu0 %v32_v4  ;;  %v25_v13 = vld [vmem:[%s195_s1 + $0x20] sm:$0xff]  ;;  %v17_v14 = vunpack.c.l.bf16 %v15_v11  ;;  %v18_v15 = vunpack.c.l.bf16 %v16_v12  ;;  %v24_v16 = vld [vmem:[%s195_s1 + $0x18] sm:$0xff]  ;;  %v23_v17 = vld [vmem:[%s195_s1 + $0x10] sm:$0xff] }
   0xb   :  { %v22_v20 = vld [vmem:[%s195_s1 + $0x8] sm:$0xff]  ;;  %v21_v21 = vld [vmem:[%s195_s1] sm:$0xff] }
   0xc   :  { %53 = vmatpush.msra.mxu0 %v31_v5  ;;  %v43_v18 = vperm.slane %v17_v14, 0  ;;  %v44_v19 = vperm.slane %v18_v15, 0  ;;  %v86_v23 = vld [vmem:[%s196_s2] ss:$0 sm:$0xff] }
   0xe   :  { %54 = vmatpush.msra.mxu0 %v30_v6  ;;  %v46_v22 = vsel %vm45_vm0, %v44_v19, %v43_v18 }
  0x10   :  { %55 = vmatpush.msra.mxu0 %v29_v7 }
  0x12   :  { %56 = vmatpush.msra.mxu0 %v28_v8 }
  0x14   :  { %57 = vmatpush.msra.mxu0 %v27_v9 }
  0x16   :  { %58 = vmatpush.msra.mxu0 %v26_v10 }
  0x18   :  { %59 = vmatpush.msra.mxu0 %v25_v13 }
  0x1a   :  { %60 = vmatpush.msra.mxu0 %v24_v16 }
  0x1c   :  { %61 = vmatpush.msra.mxu0 %v23_v17 }
  0x1e   :  { %62 = vmatpush.msra.mxu0 %v22_v20 }
  0x20   :  { %63 = vmatpush.msra.mxu0 %v21_v21 }
  0x21   :  { %64 = vmatmul.f32.vlgmr.msra.gmra.mxu0 %v46_v22 }
  0x9e   :  { %v65_v24 = vpop.f32.mrf.mxu0 }
  0x9f   :  { %v66_v25 = vadd.f32 %v86_v23, %v65_v24 }
  0xa1   :  { %68 = vst [vmem:[#allocation2] sm:$0x3] %v66_v25 }
  0xa2   :  { %79 = dma.vmem_to_hbm [thread:$0]  %s75_s23, 32, %s77_s26, [#allocation3]  }
  0xa3   :  { %111 = dma.done.wait [#allocation3], 32  }
  0xa4   :  { %112 = vsyncadd [#allocation3], 4294967264 }
  0xa5   :  { %84 = vsyncpa [#allocation3], 1 }

// kernel: repvgg_forward.13
= control target key start
LH: loop header
LB: loop body
LE: loop exit
PB: predicated region body
PF: predicated region fallthrough
CT: control target
= control target key end

     0   :  { %s1695_s12 = smov 0   ;;  %s1697_s13 = smov 0   ;;  %s1972_s0 = inlined_call_operand.vmem [shape: bf16[2,2,16,128], index: 0, kind: input, shape index: {}]   ;;  %s1973_s1 = inlined_call_operand.vmem [shape: bf16[9,128,128], index: 1, kind: input, shape index: {}]   ;;  %s1974_s2 = inlined_call_operand.vmem [shape: f32[1,128], index: 2, kind: input, shape index: {}]   ;;  %s1975_s3 = inlined_call_operand.vmem [shape: bf16[2,8,128], index: 3, kind: output, shape index: {}]  }
   0x1   :  { %s1699_s14 = smov 0  }
   0x2 LB: > { %s25_s15 = sadd.s32 1, %s1669_s13  ;;  %p1116_p0 = scmp.ge.s32.totalorder %s1673_s14, 1  ;;  %s1673_s14 = sphi %s1699_s14, %s13_s14   ;;  %s1669_s13 = sphi %s1697_s13, %s1977_s13   ;;  %s1665_s12 = sphi %s1695_s12, %s1976_s12  }
   0x3   : > { %p27_p1 = scmp.ge.s32.totalorder %s25_s15, 2  ;;  %p168_p2 = scmp.lt.s32.totalorder %s1673_s14, 3 }
   0x5   : > { %s1979_s15 = smov (%p27_p1, %s25_s15), 0  ;;  %p169_p3 = pnand %p1116_p0, %p168_p2 }
   0x6   : > { %p201_p4 = scmp.lt.s32.totalorder (!%p169_p3), %s1665_s12, 1 }
   0x7   : > { %172 = sbr.rel (%p169_p3) target bundleno = 242 (0xf2), region = 32 }
   0xc   : > { %v1559_v0 = vld [vmem:[%s1973_s1 + $0x38] sm:$0xff]  ;;  %v1558_v4 = vld [vmem:[%s1973_s1 + $0x30] sm:$0xff]  ;;  %v1557_v8 = vld [vmem:[%s1973_s1 + $0x28] sm:$0xff]  ;;  %s1981_s12 = smov (!%p201_p4, %s1665_s12), 1 }
   0xd   : > { %v1575_v1 = vld [vmem:[%s1973_s1 + $0xb8] sm:$0xff]  ;;  %289 = vmatpush.bf16.msra.mxu0 %v1559_v0  ;;  %v1574_v5 = vld [vmem:[%s1973_s1 + $0xb0] sm:$0xff]  ;;  %v1573_v9 = vld [vmem:[%s1973_s1 + $0xa8] sm:$0xff]  ;;  %s1551_s21 = sshll.u32 %s1981_s12, 4  ;;  %s1119_s5 = sshll.u32 %s1981_s12, 2 }
   0xe   : > { %v1583_v2 = vld [vmem:[%s1973_s1 + $0xf8] sm:$0xff]  ;;  %464 = vmatpush.bf16.msra.mxu2 %v1575_v1  ;;  %v1582_v6 = vld [vmem:[%s1973_s1 + $0xf0] sm:$0xff]  ;;  %v1581_v10 = vld [vmem:[%s1973_s1 + $0xe8] sm:$0xff]  ;;  %s1767_s28 = scalar_lea.vmem %s1972_s0, %s1551_s21  ;;  %s219_s8 = scalar_lea.vmem %s1975_s3, %s1119_s5 }
   0xf   : > { %v1567_v3 = vld [vmem:[%s1973_s1 + $0x78] sm:$0xff]  ;;  %549 = vmatpush.bf16.msra.mxu3 %v1583_v2  ;;  %v1566_v7 = vld [vmem:[%s1973_s1 + $0x70] sm:$0xff]  ;;  %v1565_v11 = vld [vmem:[%s1973_s1 + $0x68] sm:$0xff] }
  0x10   : > { %370 = vmatpush.bf16.msra.mxu1 %v1567_v3  ;;  %v1556_v12 = vld [vmem:[%s1973_s1 + $0x20] sm:$0xff]  ;;  %v1555_v16 = vld [vmem:[%s1973_s1 + $0x18] sm:$0xff]  ;;  %v1554_v24 = vld [vmem:[%s1973_s1 + $0x10] sm:$0xff] }
  0x11   : > { %290 = vmatpush.bf16.msra.mxu0 %v1558_v4  ;;  %v1572_v13 = vld [vmem:[%s1973_s1 + $0xa0] sm:$0xff]  ;;  %v1571_v17 = vld [vmem:[%s1973_s1 + $0x98] sm:$0xff]  ;;  %v1570_v25 = vld [vmem:[%s1973_s1 + $0x90] sm:$0xff] }
  0x12   : > { %465 = vmatpush.bf16.msra.mxu2 %v1574_v5  ;;  %v1580_v14 = vld [vmem:[%s1973_s1 + $0xe0] sm:$0xff]  ;;  %v1579_v18 = vld [vmem:[%s1973_s1 + $0xd8] sm:$0xff]  ;;  %v1578_v26 = vld [vmem:[%s1973_s1 + $0xd0] sm:$0xff] }
  0x13   : > { %550 = vmatpush.bf16.msra.mxu3 %v1582_v6  ;;  %v1564_v15 = vld [vmem:[%s1973_s1 + $0x60] sm:$0xff]  ;;  %v1563_v19 = vld [vmem:[%s1973_s1 + $0x58] sm:$0xff]  ;;  %v1562_v27 = vld [vmem:[%s1973_s1 + $0x50] sm:$0xff] }
  0x14   : > { %371 = vmatpush.bf16.msra.mxu1 %v1566_v7  ;;  %v384_v20 = vld [vmem:[%s1767_s28] sm:$0xf]  ;;  %v385_v21 = vld [vmem:[%s1767_s28 + $0x4] sm:$0x1]  ;;  %v1553_v30 = vld [vmem:[%s1973_s1 + $0x8] sm:$0xff] }
  0x15   : > { %291 = vmatpush.bf16.msra.mxu0 %v1557_v8  ;;  %v405_v22 = vunpack.c.l.b16 %v384_v20  ;;  %v406_v23 = vunpack.c.l.b16 %v385_v21  ;;  %v1796_v29 = vld [vmem:[%s1767_s28] sm:$0xe]  ;;  %v1569_v31 = vld [vmem:[%s1973_s1 + $0x88] sm:$0xff]  ;;  %v1592_v40 = vld [vmem:[%s1973_s1 + $0x138] sm:$0xff] }
  0x16   : > { %466 = vmatpush.bf16.msra.mxu2 %v1573_v9  ;;  %v1577_v33 = vld [vmem:[%s1973_s1 + $0xc8] sm:$0xff]  ;;  %v497_v35 = vunpack.c.l.b16 %v1796_v29  ;;  %v1552_v36 = vld [vmem:[%s1973_s1] sm:$0xff]  ;;  %v1608_v41 = vld [vmem:[%s1973_s1 + $0x1b8] sm:$0xff] }
  0x17   : > { %551 = vmatpush.bf16.msra.mxu3 %v1581_v10  ;;  %v407_v28 = vpack.c.b16 %v406_v23, %v405_v22  ;;  %v1561_v34 = vld [vmem:[%s1973_s1 + $0x48] sm:$0xff]  ;;  %v1568_v37 = vld [vmem:[%s1973_s1 + $0x80] sm:$0xff]  ;;  %v1617_v45 = vld [vmem:[%s1973_s1 + $0x1f8] sm:$0xff] }
  0x18   : > { %372 = vmatpush.bf16.msra.mxu1 %v1565_v11  ;;  %v1576_v42 = vld [vmem:[%s1973_s1 + $0xc0] sm:$0xff]  ;;  %v498_v44 = vpack.c.b16 %v406_v23, %v497_v35  ;;  %v1600_v46 = vld [vmem:[%s1973_s1 + $0x178] sm:$0xff]  ;;  %v1591_v48 = vld [vmem:[%s1973_s1 + $0x130] sm:$0xff] }
  0x19   : > { %292 = vmatpush.bf16.msra.mxu0 %v1556_v12  ;;  %v411_v32 = vshll.u32 %v407_v28, 16  ;;  %v409_v38 = vshrl.u32 %v407_v28, 16  ;;  %v1560_v43 = vld [vmem:[%s1973_s1 + $0x40] sm:$0xff]  ;;  %v1607_v49 = vld [vmem:[%s1973_s1 + $0x1b0] sm:$0xff]  ;;  %v1152_v54 = vld [vmem:[%s1767_s28 + $0x8] sm:$0xf] }
  0x1a   : > { %467 = vmatpush.bf16.msra.mxu2 %v1572_v13  ;;  %v224_v50 = vld [vmem:[%s1767_s28] sm:$0xf]  ;;  %v499_v51 = vrot.slane %v498_v44, 1  ;;  %v1616_v52 = vld [vmem:[%s1973_s1 + $0x1f0] sm:$0xff]  ;;  %v1590_v55 = vld [vmem:[%s1973_s1 + $0x128] sm:$0xff] }
  0x1b   : > { %552 = vmatpush.bf16.msra.mxu3 %v1580_v14  ;;  %v413_v39 = vrot.slane %v411_v32, 1  ;;  %v1599_v53 = vld [vmem:[%s1973_s1 + $0x170] sm:$0xff]  ;;  %v1606_v56 = vld [vmem:[%s1973_s1 + $0x1a8] sm:$0xff]  ;;  %v1589_v59 = vld [vmem:[%s1973_s1 + $0x120] sm:$0xff] }
  0x1c   : > { %373 = vmatpush.bf16.msra.mxu1 %v1564_v15  ;;  %v1615_v57 = vld [vmem:[%s1973_s1 + $0x1e8] sm:$0xff]  ;;  %v1605_v60 = vld [vmem:[%s1973_s1 + $0x1a0] sm:$0xff]  ;;  %v1588_v0 = vld [vmem:[%s1973_s1 + $0x118] sm:$0xff] }
  0x1d   : > { %293 = vmatpush.bf16.msra.mxu0 %v1555_v16  ;;  %v414_v47 = vor.u32 %v413_v39, %v409_v38  ;;  %v1598_v58 = vld [vmem:[%s1973_s1 + $0x168] sm:$0xff]  ;;  %v1614_v61 = vld [vmem:[%s1973_s1 + $0x1e0] sm:$0xff]  ;;  %v1604_v1 = vld [vmem:[%s1973_s1 + $0x198] sm:$0xff] }
  0x1e   : > { %468 = vmatpush.bf16.msra.mxu2 %v1571_v17  ;;  %v1597_v62 = vld [vmem:[%s1973_s1 + $0x160] sm:$0xff]  ;;  %v1613_v3 = vld [vmem:[%s1973_s1 + $0x1d8] sm:$0xff]  ;;  %v1587_v5 = vld [vmem:[%s1973_s1 + $0x110] sm:$0xff] }
  0x1f   : > { %553 = vmatpush.bf16.msra.mxu3 %v1579_v18  ;;  %v651_v63 = vld [vmem:[%s1767_s28 + $0x4] sm:$0x3]  ;;  %v1596_v4 = vld [vmem:[%s1973_s1 + $0x158] sm:$0xff]  ;;  %v1603_v6 = vld [vmem:[%s1973_s1 + $0x190] sm:$0xff] }
  0x20   : > { %374 = vmatpush.bf16.msra.mxu1 %v1563_v19  ;;  %v670_v2 = vunpack.c.l.b16 %v651_v63  ;;  %v743_v7 = vld [vmem:[%s1767_s28] sm:$0xc]  ;;  %v1612_v9 = vld [vmem:[%s1973_s1 + $0x1d0] sm:$0xff]  ;;  %v1586_v11 = vld [vmem:[%s1973_s1 + $0x108] sm:$0xff] }
  0x21   : > { %294 = vmatpush.bf16.msra.mxu0 %v1554_v24  ;;  %v1595_v10 = vld [vmem:[%s1973_s1 + $0x150] sm:$0xff]  ;;  %v762_v12 = vunpack.c.l.b16 %v743_v7  ;;  %v1602_v13 = vld [vmem:[%s1973_s1 + $0x188] sm:$0xff]  ;;  %v1585_v24 = vld [vmem:[%s1973_s1 + $0x100] sm:$0xff] }
  0x22   : > { %469 = vmatpush.bf16.msra.mxu2 %v1570_v25  ;;  %v671_v8 = vpack.c.b16 %v670_v2, %v497_v35  ;;  %v1317_v14 = vld [vmem:[%s1767_s28 + $0x8] sm:$0xe]  ;;  %v1584_v15 = vld [vmem:[%s1767_s28 + $0x8] sm:$0x10]  ;;  %v1601_v25 = vld [vmem:[%s1973_s1 + $0x180] sm:$0xff] }
  0x23   : > { %554 = vmatpush.bf16.msra.mxu3 %v1578_v26  ;;  %v1611_v16 = vld [vmem:[%s1973_s1 + $0x1c8] sm:$0xff]  ;;  %v763_v22 = vpack.c.b16 %v670_v2, %v762_v12  ;;  %v1318_v23 = vor.u32 %v1584_v15, %v1317_v14  ;;  %v1625_v26 = vld [vmem:[%s1973_s1 + $0x238] sm:$0xff]  ;;  %v1610_v28 = vld [vmem:[%s1973_s1 + $0x1c0] sm:$0xff] }
  0x24   : > { %375 = vmatpush.bf16.msra.mxu1 %v1562_v27  ;;  %v1594_v17 = vld [vmem:[%s1973_s1 + $0x148] sm:$0xff]  ;;  %v673_v20 = vshrl.u32 %v671_v8, 16  ;;  %v676_v21 = vshll.u32 %v671_v8, 16  ;;  %v1593_v29 = vld [vmem:[%s1973_s1 + $0x140] sm:$0xff] }
  0x25   : > { %295 = vmatpush.bf16.msra.mxu0 %v1553_v30  ;;  %v1467_v18 = vld [vmem:[%s1767_s28 + $0x8] sm:$0xc]  ;;  %v1609_v19 = vld [vmem:[%s1767_s28 + $0x8] sm:$0x30]  ;;  %v764_v32 = vrot.slane %v763_v22, 2  ;;  %v1622_v39 = vld [vmem:[%s1973_s1 + $0x220] sm:$0xff] }
  0x26   : > { %470 = vmatpush.bf16.msra.mxu2 %v1569_v31  ;;  %v1468_v27 = vor.u32 %v1609_v19, %v1467_v18  ;;  %v675_v30 = vrot.slane %v673_v20, 1  ;;  %v678_v31 = vrot.slane %v676_v21, 2  ;;  %v916_v38 = vld [vmem:[%s1767_s28 + $0x4] sm:$0x7] }
  0x27   : > { %555 = vmatpush.bf16.msra.mxu3 %v1577_v33  ;;  %v587_v33 = vrot.slane %v1318_v23, 1 }
  0x28   : > { %376 = vmatpush.bf16.msra.mxu1 %v1561_v34  ;;  %v1624_v34 = vld [vmem:[%s1973_s1 + $0x230] sm:$0xff]  ;;  %v852_v35 = vrot.slane %v1468_v27, 2 }
  0x29   : > { %296 = vmatpush.bf16.msra.mxu0 %v1552_v36  ;;  %v679_v36 = vor.u32 %v678_v31, %v675_v30 }
  0x2a   : > { %471 = vmatpush.bf16.msra.mxu2 %v1568_v37  ;;  %v1623_v37 = vld [vmem:[%s1973_s1 + $0x228] sm:$0xff] }
  0x2b   : > { %556 = vmatpush.bf16.msra.mxu3 %v1576_v42 }
  0x2c   : > { %377 = vmatpush.bf16.msra.mxu1 %v1560_v43  ;;  %297 = vmatmul.bf16.vlgmr.msra.gmra.mxu0 %v224_v50  ;;  %v1620_v43 = vld [vmem:[%s1973_s1 + $0x210] sm:$0xff] }
  0x2d   : > { %637 = vmatpush.bf16.msrb.mxu0 %v1592_v40  ;;  %472 = vmatmul.bf16.vlgmr.msra.gmra.mxu2 %v414_v47  ;;  %v935_v40 = vunpack.c.l.b16 %v916_v38 }
  0x2e   : > { %814 = vmatpush.bf16.msrb.mxu2 %v1608_v41  ;;  %557 = vmatmul.bf16.vlgmr.msra.gmra.mxu3 %v499_v51  ;;  %v1621_v41 = vld [vmem:[%s1973_s1 + $0x218] sm:$0xff] }
  0x2f   : > { %902 = vmatpush.bf16.msrb.mxu3 %v1617_v45  ;;  %378 = vmatmul.bf16.vlgmr.msra.gmra.mxu1 %v1152_v54  ;;  %v936_v42 = vpack.c.b16 %v935_v40, %v762_v12 }
  0x30   : > { %729 = vmatpush.bf16.msrb.mxu1 %v1600_v46  ;;  %v1619_v46 = vld [vmem:[%s1973_s1 + $0x208] sm:$0xff] }
  0x31   : > { %638 = vmatpush.bf16.msrb.mxu0 %v1591_v48  ;;  %v938_v44 = vshrl.u32 %v936_v42, 16  ;;  %v941_v45 = vshll.u32 %v936_v42, 16 }
  0x32   : > { %815 = vmatpush.bf16.msrb.mxu2 %v1607_v49  ;;  %v1618_v49 = vld [vmem:[%s1973_s1 + $0x200] sm:$0xff] }
  0x33   : > { %903 = vmatpush.bf16.msrb.mxu3 %v1616_v52  ;;  %v940_v47 = vrot.slane %v938_v44, 2  ;;  %v943_v48 = vrot.slane %v941_v45, 3 }
  0x34   : > { %730 = vmatpush.bf16.msrb.mxu1 %v1599_v53 }
  0x35   : > { %639 = vmatpush.bf16.msrb.mxu0 %v1590_v55  ;;  %v944_v50 = vor.u32 %v943_v48, %v940_v47 }
  0x36   : > { %816 = vmatpush.bf16.msrb.mxu2 %v1606_v56 }
  0x37   : > { %904 = vmatpush.bf16.msrb.mxu3 %v1615_v57 }
  0x38   : > { %731 = vmatpush.bf16.msrb.mxu1 %v1598_v58 }
  0x39   : > { %640 = vmatpush.bf16.msrb.mxu0 %v1589_v59  ;;  %v1650_v59 = vld [vmem:[%s1974_s2] ss:$0 sm:$0xff] }
  0x3a   : > { %817 = vmatpush.bf16.msrb.mxu2 %v1605_v60 }
  0x3b   : > { %905 = vmatpush.bf16.msrb.mxu3 %v1614_v61 }
  0x3c   : > { %732 = vmatpush.bf16.msrb.mxu1 %v1597_v62 }
  0x3d   : > { %641 = vmatpush.bf16.msrb.mxu0 %v1588_v0 }
  0x3e   : > { %818 = vmatpush.bf16.msrb.mxu2 %v1604_v1 }
  0x3f   : > { %906 = vmatpush.bf16.msrb.mxu3 %v1613_v3 }
  0x40   : > { %733 = vmatpush.bf16.msrb.mxu1 %v1596_v4 }
  0x41   : > { %642 = vmatpush.bf16.msrb.mxu0 %v1587_v5 }
  0x42   : > { %819 = vmatpush.bf16.msrb.mxu2 %v1603_v6 }
  0x43   : > { %907 = vmatpush.bf16.msrb.mxu3 %v1612_v9 }
  0x44   : > { %734 = vmatpush.bf16.msrb.mxu1 %v1595_v10 }
  0x45   : > { %643 = vmatpush.bf16.msrb.mxu0 %v1586_v11 }
  0x46   : > { %820 = vmatpush.bf16.msrb.mxu2 %v1602_v13 }
  0x47   : > { %908 = vmatpush.bf16.msrb.mxu3 %v1611_v16 }
  0x48   : > { %735 = vmatpush.bf16.msrb.mxu1 %v1594_v17 }
  0x49   : > { %644 = vmatpush.bf16.msrb.mxu0 %v1585_v24 }
  0x4a   : > { %821 = vmatpush.bf16.msrb.mxu2 %v1601_v25 }
  0x4b   : > { %909 = vmatpush.bf16.msrb.mxu3 %v1610_v28 }
  0x4c   : > { %736 = vmatpush.bf16.msrb.mxu1 %v1593_v29  ;;  %645 = vmatmul.bf16.vlgmr.msrb.gmra.mxu0 %v587_v33 }
  0x4d   : > { %994 = vmatpush.bf16.msra.mxu0 %v1625_v26  ;;  %822 = vmatmul.bf16.vlgmr.msrb.gmra.mxu2 %v764_v32 }
  0x4e   : > { %910 = vmatmul.bf16.vlgmr.msrb.gmra.mxu3 %v852_v35 }
  0x4f   : > { %737 = vmatmul.bf16.vlgmr.msrb.gmra.mxu1 %v679_v36 }
  0x51   : > { %995 = vmatpush.bf16.msra.mxu0 %v1624_v34 }
  0x55   : > { %996 = vmatpush.bf16.msra.mxu0 %v1623_v37 }
  0x59   : > { %997 = vmatpush.bf16.msra.mxu0 %v1622_v39 }
  0x5d   : > { %998 = vmatpush.bf16.msra.mxu0 %v1621_v41 }
  0x61   : > { %999 = vmatpush.bf16.msra.mxu0 %v1620_v43 }
  0x65   : > { %1000 = vmatpush.bf16.msra.mxu0 %v1619_v46 }
  0x69   : > { %1001 = vmatpush.bf16.msra.mxu0 %v1618_v49 }
  0x6c   : > { %1002 = vmatmul.bf16.vlgmr.msra.gmra.mxu0 %v944_v50 }
  0xa9   : > { %v298_v51 = vpop.f32.mrf.mxu0 }
  0xaa   : > { %v302_v60 = vadd.f32 %v1650_v59, %v298_v51 }
  0xac   : > { %v379_v52 = vpop.f32.mrf.mxu1 }
  0xad   : > { %v383_v63 = vadd.f32 %v379_v52, %v302_v60 }
  0xb0   : > { %v473_v53 = vpop.f32.mrf.mxu2 }
  0xb1   : > { %v558_v54 = vpop.f32.mrf.mxu3  ;;  %v300_v55 = vpop.f32.mrf.mxu0  ;;  %v477_v1 = vadd.f32 %v473_v53, %v383_v63 }
  0xb3   : > { %v562_v5 = vadd.f32 %v558_v54, %v477_v1 }
  0xb4   : > { %v381_v56 = vpop.f32.mrf.mxu1 }
  0xb8   : > { %v475_v57 = vpop.f32.mrf.mxu2 }
  0xb9   : > { %v560_v58 = vpop.f32.mrf.mxu3 }
  0xc9   : > { %v646_v61 = vpop.f32.mrf.mxu0 }
  0xca   : > { %v650_v7 = vadd.f32 %v646_v61, %v562_v5 }
  0xcc   : > { %v738_v62 = vpop.f32.mrf.mxu1 }
  0xcd   : > { %v742_v9 = vadd.f32 %v738_v62, %v650_v7 }
  0xd0   : > { %v823_v0 = vpop.f32.mrf.mxu2 }
  0xd1   : > { %v911_v2 = vpop.f32.mrf.mxu3  ;;  %v648_v3 = vpop.f32.mrf.mxu0  ;;  %v827_v10 = vadd.f32 %v823_v0, %v742_v9 }
  0xd3   : > { %v915_v11 = vadd.f32 %v911_v2, %v827_v10 }
  0xd4   : > { %v740_v4 = vpop.f32.mrf.mxu1 }
  0xd8   : > { %v825_v6 = vpop.f32.mrf.mxu2 }
  0xd9   : > { %v913_v8 = vpop.f32.mrf.mxu3 }
  0xe9   : > { %v1003_v12 = vpop.f32.mrf.mxu0 }
  0xea   : > { %v1007_v13 = vadd.f32 %v1003_v12, %v915_v11 }
  0xec   : > { %v1008_v14 = vmax.f32 %v1007_v13, 0.0 }
  0xee   : > { %v1009_v15 = vpack.c.bf16 %v1008_v14, %v1008_v14 }
  0xf0   : > { %1010 = vst [vmem:[%s219_s8] sm:$0xf] %v1009_v15 }
  0xf1   : > { %v1005_v16 = vpop.f32.mrf.mxu0 }
  0xf2 PF: > { %s13_s14 = sadd.s32 1, %s1673_s14   ;;  %s1976_s12 = smov %s1669_s13 }
  0xf3   : > { %p10_p5 = scmp.ge.s32.totalorder %s13_s14, 4   ;;  %s1977_s13 = smov %s1979_s15 }
  0xf5   :  { %12 = sbr.rel (!%p10_p5) target bundleno = 2 (0x2), region = 77 }

// kernel: repvgg_forward.14
= control target key start
LH: loop header
LB: loop body
LE: loop exit
PB: predicated region body
PF: predicated region fallthrough
CT: control target
= control target key end

     0   :  { %s1688_s12 = smov 0   ;;  %s1690_s13 = smov 0   ;;  %s1978_s0 = inlined_call_operand.vmem [shape: bf16[2,2,16,128], index: 0, kind: input, shape index: {}]   ;;  %s1979_s1 = inlined_call_operand.vmem [shape: bf16[9,128,128], index: 1, kind: input, shape index: {}]   ;;  %s1980_s2 = inlined_call_operand.vmem [shape: f32[1,128], index: 2, kind: input, shape index: {}]   ;;  %s1981_s3 = inlined_call_operand.vmem [shape: bf16[2,8,128], index: 3, kind: output, shape index: {}]  }
   0x1   :  { %s1692_s14 = smov 0  }
   0x2 LB: > { %s25_s15 = sadd.s32 1, %s1662_s13  ;;  %p1119_p0 = scmp.ge.s32.totalorder %s1666_s14, 1  ;;  %s1666_s14 = sphi %s1692_s14, %s13_s14   ;;  %s1662_s13 = sphi %s1690_s13, %s1983_s13   ;;  %s1658_s12 = sphi %s1688_s12, %s1982_s12  }
   0x3   : > { %p27_p1 = scmp.ge.s32.totalorder %s25_s15, 2  ;;  %p168_p2 = scmp.lt.s32.totalorder %s1666_s14, 3 }
   0x5   : > { %s1985_s15 = smov (%p27_p1, %s25_s15), 0  ;;  %p169_p3 = pnand %p1119_p0, %p168_p2 }
   0x6   : > { %p201_p4 = scmp.lt.s32.totalorder (!%p169_p3), %s1658_s12, 1 }
   0x7   : > { %172 = sbr.rel (%p169_p3) target bundleno = 242 (0xf2), region = 32 }
   0xc   : > { %v1554_v0 = vld [vmem:[%s1979_s1 + $0x38] sm:$0xff]  ;;  %v1553_v4 = vld [vmem:[%s1979_s1 + $0x30] sm:$0xff]  ;;  %v1552_v8 = vld [vmem:[%s1979_s1 + $0x28] sm:$0xff]  ;;  %s1987_s12 = smov (!%p201_p4, %s1658_s12), 1 }
   0xd   : > { %v1570_v1 = vld [vmem:[%s1979_s1 + $0xb8] sm:$0xff]  ;;  %289 = vmatpush.bf16.msra.mxu0 %v1554_v0  ;;  %v1569_v5 = vld [vmem:[%s1979_s1 + $0xb0] sm:$0xff]  ;;  %v1568_v9 = vld [vmem:[%s1979_s1 + $0xa8] sm:$0xff]  ;;  %s1546_s21 = sshll.u32 %s1987_s12, 4  ;;  %s1122_s5 = sshll.u32 %s1987_s12, 2 }
   0xe   : > { %v1578_v2 = vld [vmem:[%s1979_s1 + $0xf8] sm:$0xff]  ;;  %464 = vmatpush.bf16.msra.mxu2 %v1570_v1  ;;  %v1577_v6 = vld [vmem:[%s1979_s1 + $0xf0] sm:$0xff]  ;;  %v1576_v10 = vld [vmem:[%s1979_s1 + $0xe8] sm:$0xff]  ;;  %s1760_s28 = scalar_lea.vmem %s1978_s0, %s1546_s21  ;;  %s219_s8 = scalar_lea.vmem %s1981_s3, %s1122_s5 }
   0xf   : > { %v1562_v3 = vld [vmem:[%s1979_s1 + $0x78] sm:$0xff]  ;;  %558 = vmatpush.bf16.msra.mxu3 %v1578_v2  ;;  %v1561_v7 = vld [vmem:[%s1979_s1 + $0x70] sm:$0xff]  ;;  %v1560_v11 = vld [vmem:[%s1979_s1 + $0x68] sm:$0xff] }
  0x10   : > { %370 = vmatpush.bf16.msra.mxu1 %v1562_v3  ;;  %v1551_v12 = vld [vmem:[%s1979_s1 + $0x20] sm:$0xff]  ;;  %v1550_v16 = vld [vmem:[%s1979_s1 + $0x18] sm:$0xff]  ;;  %v1252_v24 = vld [vmem:[%s1760_s28 + $0x8] sm:$0xf] }
  0x11   : > { %290 = vmatpush.bf16.msra.mxu0 %v1553_v4  ;;  %v1567_v13 = vld [vmem:[%s1979_s1 + $0xa0] sm:$0xff]  ;;  %v1566_v17 = vld [vmem:[%s1979_s1 + $0x98] sm:$0xff]  ;;  %v1549_v25 = vld [vmem:[%s1979_s1 + $0x10] sm:$0xff]  ;;  %v499_v28 = vunpack.c.l.b16 %v1252_v24 }
  0x12   : > { %465 = vmatpush.bf16.msra.mxu2 %v1569_v5  ;;  %v1575_v14 = vld [vmem:[%s1979_s1 + $0xe0] sm:$0xff]  ;;  %v1574_v18 = vld [vmem:[%s1979_s1 + $0xd8] sm:$0xff]  ;;  %v1565_v26 = vld [vmem:[%s1979_s1 + $0x90] sm:$0xff] }
  0x13   : > { %559 = vmatpush.bf16.msra.mxu3 %v1577_v6  ;;  %v1559_v15 = vld [vmem:[%s1979_s1 + $0x60] sm:$0xff]  ;;  %v1558_v19 = vld [vmem:[%s1979_s1 + $0x58] sm:$0xff]  ;;  %v1787_v27 = vld [vmem:[%s1760_s28 + $0xc] sm:$0x1] }
  0x14   : > { %371 = vmatpush.bf16.msra.mxu1 %v1561_v7  ;;  %v384_v20 = vld [vmem:[%s1760_s28] sm:$0xf]  ;;  %v1776_v21 = vld [vmem:[%s1760_s28 + $0x4] sm:$0x1]  ;;  %v1573_v29 = vld [vmem:[%s1979_s1 + $0xd0] sm:$0xff]  ;;  %v500_v32 = vunpack.c.l.b16 %v1787_v27 }
  0x15   : > { %291 = vmatpush.bf16.msra.mxu0 %v1552_v8  ;;  %v405_v22 = vunpack.c.l.b16 %v384_v20  ;;  %v406_v23 = vunpack.c.l.b16 %v1776_v21  ;;  %v1557_v30 = vld [vmem:[%s1979_s1 + $0x50] sm:$0xff]  ;;  %v1548_v34 = vld [vmem:[%s1979_s1 + $0x8] sm:$0xff]  ;;  %v1547_v40 = vld [vmem:[%s1979_s1] sm:$0xff] }
  0x16   : > { %466 = vmatpush.bf16.msra.mxu2 %v1568_v9  ;;  %v501_v33 = vpack.c.b16 %v500_v32, %v499_v28  ;;  %v1564_v35 = vld [vmem:[%s1979_s1 + $0x88] sm:$0xff]  ;;  %v1563_v41 = vld [vmem:[%s1979_s1 + $0x80] sm:$0xff]  ;;  %v1586_v44 = vld [vmem:[%s1979_s1 + $0x138] sm:$0xff] }
  0x17   : > { %560 = vmatpush.bf16.msra.mxu3 %v1576_v10  ;;  %v407_v31 = vpack.c.b16 %v406_v23, %v405_v22  ;;  %v1572_v37 = vld [vmem:[%s1979_s1 + $0xc8] sm:$0xff]  ;;  %v1602_v45 = vld [vmem:[%s1979_s1 + $0x1b8] sm:$0xff]  ;;  %v1571_v46 = vld [vmem:[%s1979_s1 + $0xc0] sm:$0xff] }
  0x18   : > { %372 = vmatpush.bf16.msra.mxu1 %v1560_v11  ;;  %v1556_v38 = vld [vmem:[%s1979_s1 + $0x48] sm:$0xff]  ;;  %v505_v39 = vshll.u32 %v501_v33, 16  ;;  %v1555_v47 = vld [vmem:[%s1979_s1 + $0x40] sm:$0xff]  ;;  %v503_v48 = vshrl.u32 %v501_v33, 16  ;;  %v1610_v50 = vld [vmem:[%s1979_s1 + $0x1f8] sm:$0xff] }
  0x19   : > { %292 = vmatpush.bf16.msra.mxu0 %v1551_v12  ;;  %v411_v36 = vshll.u32 %v407_v31, 16  ;;  %v409_v42 = vshrl.u32 %v407_v31, 16  ;;  %v1594_v51 = vld [vmem:[%s1979_s1 + $0x178] sm:$0xff]  ;;  %v1585_v53 = vld [vmem:[%s1979_s1 + $0x130] sm:$0xff]  ;;  %v224_v55 = vld [vmem:[%s1760_s28] sm:$0xf] }
  0x1a   : > { %467 = vmatpush.bf16.msra.mxu2 %v1567_v13  ;;  %v507_v49 = vrot.slane %v505_v39, 1  ;;  %v1601_v54 = vld [vmem:[%s1979_s1 + $0x1b0] sm:$0xff]  ;;  %v1155_v59 = vld [vmem:[%s1760_s28 + $0x8] sm:$0xf]  ;;  %v1583_v0 = vld [vmem:[%s1979_s1 + $0x120] sm:$0xff] }
  0x1b   : > { %561 = vmatpush.bf16.msra.mxu3 %v1575_v14  ;;  %v413_v43 = vrot.slane %v411_v36, 1  ;;  %v1609_v57 = vld [vmem:[%s1979_s1 + $0x1f0] sm:$0xff]  ;;  %v1584_v60 = vld [vmem:[%s1979_s1 + $0x128] sm:$0xff]  ;;  %v1599_v1 = vld [vmem:[%s1979_s1 + $0x1a0] sm:$0xff] }
  0x1c   : > { %373 = vmatpush.bf16.msra.mxu1 %v1559_v15  ;;  %v508_v56 = vor.u32 %v507_v49, %v503_v48  ;;  %v1593_v58 = vld [vmem:[%s1979_s1 + $0x170] sm:$0xff]  ;;  %v1600_v61 = vld [vmem:[%s1979_s1 + $0x1a8] sm:$0xff]  ;;  %v572_v2 = vld [vmem:[%s1760_s28] sm:$0xe] }
  0x1d   : > { %293 = vmatpush.bf16.msra.mxu0 %v1550_v16  ;;  %v414_v52 = vor.u32 %v413_v43, %v409_v42  ;;  %v1608_v62 = vld [vmem:[%s1979_s1 + $0x1e8] sm:$0xff]  ;;  %v1870_v3 = vld [vmem:[%s1760_s28 + $0x4] sm:$0x3]  ;;  %v591_v8 = vunpack.c.l.b16 %v572_v2  ;;  %v1582_v10 = vld [vmem:[%s1979_s1 + $0x118] sm:$0xff] }
  0x1e   : > { %468 = vmatpush.bf16.msra.mxu2 %v1566_v17  ;;  %v1592_v63 = vld [vmem:[%s1979_s1 + $0x168] sm:$0xff]  ;;  %v1607_v4 = vld [vmem:[%s1979_s1 + $0x1e0] sm:$0xff]  ;;  %v761_v9 = vunpack.c.l.b16 %v1870_v3  ;;  %v1598_v11 = vld [vmem:[%s1979_s1 + $0x198] sm:$0xff] }
  0x1f   : > { %562 = vmatpush.bf16.msra.mxu3 %v1574_v18  ;;  %v1591_v5 = vld [vmem:[%s1979_s1 + $0x160] sm:$0xff]  ;;  %v1350_v6 = vld [vmem:[%s1760_s28 + $0x8] sm:$0xe]  ;;  %v1447_v7 = vld [vmem:[%s1760_s28 + $0xc] sm:$0x3]  ;;  %v592_v36 = vpack.c.b16 %v406_v23, %v591_v8 }
  0x20   : > { %374 = vmatpush.bf16.msra.mxu1 %v1558_v19  ;;  %v676_v12 = vunpack.c.l.b16 %v1350_v6  ;;  %v853_v13 = vunpack.c.l.b16 %v1447_v7  ;;  %v1606_v14 = vld [vmem:[%s1979_s1 + $0x1d8] sm:$0xff]  ;;  %v762_v16 = vpack.c.b16 %v761_v9, %v591_v8  ;;  %v1581_v17 = vld [vmem:[%s1979_s1 + $0x110] sm:$0xff]  ;;  %v1596_v28 = vld [vmem:[%s1979_s1 + $0x188] sm:$0xff] }
  0x21   : > { %294 = vmatpush.bf16.msra.mxu0 %v1549_v25  ;;  %v1590_v15 = vld [vmem:[%s1979_s1 + $0x158] sm:$0xff]  ;;  %v1597_v18 = vld [vmem:[%s1979_s1 + $0x190] sm:$0xff]  ;;  %v1604_v31 = vld [vmem:[%s1979_s1 + $0x1c8] sm:$0xff] }
  0x22   : > { %469 = vmatpush.bf16.msra.mxu2 %v1565_v26  ;;  %v854_v19 = vpack.c.b16 %v853_v13, %v676_v12  ;;  %v1605_v20 = vld [vmem:[%s1979_s1 + $0x1d0] sm:$0xff]  ;;  %v764_v24 = vshrl.u32 %v762_v16, 16  ;;  %v767_v25 = vshll.u32 %v762_v16, 16  ;;  %v1580_v26 = vld [vmem:[%s1979_s1 + $0x108] sm:$0xff]  ;;  %v1618_v39 = vld [vmem:[%s1979_s1 + $0x238] sm:$0xff]  ;;  %v677_v42 = vpack.c.b16 %v500_v32, %v676_v12 }
  0x23   : > { %563 = vmatpush.bf16.msra.mxu3 %v1573_v29  ;;  %v1589_v22 = vld [vmem:[%s1979_s1 + $0x150] sm:$0xff]  ;;  %v1588_v33 = vld [vmem:[%s1979_s1 + $0x148] sm:$0xff]  ;;  %v1603_v21 = vld [vmem:[%s1979_s1 + $0x1c0] sm:$0xff] }
  0x24   : > { %375 = vmatpush.bf16.msra.mxu1 %v1557_v30  ;;  %v856_v29 = vshrl.u32 %v854_v19, 16  ;;  %v859_v30 = vshll.u32 %v854_v19, 16  ;;  %v1587_v23 = vld [vmem:[%s1979_s1 + $0x140] sm:$0xff]  ;;  %v1616_v27 = vld [vmem:[%s1979_s1 + $0x228] sm:$0xff]  ;;  %v1614_v48 = vld [vmem:[%s1979_s1 + $0x218] sm:$0xff] }
  0x25   : > { %295 = vmatpush.bf16.msra.mxu0 %v1548_v34  ;;  %v766_v34 = vrot.slane %v764_v24, 1  ;;  %v1615_v32 = vld [vmem:[%s1979_s1 + $0x220] sm:$0xff]  ;;  %v1613_v49 = vld [vmem:[%s1979_s1 + $0x210] sm:$0xff] }
  0x26   : > { %470 = vmatpush.bf16.msra.mxu2 %v1564_v35  ;;  %v769_v35 = vrot.slane %v767_v25, 2 }
  0x27   : > { %564 = vmatpush.bf16.msra.mxu3 %v1572_v37  ;;  %v1579_v37 = vld [vmem:[%s1979_s1 + $0x100] sm:$0xff] }
  0x28   : > { %376 = vmatpush.bf16.msra.mxu1 %v1556_v38  ;;  %v1595_v38 = vld [vmem:[%s1979_s1 + $0x180] sm:$0xff]  ;;  %v770_v43 = vor.u32 %v769_v35, %v766_v34 }
  0x29   : > { %296 = vmatpush.bf16.msra.mxu0 %v1547_v40  ;;  %v858_v40 = vrot.slane %v856_v29, 1 }
  0x2a   : > { %471 = vmatpush.bf16.msra.mxu2 %v1563_v41  ;;  %v861_v41 = vrot.slane %v859_v30, 2 }
  0x2b   : > { %565 = vmatpush.bf16.msra.mxu3 %v1571_v46 }
  0x2c   : > { %377 = vmatpush.bf16.msra.mxu1 %v1555_v47  ;;  %297 = vmatmul.bf16.vlgmr.msra.gmra.mxu0 %v224_v55  ;;  %v862_v46 = vor.u32 %v861_v41, %v858_v40  ;;  %v678_v47 = vrot.slane %v677_v42, 1 }
  0x2d   : > { %643 = vmatpush.bf16.msrb.mxu0 %v1586_v44  ;;  %472 = vmatmul.bf16.vlgmr.msra.gmra.mxu2 %v414_v52  ;;  %v593_v44 = vrot.slane %v592_v36, 1  ;;  %v1612_v52 = vld [vmem:[%s1979_s1 + $0x208] sm:$0xff] }
  0x2e   : > { %820 = vmatpush.bf16.msrb.mxu2 %v1602_v45  ;;  %566 = vmatmul.bf16.vlgmr.msra.gmra.mxu3 %v508_v56  ;;  %v1617_v45 = vld [vmem:[%s1979_s1 + $0x230] sm:$0xff] }
  0x2f   : > { %912 = vmatpush.bf16.msrb.mxu3 %v1610_v50  ;;  %378 = vmatmul.bf16.vlgmr.msra.gmra.mxu1 %v1155_v59  ;;  %v926_v50 = vld [vmem:[%s1760_s28] sm:$0xc] }
  0x30   : > { %728 = vmatpush.bf16.msrb.mxu1 %v1594_v51  ;;  %v945_v51 = vunpack.c.l.b16 %v926_v50 }
  0x31   : > { %644 = vmatpush.bf16.msrb.mxu0 %v1585_v53 }
  0x32   : > { %821 = vmatpush.bf16.msrb.mxu2 %v1601_v54  ;;  %v946_v53 = vpack.c.b16 %v761_v9, %v945_v51  ;;  %v1611_v54 = vld [vmem:[%s1979_s1 + $0x200] sm:$0xff] }
  0x33   : > { %913 = vmatpush.bf16.msrb.mxu3 %v1609_v57 }
  0x34   : > { %729 = vmatpush.bf16.msrb.mxu1 %v1593_v58  ;;  %v947_v55 = vrot.slane %v946_v53, 2 }
  0x35   : > { %645 = vmatpush.bf16.msrb.mxu0 %v1584_v60 }
  0x36   : > { %822 = vmatpush.bf16.msrb.mxu2 %v1600_v61 }
  0x37   : > { %914 = vmatpush.bf16.msrb.mxu3 %v1608_v62 }
  0x38   : > { %730 = vmatpush.bf16.msrb.mxu1 %v1592_v63 }
  0x39   : > { %646 = vmatpush.bf16.msrb.mxu0 %v1583_v0  ;;  %v1643_v0 = vld [vmem:[%s1980_s2] ss:$0 sm:$0xff] }
  0x3a   : > { %823 = vmatpush.bf16.msrb.mxu2 %v1599_v1 }
  0x3b   : > { %915 = vmatpush.bf16.msrb.mxu3 %v1607_v4 }
  0x3c   : > { %731 = vmatpush.bf16.msrb.mxu1 %v1591_v5 }
  0x3d   : > { %647 = vmatpush.bf16.msrb.mxu0 %v1582_v10 }
  0x3e   : > { %824 = vmatpush.bf16.msrb.mxu2 %v1598_v11 }
  0x3f   : > { %916 = vmatpush.bf16.msrb.mxu3 %v1606_v14 }
  0x40   : > { %732 = vmatpush.bf16.msrb.mxu1 %v1590_v15 }
  0x41   : > { %648 = vmatpush.bf16.msrb.mxu0 %v1581_v17 }
  0x42   : > { %825 = vmatpush.bf16.msrb.mxu2 %v1597_v18 }
  0x43   : > { %917 = vmatpush.bf16.msrb.mxu3 %v1605_v20 }
  0x44   : > { %733 = vmatpush.bf16.msrb.mxu1 %v1589_v22 }
  0x45   : > { %649 = vmatpush.bf16.msrb.mxu0 %v1580_v26 }
  0x46   : > { %826 = vmatpush.bf16.msrb.mxu2 %v1596_v28 }
  0x47   : > { %918 = vmatpush.bf16.msrb.mxu3 %v1604_v31 }
  0x48   : > { %734 = vmatpush.bf16.msrb.mxu1 %v1588_v33 }
  0x49   : > { %650 = vmatpush.bf16.msrb.mxu0 %v1579_v37 }
  0x4a   : > { %827 = vmatpush.bf16.msrb.mxu2 %v1595_v38 }
  0x4b   : > { %919 = vmatpush.bf16.msrb.mxu3 %v1603_v21 }
  0x4c   : > { %735 = vmatpush.bf16.msrb.mxu1 %v1587_v23  ;;  %651 = vmatmul.bf16.vlgmr.msrb.gmra.mxu0 %v593_v44 }
  0x4d   : > { %997 = vmatpush.bf16.msra.mxu0 %v1618_v39  ;;  %828 = vmatmul.bf16.vlgmr.msrb.gmra.mxu2 %v770_v43 }
  0x4e   : > { %920 = vmatmul.bf16.vlgmr.msrb.gmra.mxu3 %v862_v46 }
  0x4f   : > { %736 = vmatmul.bf16.vlgmr.msrb.gmra.mxu1 %v678_v47 }
  0x51   : > { %998 = vmatpush.bf16.msra.mxu0 %v1617_v45 }
  0x55   : > { %999 = vmatpush.bf16.msra.mxu0 %v1616_v27 }
  0x59   : > { %1000 = vmatpush.bf16.msra.mxu0 %v1615_v32 }
  0x5d   : > { %1001 = vmatpush.bf16.msra.mxu0 %v1614_v48 }
  0x61   : > { %1002 = vmatpush.bf16.msra.mxu0 %v1613_v49 }
  0x65   : > { %1003 = vmatpush.bf16.msra.mxu0 %v1612_v52 }
  0x69   : > { %1004 = vmatpush.bf16.msra.mxu0 %v1611_v54 }
  0x6c   : > { %1005 = vmatmul.bf16.vlgmr.msra.gmra.mxu0 %v947_v55 }
  0xa9   : > { %v298_v56 = vpop.f32.mrf.mxu0 }
  0xaa   : > { %v302_v1 = vadd.f32 %v1643_v0, %v298_v56 }
  0xac   : > { %v379_v57 = vpop.f32.mrf.mxu1 }
  0xad   : > { %v383_v4 = vadd.f32 %v379_v57, %v302_v1 }
  0xb0   : > { %v473_v58 = vpop.f32.mrf.mxu2 }
  0xb1   : > { %v567_v59 = vpop.f32.mrf.mxu3  ;;  %v300_v60 = vpop.f32.mrf.mxu0  ;;  %v477_v6 = vadd.f32 %v473_v58, %v383_v4 }
  0xb3   : > { %v571_v10 = vadd.f32 %v567_v59, %v477_v6 }
  0xb4   : > { %v381_v61 = vpop.f32.mrf.mxu1 }
  0xb8   : > { %v475_v62 = vpop.f32.mrf.mxu2 }
  0xb9   : > { %v569_v63 = vpop.f32.mrf.mxu3 }
  0xc9   : > { %v652_v2 = vpop.f32.mrf.mxu0 }
  0xca   : > { %v656_v12 = vadd.f32 %v652_v2, %v571_v10 }
  0xcc   : > { %v737_v3 = vpop.f32.mrf.mxu1 }
  0xcd   : > { %v741_v14 = vadd.f32 %v737_v3, %v656_v12 }
  0xd0   : > { %v829_v5 = vpop.f32.mrf.mxu2 }
  0xd1   : > { %v921_v7 = vpop.f32.mrf.mxu3  ;;  %v654_v8 = vpop.f32.mrf.mxu0  ;;  %v833_v15 = vadd.f32 %v829_v5, %v741_v14 }
  0xd3   : > { %v925_v16 = vadd.f32 %v921_v7, %v833_v15 }
  0xd4   : > { %v739_v9 = vpop.f32.mrf.mxu1 }
  0xd8   : > { %v831_v11 = vpop.f32.mrf.mxu2 }
  0xd9   : > { %v923_v13 = vpop.f32.mrf.mxu3 }
  0xe9   : > { %v1006_v17 = vpop.f32.mrf.mxu0 }
  0xea   : > { %v1010_v18 = vadd.f32 %v1006_v17, %v925_v16 }
  0xec   : > { %v1011_v19 = vmax.f32 %v1010_v18, 0.0 }
  0xee   : > { %v1012_v20 = vpack.c.bf16 %v1011_v19, %v1011_v19 }
  0xf0   : > { %1013 = vst [vmem:[%s219_s8] sm:$0xf] %v1012_v20 }
  0xf1   : > { %v1008_v22 = vpop.f32.mrf.mxu0 }
  0xf2 PF: > { %s13_s14 = sadd.s32 1, %s1666_s14   ;;  %s1982_s12 = smov %s1662_s13 }
  0xf3   : > { %p10_p5 = scmp.ge.s32.totalorder %s13_s14, 4   ;;  %s1983_s13 = smov %s1985_s15 }
  0xf5   :  { %12 = sbr.rel (!%p10_p5) target bundleno = 2 (0x2), region = 77 }

</bundles_post_ra>
